<compile_context>
chip_gen: v7x
topology: tpu7x:2x2x1
jax: 0.10.0
libtpu: 0.0.40
codegen_flags: <defaults>
</compile_context>

<pallas_src>
import functools

import jax
import jax.numpy as jnp
from jax.experimental import pallas as pl
from jax.experimental.pallas import tpu as pltpu

INPUT_DIM = 28 * 28   # 784
H1 = 512
H2 = 128
LATENT_DIM = 2
LATENT_PAD = 128           # lane-friendly padded latent width used inside the kernel
HEAD_DIM = 2 * LATENT_PAD  # fused mu||logvar head width (256)


def _round_up(n, m):
    return ((n + m - 1) // m) * m


def _vae_kernel(x_ref, eps_ref,
                w1_ref, b1_ref, w2_ref, b2_ref,
                whead_ref, bhead_ref,
                w3_ref, b3_ref, w4_ref, b4_ref, w5_ref, b5_ref,
                xrec_ref, mu_ref, lv_ref, *, latent_dim):
    bf16 = jnp.bfloat16
    f32 = jnp.float32
    tb = x_ref.shape[0]

    x = x_ref[...].astype(bf16)                                   # (TB, 784)

    # ---------------- encoder ----------------
    h1 = jnp.maximum(
        jnp.dot(x, w1_ref[...], preferred_element_type=f32) + b1_ref[...],
        0.0)                                                      # (TB, 512) f32
    h2 = jnp.maximum(
        jnp.dot(h1.astype(bf16), w2_ref[...], preferred_element_type=f32)
        + b2_ref[...],
        0.0)                                                      # (TB, 128) f32

    # fused mu||logvar head: one MXU pass, N = 256
    head = (jnp.dot(h2.astype(bf16), whead_ref[...], preferred_element_type=f32)
            + bhead_ref[...])                                     # (TB, 256) f32
    mu = head[:, :LATENT_PAD]          # padded cols (>= latent_dim) are exactly 0
    logvar = head[:, LATENT_PAD:]      # padded cols are exactly 0

    # compact outputs: only the real latent columns ever hit HBM
    mu_ref[...] = mu[:, :latent_dim]
    lv_ref[...] = logvar[:, :latent_dim]

    # ---------------- reparameterize ----------------
    std = jnp.exp(0.5 * logvar)        # padded cols: exp(0) = 1
    # spread the (TB, latent_dim) noise into the 128-lane layout (zeros elsewhere)
    eps_t = eps_ref[...].astype(f32)                              # (TB, latent_dim)
    lane = jax.lax.broadcasted_iota(jnp.int32, (tb, LATENT_PAD), 1)
    eps_full = jnp.zeros((tb, LATENT_PAD), f32)
    for d in range(latent_dim):        # latent_dim is static (== 2)
        eps_full = jnp.where(lane == d, eps_t[:, d:d + 1], eps_full)
    z = mu + eps_full * std            # padded cols: 0 + 0*1 = 0

    # ---------------- decoder ----------------
    # w3 padded rows (>= latent_dim) are zero, so padded z columns are ignored.
    h3 = jnp.maximum(
        jnp.dot(z.astype(bf16), w3_ref[...], preferred_element_type=f32)
        + b3_ref[...],
        0.0)                                                      # (TB, 128)
    h4 = jnp.maximum(
        jnp.dot(h3.astype(bf16), w4_ref[...], preferred_element_type=f32)
        + b4_ref[...],
        0.0)                                                      # (TB, 512)
    logits = (jnp.dot(h4.astype(bf16), w5_ref[...], preferred_element_type=f32)
              + b5_ref[...])                                      # (TB, 784)

    xrec_ref[...] = jax.nn.sigmoid(logits).astype(xrec_ref.dtype)


def init_params(key, latent_dim=LATENT_DIM):
    """Deterministic parameter init. Weights stored as (in, out), biases (1, out)."""
    dims = {
        "1": (INPUT_DIM, H1),
        "2": (H1, H2),
        "mu": (H2, latent_dim),
        "lv": (H2, latent_dim),
        "3": (latent_dim, H2),
        "4": (H2, H1),
        "5": (H1, INPUT_DIM),
    }
    params = {}
    keys = jax.random.split(key, len(dims))
    for (name, (din, dout)), k in zip(dims.items(), keys):
        scale = 1.0 / jnp.sqrt(din)  # mimic nn.Linear's uniform(-1/sqrt(in), 1/sqrt(in))
        kw, kb = jax.random.split(k)
        params[f"w{name}"] = jax.random.uniform(
            kw, (din, dout), jnp.float32, -scale, scale)
        params[f"b{name}"] = jax.random.uniform(
            kb, (1, dout), jnp.float32, -scale, scale)
    return params


def prepare_params(params, latent_dim=LATENT_DIM, compute_dtype=jnp.bfloat16):
    """One-time prep: pad latent-facing params, fuse mu/logvar heads, cast to bf16.

    Done once (outside the forward path) so no pad/scatter/cast ops sit on the
    per-call critical path.
    """
    f32 = jnp.float32

    whead = jnp.zeros((H2, HEAD_DIM), f32)
    whead = whead.at[:, :latent_dim].set(params["wmu"])
    whead = whead.at[:, LATENT_PAD:LATENT_PAD + latent_dim].set(params["wlv"])
    bhead = jnp.zeros((1, HEAD_DIM), f32)
    bhead = bhead.at[:, :latent_dim].set(params["bmu"])
    bhead = bhead.at[:, LATENT_PAD:LATENT_PAD + latent_dim].set(params["blv"])

    w3 = jnp.zeros((LATENT_PAD, H2), f32).at[:latent_dim, :].set(params["w3"])

    return {
        "w1": params["w1"].astype(compute_dtype), "b1": params["b1"].astype(f32),
        "w2": params["w2"].astype(compute_dtype), "b2": params["b2"].astype(f32),
        "whead": whead.astype(compute_dtype), "bhead": bhead.astype(f32),
        "w3": w3.astype(compute_dtype), "b3": params["b3"].astype(f32),
        "w4": params["w4"].astype(compute_dtype), "b4": params["b4"].astype(f32),
        "w5": params["w5"].astype(compute_dtype), "b5": params["b5"].astype(f32),
    }


def _pick_batch_tile(B, block_b):
    """Tile multiple of 8, <= block_b, >= 2 grid steps when possible, and
    preferably dividing B so no wrapper-side batch pad is needed."""
    tb_cap = max(8, _round_up(pl.cdiv(B, 2), 8))   # keep >= 2 grid steps
    tb = max(8, min(block_b, tb_cap))
    tb = max(8, (tb // 8) * 8)
    if B % tb != 0:
        for cand in range(tb, 0, -8):
            if B % cand == 0:
                return cand
    return tb


@functools.partial(jax.jit, static_argnames=("latent_dim", "block_b"))
def vae_forward(x, eps, prepped, latent_dim=LATENT_DIM, block_b=512):
    """Fused VAE forward.

    x:   (B, 784) float32 or bfloat16 (bf16 recommended: halves input DMA)
    eps: (B, latent_dim) float32 standard-normal noise (reparameterization)
    prepped: output of prepare_params()
    returns: (x_recon (B,784) bf16, mu (B,latent_dim) f32, logvar (B,latent_dim) f32)
    """
    f32 = jnp.float32
    B = x.shape[0]

    TB = _pick_batch_tile(B, block_b)
    B_pad = _round_up(B, TB)
    if B_pad != B:   # only when B is not a multiple of 8 (rare)
        x = jnp.pad(x, ((0, B_pad - B), (0, 0)))
        eps = jnp.pad(eps, ((0, B_pad - B), (0, 0)))

    grid = (B_pad // TB,)

    act_spec = lambda feat: pl.BlockSpec((TB, feat), lambda i: (i, 0))
    res_spec = lambda shape: pl.BlockSpec(shape, lambda i: (0, 0))  # resident block

    in_specs = [
        act_spec(INPUT_DIM),                 # x
        act_spec(latent_dim),                # eps (un-padded, spread in-kernel)
        res_spec((INPUT_DIM, H1)),           # w1
        res_spec((1, H1)),                   # b1
        res_spec((H1, H2)),                  # w2
        res_spec((1, H2)),                   # b2
        res_spec((H2, HEAD_DIM)),            # whead (fused mu||logvar)
        res_spec((1, HEAD_DIM)),             # bhead
        res_spec((LATENT_PAD, H2)),          # w3 (padded rows >= latent_dim are 0)
        res_spec((1, H2)),                   # b3
        res_spec((H2, H1)),                  # w4
        res_spec((1, H1)),                   # b4
        res_spec((H1, INPUT_DIM)),           # w5
        res_spec((1, INPUT_DIM)),            # b5
    ]
    out_specs = (
        act_spec(INPUT_DIM),                 # x_recon (bf16)
        act_spec(latent_dim),                # mu      (f32, compact)
        act_spec(latent_dim),                # logvar  (f32, compact)
    )
    out_shape = (
        jax.ShapeDtypeStruct((B_pad, INPUT_DIM), jnp.bfloat16),
        jax.ShapeDtypeStruct((B_pad, latent_dim), f32),
        jax.ShapeDtypeStruct((B_pad, latent_dim), f32),
    )

    # advisory cost model so XLA can schedule neighbours against this call
    flops = 2 * B_pad * (INPUT_DIM * H1 + H1 * H2 + H2 * HEAD_DIM
                         + LATENT_PAD * H2 + H2 * H1 + H1 * INPUT_DIM)
    transcendentals = B_pad * (LATENT_PAD + INPUT_DIM)      # exp(std) + sigmoid
    weight_bytes = sum(int(v.size) * v.dtype.itemsize for v in prepped.values())
    bytes_accessed = (B_pad * INPUT_DIM * x.dtype.itemsize          # x in
                      + B_pad * latent_dim * eps.dtype.itemsize     # eps in
                      + weight_bytes                                # resident params
                      + B_pad * INPUT_DIM * 2                       # x_recon out (bf16)
                      + 2 * B_pad * latent_dim * 4)                 # mu, logvar out

    kernel = functools.partial(_vae_kernel, latent_dim=latent_dim)

    xrec, mu, logvar = pl.pallas_call(
        kernel,
        out_shape=out_shape,
        grid=grid,
        in_specs=in_specs,
        out_specs=out_specs,
        compiler_params=pltpu.CompilerParams(
            dimension_semantics=("parallel",),   # megacore-shard batch on v7x
            vmem_limit_bytes=48 << 20,           # headroom for TB up to 512
        ),
        cost_estimate=pl.CostEstimate(
            flops=flops,
            transcendentals=transcendentals,
            bytes_accessed=bytes_accessed),
    )(
        x, eps,
        prepped["w1"], prepped["b1"],
        prepped["w2"], prepped["b2"],
        prepped["whead"], prepped["bhead"],
        prepped["w3"], prepped["b3"],
        prepped["w4"], prepped["b4"],
        prepped["w5"], prepped["b5"],
    )

    return xrec[:B], mu[:B], logvar[:B]


def vae_forward_ref(x, eps, params):
    """Pure-JAX f32 reference (mirrors the PyTorch forward exactly)."""
    relu = lambda v: jnp.maximum(v, 0.0)
    h1 = relu(x @ params["w1"] + params["b1"])
    h2 = relu(h1 @ params["w2"] + params["b2"])
    mu = h2 @ params["wmu"] + params["bmu"]
    logvar = h2 @ params["wlv"] + params["blv"]
    std = jnp.exp(0.5 * logvar)
    z = mu + eps * std
    h3 = relu(z @ params["w3"] + params["b3"])
    h4 = relu(h3 @ params["w4"] + params["b4"])
    x_recon = jax.nn.sigmoid(h4 @ params["w5"] + params["b5"])
    return x_recon, mu, logvar


if __name__ == "__main__":
    key = jax.random.PRNGKey(0)
    k_params, k_x, k_eps = jax.random.split(key, 3)

    B = 256  # two 128-row batch tiles (>= 2 grid steps) -> exercises pipelining
    params = init_params(k_params, LATENT_DIM)
    prepped = prepare_params(params, LATENT_DIM)

    # "dataset stored in bf16": cast once at data prep, not on the call path.
    x_f32 = jax.random.uniform(k_x, (B, INPUT_DIM), jnp.float32)   # MNIST-like [0,1)
    x = x_f32.astype(jnp.bfloat16)
    eps = jax.random.normal(k_eps, (B, LATENT_DIM), jnp.float32)   # reparam noise
    # TODO(synk): torch.randn_like's internal RNG is passed in explicitly as eps
    # (could be generated in-kernel with pltpu.prng_* at the cost of bitwise
    # reproducibility vs. this reference).

    x_recon, mu, logvar = vae_forward(x, eps, prepped)
    jax.block_until_ready((x_recon, mu, logvar))

    # correctness check vs pure-JAX f32 reference (kernel uses bf16 weights /
    # bf16 input / bf16 output with f32 accumulation -> small absolute deviation)
    xr_ref, mu_ref, lv_ref = vae_forward_ref(x.astype(jnp.float32), eps, params)
    assert x_recon.shape == (B, INPUT_DIM) and x_recon.dtype == jnp.bfloat16
    assert mu.shape == (B, LATENT_DIM) and logvar.shape == (B, LATENT_DIM)
    xr = x_recon.astype(jnp.float32)
    assert bool(jnp.all(jnp.isfinite(xr)))
    assert jnp.allclose(xr, xr_ref, atol=3e-2), float(jnp.max(jnp.abs(xr - xr_ref)))
    assert jnp.allclose(mu, mu_ref, atol=3e-2), float(jnp.max(jnp.abs(mu - mu_ref)))
    assert jnp.allclose(logvar, lv_ref, atol=3e-2), float(jnp.max(jnp.abs(logvar - lv_ref)))

    print("KERNEL_OK")
</pallas_src>

<mosaic_0001>
module attributes {stable_mosaic.version = 11 : i64} {
  func.func @_vae_kernel(%arg0: i32, %arg1: memref<128x784xbf16, #tpu.memory_space<vmem>>, %arg2: memref<128x2xf32, #tpu.memory_space<vmem>>, %arg3: memref<784x512xbf16, #tpu.memory_space<vmem>>, %arg4: memref<1x512xf32, #tpu.memory_space<vmem>>, %arg5: memref<512x128xbf16, #tpu.memory_space<vmem>>, %arg6: memref<1x128xf32, #tpu.memory_space<vmem>>, %arg7: memref<128x256xbf16, #tpu.memory_space<vmem>>, %arg8: memref<1x256xf32, #tpu.memory_space<vmem>>, %arg9: memref<128x128xbf16, #tpu.memory_space<vmem>>, %arg10: memref<1x128xf32, #tpu.memory_space<vmem>>, %arg11: memref<128x512xbf16, #tpu.memory_space<vmem>>, %arg12: memref<1x512xf32, #tpu.memory_space<vmem>>, %arg13: memref<512x784xbf16, #tpu.memory_space<vmem>>, %arg14: memref<1x784xf32, #tpu.memory_space<vmem>>, %arg15: memref<128x784xbf16, #tpu.memory_space<vmem>>, %arg16: memref<128x2xf32, #tpu.memory_space<vmem>>, %arg17: memref<128x2xf32, #tpu.memory_space<vmem>>) attributes {dimension_semantics = [#tpu.dimension_semantics<parallel>], iteration_bounds = array<i64: 2>, scalar_prefetch = 0 : i64, scratch_operands = 0 : i64, tpu.core_type = #tpu.core_type<tc>, window_params = [{transform_indices = @transform_0, window_bounds = array<i64: 128, 784>}, {transform_indices = @transform_1, window_bounds = array<i64: 128, 2>}, {pipeline_mode = #tpu.pipeline_mode<synchronous>, transform_indices = @transform_2, window_bounds = array<i64: 784, 512>}, {pipeline_mode = #tpu.pipeline_mode<synchronous>, transform_indices = @transform_3, window_bounds = array<i64: 1, 512>}, {pipeline_mode = #tpu.pipeline_mode<synchronous>, transform_indices = @transform_4, window_bounds = array<i64: 512, 128>}, {pipeline_mode = #tpu.pipeline_mode<synchronous>, transform_indices = @transform_5, window_bounds = array<i64: 1, 128>}, {pipeline_mode = #tpu.pipeline_mode<synchronous>, transform_indices = @transform_6, window_bounds = array<i64: 128, 256>}, {pipeline_mode = #tpu.pipeline_mode<synchronous>, transform_indices = @transform_7, window_bounds = array<i64: 1, 256>}, {pipeline_mode = #tpu.pipeline_mode<synchronous>, transform_indices = @transform_8, window_bounds = array<i64: 128, 128>}, {pipeline_mode = #tpu.pipeline_mode<synchronous>, transform_indices = @transform_9, window_bounds = array<i64: 1, 128>}, {pipeline_mode = #tpu.pipeline_mode<synchronous>, transform_indices = @transform_10, window_bounds = array<i64: 128, 512>}, {pipeline_mode = #tpu.pipeline_mode<synchronous>, transform_indices = @transform_11, window_bounds = array<i64: 1, 512>}, {pipeline_mode = #tpu.pipeline_mode<synchronous>, transform_indices = @transform_12, window_bounds = array<i64: 512, 784>}, {pipeline_mode = #tpu.pipeline_mode<synchronous>, transform_indices = @transform_13, window_bounds = array<i64: 1, 784>}, {transform_indices = @transform_14, window_bounds = array<i64: 128, 784>}, {transform_indices = @transform_15, window_bounds = array<i64: 128, 2>}, {transform_indices = @transform_16, window_bounds = array<i64: 128, 2>}]} {
    %c0 = arith.constant 0 : index
    %c0_0 = arith.constant 0 : index
    %0 = vector.load %arg1[%c0, %c0_0] : memref<128x784xbf16, #tpu.memory_space<vmem>>, vector<128x784xbf16>
    %c0_1 = arith.constant 0 : index
    %c0_2 = arith.constant 0 : index
    %1 = vector.load %arg3[%c0_1, %c0_2] : memref<784x512xbf16, #tpu.memory_space<vmem>>, vector<784x512xbf16>
    %cst = arith.constant dense<0.000000e+00> : vector<128x512xf32>
    %2 = tpu.matmul %0, %1, %cst {dimension_numbers = #tpu.dot_dimension_numbers<[1], [0], [0], [1], [0, 0, 1, 1], [], []>} : vector<128x784xbf16>, vector<784x512xbf16>, vector<128x512xf32> -> vector<128x512xf32>
    %c0_3 = arith.constant 0 : index
    %c0_4 = arith.constant 0 : index
    %3 = vector.load %arg4[%c0_3, %c0_4] : memref<1x512xf32, #tpu.memory_space<vmem>>, vector<1x512xf32>
    %4 = vector.broadcast %3 : vector<1x512xf32> to vector<128x512xf32>
    %5 = arith.addf %2, %4 : vector<128x512xf32>
    %cst_5 = arith.constant 0.000000e+00 : f32
    %6 = vector.broadcast %cst_5 : f32 to vector<128x512xf32>
    %7 = arith.maximumf %5, %6 : vector<128x512xf32>
    %8 = arith.truncf %7 : vector<128x512xf32> to vector<128x512xbf16>
    %c0_6 = arith.constant 0 : index
    %c0_7 = arith.constant 0 : index
    %9 = vector.load %arg5[%c0_6, %c0_7] : memref<512x128xbf16, #tpu.memory_space<vmem>>, vector<512x128xbf16>
    %cst_8 = arith.constant dense<0.000000e+00> : vector<128x128xf32>
    %10 = tpu.matmul %8, %9, %cst_8 {dimension_numbers = #tpu.dot_dimension_numbers<[1], [0], [0], [1], [0, 0, 1, 1], [], []>} : vector<128x512xbf16>, vector<512x128xbf16>, vector<128x128xf32> -> vector<128x128xf32>
    %c0_9 = arith.constant 0 : index
    %c0_10 = arith.constant 0 : index
    %11 = vector.load %arg6[%c0_9, %c0_10] : memref<1x128xf32, #tpu.memory_space<vmem>>, vector<1x128xf32>
    %12 = vector.broadcast %11 : vector<1x128xf32> to vector<128x128xf32>
    %13 = arith.addf %10, %12 : vector<128x128xf32>
    %cst_11 = arith.constant 0.000000e+00 : f32
    %14 = vector.broadcast %cst_11 : f32 to vector<128x128xf32>
    %15 = arith.maximumf %13, %14 : vector<128x128xf32>
    %16 = arith.truncf %15 : vector<128x128xf32> to vector<128x128xbf16>
    %c0_12 = arith.constant 0 : index
    %c0_13 = arith.constant 0 : index
    %17 = vector.load %arg7[%c0_12, %c0_13] : memref<128x256xbf16, #tpu.memory_space<vmem>>, vector<128x256xbf16>
    %cst_14 = arith.constant dense<0.000000e+00> : vector<128x256xf32>
    %18 = tpu.matmul %16, %17, %cst_14 {dimension_numbers = #tpu.dot_dimension_numbers<[1], [0], [0], [1], [0, 0, 1, 1], [], []>} : vector<128x128xbf16>, vector<128x256xbf16>, vector<128x256xf32> -> vector<128x256xf32>
    %c0_15 = arith.constant 0 : index
    %c0_16 = arith.constant 0 : index
    %19 = vector.load %arg8[%c0_15, %c0_16] : memref<1x256xf32, #tpu.memory_space<vmem>>, vector<1x256xf32>
    %20 = vector.broadcast %19 : vector<1x256xf32> to vector<128x256xf32>
    %21 = arith.addf %18, %20 : vector<128x256xf32>
    %22 = vector.extract_strided_slice %21 {offsets = [0, 0], sizes = [128, 128], strides = [1, 1]} : vector<128x256xf32> to vector<128x128xf32>
    %23 = vector.extract_strided_slice %21 {offsets = [0, 128], sizes = [128, 128], strides = [1, 1]} : vector<128x256xf32> to vector<128x128xf32>
    %24 = vector.extract_strided_slice %22 {offsets = [0, 0], sizes = [128, 2], strides = [1, 1]} : vector<128x128xf32> to vector<128x2xf32>
    %c0_17 = arith.constant 0 : index
    %c0_18 = arith.constant 0 : index
    %25 = vector.load %arg16[%c0_17, %c0_18] : memref<128x2xf32, #tpu.memory_space<vmem>>, vector<128x2xf32>
    tpu.vector_store %arg16[%c0_17, %c0_18], %24 {strides = array<i32>} : memref<128x2xf32, #tpu.memory_space<vmem>>, vector<128x2xf32>,
    %26 = vector.extract_strided_slice %23 {offsets = [0, 0], sizes = [128, 2], strides = [1, 1]} : vector<128x128xf32> to vector<128x2xf32>
    %c0_19 = arith.constant 0 : index
    %c0_20 = arith.constant 0 : index
    %27 = vector.load %arg17[%c0_19, %c0_20] : memref<128x2xf32, #tpu.memory_space<vmem>>, vector<128x2xf32>
    tpu.vector_store %arg17[%c0_19, %c0_20], %26 {strides = array<i32>} : memref<128x2xf32, #tpu.memory_space<vmem>>, vector<128x2xf32>,
    %cst_21 = arith.constant 5.000000e-01 : f32
    %28 = vector.broadcast %cst_21 : f32 to vector<128x128xf32>
    %29 = arith.mulf %28, %23 : vector<128x128xf32>
    %30 = math.exp %29 : vector<128x128xf32>
    %c0_22 = arith.constant 0 : index
    %c0_23 = arith.constant 0 : index
    %31 = vector.load %arg2[%c0_22, %c0_23] : memref<128x2xf32, #tpu.memory_space<vmem>>, vector<128x2xf32>
    %32 = tpu.iota {dimensions = array<i32: 1>} : vector<128x128xi32>
    %cst_24 = arith.constant 0.000000e+00 : f32
    %33 = vector.broadcast %cst_24 : f32 to vector<128x128xf32>
    %c0_i32 = arith.constant 0 : i32
    %34 = vector.broadcast %c0_i32 : i32 to vector<128x128xi32>
    %35 = arith.cmpi eq, %32, %34 : vector<128x128xi32>
    %36 = vector.extract_strided_slice %31 {offsets = [0, 0], sizes = [128, 1], strides = [1, 1]} : vector<128x2xf32> to vector<128x1xf32>
    %37 = vector.shape_cast %36 : vector<128x1xf32> to vector<128x1xf32>
    %38 = vector.broadcast %37 : vector<128x1xf32> to vector<128x128xf32>
    %39 = arith.select %35, %38, %33 : vector<128x128xi1>, vector<128x128xf32>
    %c1_i32 = arith.constant 1 : i32
    %40 = vector.broadcast %c1_i32 : i32 to vector<128x128xi32>
    %41 = arith.cmpi eq, %32, %40 : vector<128x128xi32>
    %42 = vector.extract_strided_slice %31 {offsets = [0, 1], sizes = [128, 1], strides = [1, 1]} : vector<128x2xf32> to vector<128x1xf32>
    %43 = vector.shape_cast %42 : vector<128x1xf32> to vector<128x1xf32>
    %44 = vector.broadcast %43 : vector<128x1xf32> to vector<128x128xf32>
    %45 = arith.select %41, %44, %39 : vector<128x128xi1>, vector<128x128xf32>
    %46 = arith.mulf %45, %30 : vector<128x128xf32>
    %47 = arith.addf %22, %46 : vector<128x128xf32>
    %48 = arith.truncf %47 : vector<128x128xf32> to vector<128x128xbf16>
    %c0_25 = arith.constant 0 : index
    %c0_26 = arith.constant 0 : index
    %49 = vector.load %arg9[%c0_25, %c0_26] : memref<128x128xbf16, #tpu.memory_space<vmem>>, vector<128x128xbf16>
    %cst_27 = arith.constant dense<0.000000e+00> : vector<128x128xf32>
    %50 = tpu.matmul %48, %49, %cst_27 {dimension_numbers = #tpu.dot_dimension_numbers<[1], [0], [0], [1], [0, 0, 1, 1], [], []>} : vector<128x128xbf16>, vector<128x128xbf16>, vector<128x128xf32> -> vector<128x128xf32>
    %c0_28 = arith.constant 0 : index
    %c0_29 = arith.constant 0 : index
    %51 = vector.load %arg10[%c0_28, %c0_29] : memref<1x128xf32, #tpu.memory_space<vmem>>, vector<1x128xf32>
    %52 = vector.broadcast %51 : vector<1x128xf32> to vector<128x128xf32>
    %53 = arith.addf %50, %52 : vector<128x128xf32>
    %cst_30 = arith.constant 0.000000e+00 : f32
    %54 = vector.broadcast %cst_30 : f32 to vector<128x128xf32>
    %55 = arith.maximumf %53, %54 : vector<128x128xf32>
    %56 = arith.truncf %55 : vector<128x128xf32> to vector<128x128xbf16>
    %c0_31 = arith.constant 0 : index
    %c0_32 = arith.constant 0 : index
    %57 = vector.load %arg11[%c0_31, %c0_32] : memref<128x512xbf16, #tpu.memory_space<vmem>>, vector<128x512xbf16>
    %cst_33 = arith.constant dense<0.000000e+00> : vector<128x512xf32>
    %58 = tpu.matmul %56, %57, %cst_33 {dimension_numbers = #tpu.dot_dimension_numbers<[1], [0], [0], [1], [0, 0, 1, 1], [], []>} : vector<128x128xbf16>, vector<128x512xbf16>, vector<128x512xf32> -> vector<128x512xf32>
    %c0_34 = arith.constant 0 : index
    %c0_35 = arith.constant 0 : index
    %59 = vector.load %arg12[%c0_34, %c0_35] : memref<1x512xf32, #tpu.memory_space<vmem>>, vector<1x512xf32>
    %60 = vector.broadcast %59 : vector<1x512xf32> to vector<128x512xf32>
    %61 = arith.addf %58, %60 : vector<128x512xf32>
    %cst_36 = arith.constant 0.000000e+00 : f32
    %62 = vector.broadcast %cst_36 : f32 to vector<128x512xf32>
    %63 = arith.maximumf %61, %62 : vector<128x512xf32>
    %64 = arith.truncf %63 : vector<128x512xf32> to vector<128x512xbf16>
    %c0_37 = arith.constant 0 : index
    %c0_38 = arith.constant 0 : index
    %65 = vector.load %arg13[%c0_37, %c0_38] : memref<512x784xbf16, #tpu.memory_space<vmem>>, vector<512x784xbf16>
    %cst_39 = arith.constant dense<0.000000e+00> : vector<128x784xf32>
    %66 = tpu.matmul %64, %65, %cst_39 {dimension_numbers = #tpu.dot_dimension_numbers<[1], [0], [0], [1], [0, 0, 1, 1], [], []>} : vector<128x512xbf16>, vector<512x784xbf16>, vector<128x784xf32> -> vector<128x784xf32>
    %c0_40 = arith.constant 0 : index
    %c0_41 = arith.constant 0 : index
    %67 = vector.load %arg14[%c0_40, %c0_41] : memref<1x784xf32, #tpu.memory_space<vmem>>, vector<1x784xf32>
    %68 = vector.broadcast %67 : vector<1x784xf32> to vector<128x784xf32>
    %69 = arith.addf %66, %68 : vector<128x784xf32>
    %70 = arith.negf %69 : vector<128x784xf32>
    %71 = math.exp %70 : vector<128x784xf32>
    %cst_42 = arith.constant 1.000000e+00 : f32
    %72 = vector.broadcast %cst_42 : f32 to vector<128x784xf32>
    %73 = arith.addf %72, %71 : vector<128x784xf32>
    %74 = arith.divf %72, %73 : vector<128x784xf32>
    %75 = arith.truncf %74 : vector<128x784xf32> to vector<128x784xbf16>
    %c0_43 = arith.constant 0 : index
    %c0_44 = arith.constant 0 : index
    %76 = vector.load %arg15[%c0_43, %c0_44] : memref<128x784xbf16, #tpu.memory_space<vmem>>, vector<128x784xbf16>
    tpu.vector_store %arg15[%c0_43, %c0_44], %75 {strides = array<i32>} : memref<128x784xbf16, #tpu.memory_space<vmem>>, vector<128x784xbf16>,
    return
  }
  func.func @transform_0(%arg0: i32) -> (i32, i32) {
    %c0_i32 = arith.constant 0 : i32
    %c0_i32_0 = arith.constant 0 : i32
    return %arg0, %c0_i32 : i32, i32
  }
  func.func @transform_1(%arg0: i32) -> (i32, i32) {
    %c0_i32 = arith.constant 0 : i32
    %c0_i32_0 = arith.constant 0 : i32
    return %arg0, %c0_i32 : i32, i32
  }
  func.func @transform_2(%arg0: i32) -> (i32, i32) {
    %c0_i32 = arith.constant 0 : i32
    %c0_i32_0 = arith.constant 0 : i32
    %c0_i32_1 = arith.constant 0 : i32
    return %c0_i32, %c0_i32_0 : i32, i32
  }
  func.func @transform_3(%arg0: i32) -> (i32, i32) {
    %c0_i32 = arith.constant 0 : i32
    %c0_i32_0 = arith.constant 0 : i32
    %c0_i32_1 = arith.constant 0 : i32
    return %c0_i32, %c0_i32_0 : i32, i32
  }
  func.func @transform_4(%arg0: i32) -> (i32, i32) {
    %c0_i32 = arith.constant 0 : i32
    %c0_i32_0 = arith.constant 0 : i32
    %c0_i32_1 = arith.constant 0 : i32
    return %c0_i32, %c0_i32_0 : i32, i32
  }
  func.func @transform_5(%arg0: i32) -> (i32, i32) {
    %c0_i32 = arith.constant 0 : i32
    %c0_i32_0 = arith.constant 0 : i32
    %c0_i32_1 = arith.constant 0 : i32
    return %c0_i32, %c0_i32_0 : i32, i32
  }
  func.func @transform_6(%arg0: i32) -> (i32, i32) {
    %c0_i32 = arith.constant 0 : i32
    %c0_i32_0 = arith.constant 0 : i32
    %c0_i32_1 = arith.constant 0 : i32
    return %c0_i32, %c0_i32_0 : i32, i32
  }
  func.func @transform_7(%arg0: i32) -> (i32, i32) {
    %c0_i32 = arith.constant 0 : i32
    %c0_i32_0 = arith.constant 0 : i32
    %c0_i32_1 = arith.constant 0 : i32
    return %c0_i32, %c0_i32_0 : i32, i32
  }
  func.func @transform_8(%arg0: i32) -> (i32, i32) {
    %c0_i32 = arith.constant 0 : i32
    %c0_i32_0 = arith.constant 0 : i32
    %c0_i32_1 = arith.constant 0 : i32
    return %c0_i32, %c0_i32_0 : i32, i32
  }
  func.func @transform_9(%arg0: i32) -> (i32, i32) {
    %c0_i32 = arith.constant 0 : i32
    %c0_i32_0 = arith.constant 0 : i32
    %c0_i32_1 = arith.constant 0 : i32
    return %c0_i32, %c0_i32_0 : i32, i32
  }
  func.func @transform_10(%arg0: i32) -> (i32, i32) {
    %c0_i32 = arith.constant 0 : i32
    %c0_i32_0 = arith.constant 0 : i32
    %c0_i32_1 = arith.constant 0 : i32
    return %c0_i32, %c0_i32_0 : i32, i32
  }
  func.func @transform_11(%arg0: i32) -> (i32, i32) {
    %c0_i32 = arith.constant 0 : i32
    %c0_i32_0 = arith.constant 0 : i32
    %c0_i32_1 = arith.constant 0 : i32
    return %c0_i32, %c0_i32_0 : i32, i32
  }
  func.func @transform_12(%arg0: i32) -> (i32, i32) {
    %c0_i32 = arith.constant 0 : i32
    %c0_i32_0 = arith.constant 0 : i32
    %c0_i32_1 = arith.constant 0 : i32
    return %c0_i32, %c0_i32_0 : i32, i32
  }
  func.func @transform_13(%arg0: i32) -> (i32, i32) {
    %c0_i32 = arith.constant 0 : i32
    %c0_i32_0 = arith.constant 0 : i32
    %c0_i32_1 = arith.constant 0 : i32
    return %c0_i32, %c0_i32_0 : i32, i32
  }
  func.func @transform_14(%arg0: i32) -> (i32, i32) {
    %c0_i32 = arith.constant 0 : i32
    %c0_i32_0 = arith.constant 0 : i32
    return %arg0, %c0_i32 : i32, i32
  }
  func.func @transform_15(%arg0: i32) -> (i32, i32) {
    %c0_i32 = arith.constant 0 : i32
    %c0_i32_0 = arith.constant 0 : i32
    return %arg0, %c0_i32 : i32, i32
  }
  func.func @transform_16(%arg0: i32) -> (i32, i32) {
    %c0_i32 = arith.constant 0 : i32
    %c0_i32_0 = arith.constant 0 : i32
    return %arg0, %c0_i32 : i32, i32
  }
}

</mosaic_0001>

<bundles_post_ra>
// kernel: vae_forward.1
= control target key start
LH: loop header
LB: loop body
LE: loop exit
PB: predicated region body
PF: predicated region fallthrough
CT: control target
= control target key end

     0   :  { %s11462_s21 = smov 0   ;;  %s14610_s0 = inlined_call_operand.vmem [shape: bf16[256,784], index: 0, kind: input, shape index: {}]   ;;  %s14611_s1 = inlined_call_operand.vmem [shape: f32[256,2], index: 1, kind: input, shape index: {}]   ;;  %s14612_s2 = inlined_call_operand.vmem [shape: bf16[784,512], index: 2, kind: input, shape index: {}]   ;;  %s14613_s3 = inlined_call_operand.vmem [shape: f32[1,512], index: 3, kind: input, shape index: {}]   ;;  %s14614_s4 = inlined_call_operand.vmem [shape: bf16[512,128], index: 4, kind: input, shape index: {}]   ;;  %s14615_s5 = inlined_call_operand.vmem [shape: f32[1,128], index: 5, kind: input, shape index: {}]   ;;  %s14616_s6 = inlined_call_operand.vmem [shape: bf16[128,256], index: 6, kind: input, shape index: {}]   ;;  %s14617_s7 = inlined_call_operand.vmem [shape: f32[1,256], index: 7, kind: input, shape index: {}]   ;;  %s14618_s8 = inlined_call_operand.vmem [shape: bf16[128,128], index: 8, kind: input, shape index: {}]   ;;  %s14619_s9 = inlined_call_operand.vmem [shape: f32[1,128], index: 9, kind: input, shape index: {}]   ;;  %s14620_s10 = inlined_call_operand.vmem [shape: bf16[128,512], index: 10, kind: input, shape index: {}]   ;;  %s14621_s11 = inlined_call_operand.vmem [shape: f32[1,512], index: 11, kind: input, shape index: {}]   ;;  %s14622_s12 = inlined_call_operand.vmem [shape: bf16[512,784], index: 12, kind: input, shape index: {}]   ;;  %s14623_s13 = inlined_call_operand.vmem [shape: f32[1,784], index: 13, kind: input, shape index: {}]   ;;  %s14624_s14 = inlined_call_operand.vmem [shape: bf16[256,784], index: 14, kind: output, shape index: {0}]   ;;  %s14625_s15 = inlined_call_operand.vmem [shape: f32[256,2], index: 15, kind: output, shape index: {1}]   ;;  %s14626_s16 = inlined_call_operand.vmem [shape: f32[256,2], index: 16, kind: output, shape index: {2}]  }
   0x1   :  { %14627 = sst [smem:[#allocation2_spill]] %s14610_s0 }
   0x2 LB: > { %s8438_s22 = sadd.s32 4294967295, %s11373_s21   ;;  %p8442_p0 = scmp.ge.s32.totalorder %s11373_s21, 1  ;;  %s11373_s21 = sphi %s11462_s21, %s27_s21  }
   0x3   : > { %p480_p1 = scmp.lt.s32.totalorder %s11373_s21, 3 }
   0x5   : > { %p481_p2 = pnand %p8442_p0, %p480_p1 }
   0x6   : > { %v10072_v0 = vld [vmem:[%s14612_s2 + $0x4] ss:$16 sps:$4 sm:$0xff] (!%p481_p2)   ;;  %s8443_s25 = sshll.u32 (!%p481_p2), %s8438_s22, 4  ;;  %v10074_v1 = vld [vmem:[%s14612_s2] ss:$16 sps:$4 sm:$0xff] (!%p481_p2)   ;;  %v11375_v2 = vmov (!%p481_p2), 0  }
   0x7   : > { %484 = sbr.rel (%p481_p2) target bundleno = 1922 (0x782), region = 76  ;;  %2518 = vmatprep.mubr.bf16.mxu1 (!%p481_p2), %v11375_v2  ;;  %p548_p3 = scmp.lt.s32.totalorder (!%p481_p2), %s8443_s25, 31  ;;  %10059 = vset.pattern.permute.xlu1 (!%p481_p2), %v11375_v2  ;;  %v10075_v3 = vld [vmem:[%s14612_s2 + $0x24] ss:$16 sps:$4 sm:$0xff] (!%p481_p2)   ;;  %v10079_v5 = vld [vmem:[%s14612_s2 + $0x20] ss:$16 sps:$4 sm:$0xff] (!%p481_p2)  }
   0x8   : > { %2147 = vmatprep.subr.bf16.mxu0 (!%p481_p2), %v10072_v0  ;;  %10058 = vset.pattern.permute.xlu0 (!%p481_p2), %v11375_v2  ;;  %v10077_v4 = vld [vmem:[%s14612_s2 + $0x604] ss:$16 sps:$4 sm:$0xff] (!%p481_p2)   ;;  %v10080_v6 = vld [vmem:[%s14612_s2 + $0x600] ss:$16 sps:$4 sm:$0xff] (!%p481_p2)   ;;  %v10084_v8 = vld [vmem:[%s14612_s2 + $0x8] ss:$16 sps:$4 sm:$0xff] (!%p481_p2)  }
   0x9   : > { %2148 = vmatpush1.bf16.msra.mxu0 (!%p481_p2), %v10074_v1  ;;  %v10081_v7 = vld [vmem:[%s14612_s2 + $0x44] ss:$16 sps:$4 sm:$0xff] (!%p481_p2)   ;;  %2486 = vmatprep.subr.bf16.mxu1 (!%p481_p2), %v10077_v4  ;;  %v10086_v9 = vld [vmem:[%s14612_s2 + $0xc] ss:$16 sps:$4 sm:$0xff] (!%p481_p2)   ;;  %v10087_v10 = vld [vmem:[%s14612_s2 + $0x40] ss:$16 sps:$4 sm:$0xff] (!%p481_p2)  }
   0xa   : > { %2149 = vmatprep.subr.bf16.mxu0 (!%p481_p2), %v10075_v3  ;;  %2487 = vmatpush1.bf16.msra.mxu1 (!%p481_p2), %v10080_v6  ;;  %s14628_s19 = sld [smem:[#allocation2_spill]] (!%p481_p2)  ;;  %vm2122_vm0 = vcmask (!%p481_p2), 130048   ;;  %v10088_v11 = vld [vmem:[%s14612_s2 + $0x64] ss:$16 sps:$4 sm:$0xff] (!%p481_p2)   ;;  %v10092_v12 = vld [vmem:[%s14612_s2 + $0x2c] ss:$16 sps:$4 sm:$0xff] (!%p481_p2)  }
   0xb   : > { %2599 = vmatprep.subr.bf16.mxu1 (!%p481_p2), %v10086_v9  ;;  %v10090_v14 = vld [vmem:[%s14612_s2 + $0x28] ss:$16 sps:$4 sm:$0xff] (!%p481_p2)   ;;  %v10093_v15 = vld [vmem:[%s14612_s2 + $0x60] ss:$16 sps:$4 sm:$0xff] (!%p481_p2)   ;;  %v10094_v16 = vld [vmem:[%s14612_s2 + $0x84] ss:$16 sps:$4 sm:$0xff] (!%p481_p2)  }
   0xc   : > { %v10099_v17 = vld [vmem:[%s14612_s2 + $0x4c] ss:$16 sps:$4 sm:$0xff] (!%p481_p2)   ;;  %v10100_v19 = vld [vmem:[%s14612_s2 + $0x80] ss:$16 sps:$4 sm:$0xff] (!%p481_p2)   ;;  %v10097_v20 = vld [vmem:[%s14612_s2 + $0x48] ss:$16 sps:$4 sm:$0xff] (!%p481_p2)  }
   0xd   : > { %2150 = vmatpush1.bf16.msra.mxu0 (!%p481_p2), %v10079_v5  ;;  %v10101_v21 = vld [vmem:[%s14612_s2 + $0xa4] ss:$16 sps:$4 sm:$0xff] (!%p481_p2)   ;;  %v10105_v22 = vld [vmem:[%s14612_s2 + $0x6c] ss:$16 sps:$4 sm:$0xff] (!%p481_p2)   ;;  %v10103_v23 = vld [vmem:[%s14612_s2 + $0x68] ss:$16 sps:$4 sm:$0xff] (!%p481_p2)  }
   0xe   : > { %s14630_s25 = smov (!%p548_p3, %s8443_s25), 31  ;;  %2151 = vmatprep.subr.bf16.mxu0 %v10081_v7  ;;  %v10106_v24 = vld [vmem:[%s14612_s2 + $0xa0] ss:$16 sps:$4 sm:$0xff]   ;;  %v10107_v25 = vld [vmem:[%s14612_s2 + $0xc4] ss:$16 sps:$4 sm:$0xff]   ;;  %vm3849_vm1 = vcmask 15360  }
   0xf   : > { %s10047_s24 = smul.u32 28, %s14630_s25  ;;  %v10112_v26 = vld [vmem:[%s14612_s2 + $0x8c] ss:$16 sps:$4 sm:$0xff]   ;;  %v10110_v28 = vld [vmem:[%s14612_s2 + $0x88] ss:$16 sps:$4 sm:$0xff]   ;;  %s12564_s27 = sshll.u32 %s14630_s25, 3 }
  0x10   : > { %v10113_v29 = vld [vmem:[%s14612_s2 + $0xc0] ss:$16 sps:$4 sm:$0xff]   ;;  %v10114_v30 = vld [vmem:[%s14612_s2 + $0xe4] ss:$16 sps:$4 sm:$0xff]   ;;  %v10118_v31 = vld [vmem:[%s14612_s2 + $0xac] ss:$16 sps:$4 sm:$0xff]   ;;  %s12573_s0 = scalar_lea.vmem %s14611_s1, %s12564_s27  ;;  %s12776_s26 = scalar_lea.vmem %s14626_s16, %s12564_s27 }
  0x11   : > { %s11511_s20 = scalar_lea.vmem %s14628_s19, %s10047_s24  ;;  %2152 = vmatpush1.bf16.msra.mxu0 %v10087_v10  ;;  %v10119_v32 = vld [vmem:[%s14612_s2 + $0xe0] ss:$16 sps:$4 sm:$0xff]   ;;  %v10116_v33 = vld [vmem:[%s14612_s2 + $0xa8] ss:$16 sps:$4 sm:$0xff]   ;;  %v10120_v34 = vld [vmem:[%s14612_s2 + $0x104] ss:$16 sps:$4 sm:$0xff]   ;;  %s12767_s19 = scalar_lea.vmem %s14625_s15, %s12564_s27 }
  0x12   : > { %v10083_v13 = vld [vmem:[%s11511_s20 + $0x18] ss:$28 sps:$4 sm:$0xff]   ;;  %2153 = vmatprep.subr.bf16.mxu0 %v10088_v11  ;;  %v10096_v18 = vld [vmem:[%s11511_s20 + $0x50] ss:$28 sps:$4 sm:$0xff]   ;;  %v10109_v27 = vld [vmem:[%s11511_s20 + $0x88] ss:$28 sps:$4 sm:$0xff]   ;;  %s14191_s30 = scalar_lea.vmem %s14624_s14, %s10047_s24 }
  0x13   : > { %8705 = vmatmul.mubr.msk.bf16.vlgmr.msra.gmra.mrb[0].mxu1 %vm2122_vm0, %v10083_v13  ;;  %v10125_v35 = vld [vmem:[%s14612_s2 + $0xcc] ss:$16 sps:$4 sm:$0xff]   ;;  %v10126_v37 = vld [vmem:[%s14612_s2 + $0x100] ss:$16 sps:$4 sm:$0xff]   ;;  %v10123_v38 = vld [vmem:[%s14612_s2 + $0xc8] ss:$16 sps:$4 sm:$0xff]  }
  0x14   : > { %2600 = vmatpush1.bf16.msra.mxu1 %v10084_v8  ;;  %2528 = vmatprep.mubr.bf16.mxu1 %v11375_v2  ;;  %v10122_v36 = vld [vmem:[%s11511_s20 + $0xc0] ss:$28 sps:$4 sm:$0xff]   ;;  %v10127_v39 = vld [vmem:[%s14612_s2 + $0x124] ss:$16 sps:$4 sm:$0xff]   ;;  %v10129_v41 = vld [vmem:[%s14612_s2 + $0xe8] ss:$16 sps:$4 sm:$0xff]  }
  0x15   : > { %2601 = vmatprep.subr.bf16.mxu1 %v10092_v12  ;;  %2154 = vmatpush1.bf16.msra.mxu0 %v10093_v15  ;;  %v10131_v40 = vld [vmem:[%s14612_s2 + $0xec] ss:$16 sps:$4 sm:$0xff]   ;;  %v10132_v42 = vld [vmem:[%s14612_s2 + $0x120] ss:$16 sps:$4 sm:$0xff]   ;;  %v10133_v43 = vld [vmem:[%s14612_s2 + $0x144] ss:$16 sps:$4 sm:$0xff]  }
  0x16   : > { %2155 = vmatprep.subr.bf16.mxu0 %v10094_v16  ;;  %v10138_v44 = vld [vmem:[%s14612_s2 + $0x10c] ss:$16 sps:$4 sm:$0xff]   ;;  %v10135_v45 = vld [vmem:[%s11511_s20 + $0xf8] ss:$28 sps:$4 sm:$0xff]   ;;  %v10139_v47 = vld [vmem:[%s14612_s2 + $0x140] ss:$16 sps:$4 sm:$0xff]  }
  0x17   : > { %v10136_v46 = vld [vmem:[%s14612_s2 + $0x108] ss:$16 sps:$4 sm:$0xff]   ;;  %v10140_v48 = vld [vmem:[%s14612_s2 + $0x164] ss:$16 sps:$4 sm:$0xff]   ;;  %v10144_v49 = vld [vmem:[%s14612_s2 + $0x12c] ss:$16 sps:$4 sm:$0xff]  }
  0x18   : > { %2602 = vmatpush1.bf16.msra.mxu1 %v10090_v14  ;;  %v10142_v50 = vld [vmem:[%s14612_s2 + $0x128] ss:$16 sps:$4 sm:$0xff]   ;;  %v10145_v51 = vld [vmem:[%s14612_s2 + $0x160] ss:$16 sps:$4 sm:$0xff]   ;;  %v10146_v52 = vld [vmem:[%s14612_s2 + $0x184] ss:$16 sps:$4 sm:$0xff]  }
  0x19   : > { %2603 = vmatprep.subr.bf16.mxu1 %v10099_v17  ;;  %2156 = vmatpush1.bf16.msra.mxu0 %v10100_v19  ;;  %v10151_v53 = vld [vmem:[%s14612_s2 + $0x14c] ss:$16 sps:$4 sm:$0xff]   ;;  %v10149_v55 = vld [vmem:[%s14612_s2 + $0x148] ss:$16 sps:$4 sm:$0xff]   ;;  %v10152_v56 = vld [vmem:[%s14612_s2 + $0x180] ss:$16 sps:$4 sm:$0xff]  }
  0x1a   : > { %2157 = vmatprep.subr.bf16.mxu0 %v10101_v21  ;;  %v10148_v54 = vld [vmem:[%s11511_s20 + $0x130] ss:$28 sps:$4 sm:$0xff]   ;;  %v10153_v57 = vld [vmem:[%s14612_s2 + $0x1a4] ss:$16 sps:$4 sm:$0xff]   ;;  %v10155_v59 = vld [vmem:[%s14612_s2 + $0x168] ss:$16 sps:$4 sm:$0xff]  }
  0x1b   : > { %8706 = vmatmul.mubr.msk.bf16.gmra.mrb[4].mxu1 %vm2122_vm0, %v10096_v18  ;;  %v10157_v58 = vld [vmem:[%s14612_s2 + $0x16c] ss:$16 sps:$4 sm:$0xff]   ;;  %v10174_v60 = vld [vmem:[%s11511_s20 + $0x4] ss:$28 sps:$4 sm:$0xff]   ;;  %v10162_v1 = vld [vmem:[%s14612_s2 + $0x188] ss:$16 sps:$4 sm:$0xff]  }
  0x1c   : > { %2604 = vmatpush1.bf16.msra.mxu1 %v10097_v20  ;;  %2538 = vmatprep.mubr.bf16.mxu1 %v11375_v2  ;;  %v10158_v61 = vld [vmem:[%s14612_s2 + $0x1a0] ss:$16 sps:$4 sm:$0xff]   ;;  %v10159_v62 = vld [vmem:[%s14612_s2 + $0x1c4] ss:$16 sps:$4 sm:$0xff]   ;;  %v10164_v63 = vld [vmem:[%s14612_s2 + $0x18c] ss:$16 sps:$4 sm:$0xff]  }
  0x1d   : > { %2605 = vmatprep.subr.bf16.mxu1 %v10105_v22  ;;  %2158 = vmatpush1.bf16.msra.mxu0 %v10106_v24  ;;  %v10161_v0 = vld [vmem:[%s11511_s20 + $0x168] ss:$28 sps:$4 sm:$0xff]   ;;  %v10165_v3 = vld [vmem:[%s14612_s2 + $0x1c0] ss:$16 sps:$4 sm:$0xff]   ;;  %v10170_v5 = vld [vmem:[%s14612_s2 + $0x1ac] ss:$16 sps:$4 sm:$0xff]  }
  0x1e   : > { %2159 = vmatprep.subr.bf16.mxu0 %v10107_v25  ;;  %2179 = vmatprep.mubr.bf16.mxu0 %v10174_v60  ;;  %v10166_v4 = vld [vmem:[%s14612_s2 + $0x1e4] ss:$16 sps:$4 sm:$0xff]   ;;  %v10168_v6 = vld [vmem:[%s14612_s2 + $0x1a8] ss:$16 sps:$4 sm:$0xff]   ;;  %v10171_v7 = vld [vmem:[%s14612_s2 + $0x1e0] ss:$16 sps:$4 sm:$0xff]  }
  0x1f   : > { %v10172_v8 = vld [vmem:[%s11511_s20] ss:$28 sps:$4 sm:$0xff]   ;;  %v10177_v9 = vld [vmem:[%s14612_s2 + $0x204] ss:$16 sps:$4 sm:$0xff]   ;;  %v10179_v13 = vld [vmem:[%s14612_s2 + $0x1c8] ss:$16 sps:$4 sm:$0xff]  }
  0x20   : > { %2606 = vmatpush1.bf16.msra.mxu1 %v10103_v23  ;;  %v10181_v10 = vld [vmem:[%s14612_s2 + $0x1cc] ss:$16 sps:$4 sm:$0xff]   ;;  %v10175_v11 = vld [vmem:[%s14612_s2 + $0x200] ss:$16 sps:$4 sm:$0xff]   ;;  %v10184_v14 = vld [vmem:[%s14612_s2 + $0x224] ss:$16 sps:$4 sm:$0xff]  }
  0x21   : > { %2607 = vmatprep.subr.bf16.mxu1 %v10112_v26  ;;  %2160 = vmatpush1.bf16.msra.mxu0 %v10113_v29  ;;  %v10178_v12 = vld [vmem:[%s11511_s20 + $0x1a0] ss:$28 sps:$4 sm:$0xff]   ;;  %v10185_v18 = vld [vmem:[%s14612_s2 + $0x1e8] ss:$16 sps:$4 sm:$0xff]   ;;  %v10193_v19 = vld [vmem:[%s14612_s2 + $0x244] ss:$16 sps:$4 sm:$0xff]  }
  0x22   : > { %2161 = vmatprep.subr.bf16.mxu0 %v10114_v30  ;;  %v10187_v15 = vld [vmem:[%s14612_s2 + $0x1ec] ss:$16 sps:$4 sm:$0xff]   ;;  %v10182_v17 = vld [vmem:[%s14612_s2 + $0x220] ss:$16 sps:$4 sm:$0xff]   ;;  %v10190_v21 = vld [vmem:[%s11511_s20 + $0x38] ss:$28 sps:$4 sm:$0xff]  }
  0x23   : > { %8707 = vmatmul.mubr.msk.bf16.gmra.mrb[8].mxu1 %vm2122_vm0, %v10109_v27  ;;  %v10188_v16 = vld [vmem:[%s11511_s20 + $0x3c] ss:$28 sps:$4 sm:$0xff]   ;;  %v10191_v22 = vld [vmem:[%s14612_s2 + $0x240] ss:$16 sps:$4 sm:$0xff]   ;;  %v10199_v24 = vld [vmem:[%s14612_s2 + $0x264] ss:$16 sps:$4 sm:$0xff]  }
  0x24   : > { %2608 = vmatpush1.bf16.msra.mxu1 %v10110_v28  ;;  %2548 = vmatprep.mubr.bf16.mxu1 %v11375_v2  ;;  %v10196_v20 = vld [vmem:[%s14612_s2 + $0x20c] ss:$16 sps:$4 sm:$0xff]   ;;  %v10194_v23 = vld [vmem:[%s14612_s2 + $0x208] ss:$16 sps:$4 sm:$0xff]   ;;  %v10203_v26 = vld [vmem:[%s11511_s20 + $0x74] ss:$28 sps:$4 sm:$0xff]  }
  0x25   : > { %2609 = vmatprep.subr.bf16.mxu1 %v10118_v31  ;;  %2162 = vmatpush1.bf16.msra.mxu0 %v10119_v32  ;;  %v10202_v25 = vld [vmem:[%s14612_s2 + $0x22c] ss:$16 sps:$4 sm:$0xff]   ;;  %v10197_v27 = vld [vmem:[%s14612_s2 + $0x260] ss:$16 sps:$4 sm:$0xff]   ;;  %v10200_v28 = vld [vmem:[%s14612_s2 + $0x228] ss:$16 sps:$4 sm:$0xff]  }
  0x26   : > { %2163 = vmatprep.subr.bf16.mxu0 %v10120_v34  ;;  %v10208_v29 = vld [vmem:[%s14612_s2 + $0x284] ss:$16 sps:$4 sm:$0xff]   ;;  %v10211_v30 = vld [vmem:[%s14612_s2 + $0x24c] ss:$16 sps:$4 sm:$0xff]   ;;  %v10206_v32 = vld [vmem:[%s14612_s2 + $0x280] ss:$16 sps:$4 sm:$0xff]  }
  0x27   : > { %v10205_v31 = vld [vmem:[%s11511_s20 + $0x70] ss:$28 sps:$4 sm:$0xff]   ;;  %v10214_v34 = vld [vmem:[%s14612_s2 + $0x2a4] ss:$16 sps:$4 sm:$0xff]   ;;  %vm8238_vm4 = vcmask 125952  }
  0x28   : > { %2610 = vmatpush1.bf16.msra.mxu1 %v10116_v33  ;;  %v10209_v33 = vld [vmem:[%s14612_s2 + $0x248] ss:$16 sps:$4 sm:$0xff]  }
  0x29   : > { %2611 = vmatprep.subr.bf16.mxu1 %v10125_v35  ;;  %2164 = vmatpush1.bf16.msra.mxu0 %v10126_v37  ;;  %v10217_v35 = vld [vmem:[%s14612_s2 + $0x26c] ss:$16 sps:$4 sm:$0xff]   ;;  %v10212_v37 = vld [vmem:[%s14612_s2 + $0x2a0] ss:$16 sps:$4 sm:$0xff]  }
  0x2a   : > { %2165 = vmatprep.subr.bf16.mxu0 %v10127_v39  ;;  %v10223_v39 = vld [vmem:[%s14612_s2 + $0x2c4] ss:$16 sps:$4 sm:$0xff]  }
  0x2b   : > { %8708 = vmatmul.mubr.msk.bf16.gmra.mrb[12].mxu1 %vm2122_vm0, %v10122_v36  ;;  %v10218_v36 = vld [vmem:[%s11511_s20 + $0xac] ss:$28 sps:$4 sm:$0xff]  }
  0x2c   : > { %2612 = vmatpush1.bf16.msra.mxu1 %v10123_v38  ;;  %2558 = vmatprep.mubr.bf16.mxu1 %v11375_v2  ;;  %v10215_v38 = vld [vmem:[%s14612_s2 + $0x268] ss:$16 sps:$4 sm:$0xff]  }
  0x2d   : > { %2613 = vmatprep.subr.bf16.mxu1 %v10131_v40  ;;  %2166 = vmatpush1.bf16.msra.mxu0 %v10132_v42  ;;  %v10226_v40 = vld [vmem:[%s14612_s2 + $0x28c] ss:$16 sps:$4 sm:$0xff]   ;;  %v10221_v42 = vld [vmem:[%s14612_s2 + $0x2c0] ss:$16 sps:$4 sm:$0xff]  }
  0x2e   : > { %2167 = vmatprep.subr.bf16.mxu0 %v10133_v43  ;;  %v10224_v43 = vld [vmem:[%s14612_s2 + $0x288] ss:$16 sps:$4 sm:$0xff]  }
  0x30   : > { %2614 = vmatpush1.bf16.msra.mxu1 %v10129_v41  ;;  %v10220_v41 = vld [vmem:[%s11511_s20 + $0xa8] ss:$28 sps:$4 sm:$0xff]  }
  0x31   : > { %2615 = vmatprep.subr.bf16.mxu1 %v10138_v44  ;;  %2168 = vmatpush1.bf16.msra.mxu0 %v10139_v47  ;;  %v10229_v44 = vld [vmem:[%s14612_s2 + $0x2e4] ss:$16 sps:$4 sm:$0xff]   ;;  %v10227_v47 = vld [vmem:[%s14612_s2 + $0x2e0] ss:$16 sps:$4 sm:$0xff]  }
  0x32   : > { %2169 = vmatprep.subr.bf16.mxu0 %v10140_v48  ;;  %v10230_v48 = vld [vmem:[%s14612_s2 + $0x2a8] ss:$16 sps:$4 sm:$0xff]  }
  0x33   : > { %8709 = vmatmul.mubr.msk.bf16.gmra.mrb[16].mxu1 %vm2122_vm0, %v10135_v45  ;;  %v10232_v45 = vld [vmem:[%s14612_s2 + $0x2ac] ss:$16 sps:$4 sm:$0xff]  }
  0x34   : > { %2616 = vmatpush1.bf16.msra.mxu1 %v10136_v46  ;;  %2568 = vmatprep.mubr.bf16.mxu1 %v11375_v2  ;;  %v10233_v46 = vld [vmem:[%s11511_s20 + $0xe4] ss:$28 sps:$4 sm:$0xff]  }
  0x35   : > { %2617 = vmatprep.subr.bf16.mxu1 %v10144_v49  ;;  %2170 = vmatpush1.bf16.msra.mxu0 %v10145_v51  ;;  %v10238_v49 = vld [vmem:[%s14612_s2 + $0x304] ss:$16 sps:$4 sm:$0xff]   ;;  %v10235_v51 = vld [vmem:[%s11511_s20 + $0xe0] ss:$28 sps:$4 sm:$0xff]  }
  0x36   : > { %2171 = vmatprep.subr.bf16.mxu0 %v10146_v52  ;;  %v10236_v52 = vld [vmem:[%s14612_s2 + $0x300] ss:$16 sps:$4 sm:$0xff]  }
  0x38   : > { %2618 = vmatpush1.bf16.msra.mxu1 %v10142_v50  ;;  %v10241_v50 = vld [vmem:[%s14612_s2 + $0x2cc] ss:$16 sps:$4 sm:$0xff]  }
  0x39   : > { %2619 = vmatprep.subr.bf16.mxu1 %v10151_v53  ;;  %2172 = vmatpush1.bf16.msra.mxu0 %v10152_v56  ;;  %v10239_v53 = vld [vmem:[%s14612_s2 + $0x2c8] ss:$16 sps:$4 sm:$0xff]  }
  0x3a   : > { %2173 = vmatprep.subr.bf16.mxu0 %v10153_v57  ;;  %v10248_v56 = vld [vmem:[%s11511_s20 + $0x11c] ss:$28 sps:$4 sm:$0xff]   ;;  %v10242_v57 = vld [vmem:[%s14612_s2 + $0x320] ss:$16 sps:$4 sm:$0xff]  }
  0x3b   : > { %8710 = vmatmul.mubr.msk.bf16.gmra.mrb[20].mxu1 %vm2122_vm0, %v10148_v54  ;;  %v10244_v54 = vld [vmem:[%s14612_s2 + $0x324] ss:$16 sps:$4 sm:$0xff]  }
  0x3c   : > { %2620 = vmatpush1.bf16.msra.mxu1 %v10149_v55  ;;  %2578 = vmatprep.mubr.bf16.mxu1 %v11375_v2  ;;  %v10247_v55 = vld [vmem:[%s14612_s2 + $0x2ec] ss:$16 sps:$4 sm:$0xff]  }
  0x3d   : > { %2621 = vmatprep.subr.bf16.mxu1 %v10157_v58  ;;  %2174 = vmatpush1.bf16.msra.mxu0 %v10158_v61  ;;  %v10245_v58 = vld [vmem:[%s14612_s2 + $0x2e8] ss:$16 sps:$4 sm:$0xff]  }
  0x3e   : > { %2175 = vmatprep.subr.bf16.mxu0 %v10159_v62  ;;  %v10250_v61 = vld [vmem:[%s11511_s20 + $0x118] ss:$28 sps:$4 sm:$0xff]   ;;  %v10251_v62 = vld [vmem:[%s14612_s2 + $0x340] ss:$16 sps:$4 sm:$0xff]  }
  0x40   : > { %2622 = vmatpush1.bf16.msra.mxu1 %v10155_v59  ;;  %v10253_v59 = vld [vmem:[%s14612_s2 + $0x344] ss:$16 sps:$4 sm:$0xff]  }
  0x41   : > { %2623 = vmatprep.subr.bf16.mxu1 %v10164_v63  ;;  %2176 = vmatpush1.bf16.msra.mxu0 %v10165_v3  ;;  %v10254_v63 = vld [vmem:[%s14612_s2 + $0x308] ss:$16 sps:$4 sm:$0xff]   ;;  %v10263_v3 = vld [vmem:[%s11511_s20 + $0x154] ss:$28 sps:$4 sm:$0xff]  }
  0x42   : > { %2177 = vmatprep.subr.bf16.mxu0 %v10166_v4  ;;  %v10257_v4 = vld [vmem:[%s14612_s2 + $0x360] ss:$16 sps:$4 sm:$0xff]  }
  0x43   : > { %8711 = vmatmul.mubr.msk.bf16.gmra.mrb[24].mxu1 %vm2122_vm0, %v10161_v0  ;;  %v10259_v0 = vld [vmem:[%s14612_s2 + $0x364] ss:$16 sps:$4 sm:$0xff]  }
  0x44   : > { %2624 = vmatpush1.bf16.msra.mxu1 %v10162_v1  ;;  %2588 = vmatprep.mubr.bf16.mxu1 %v11375_v2  ;;  %v10262_v1 = vld [vmem:[%s14612_s2 + $0x32c] ss:$16 sps:$4 sm:$0xff]  }
  0x45   : > { %2625 = vmatprep.subr.bf16.mxu1 %v10170_v5  ;;  %2178 = vmatpush1.bf16.msra.mxu0 %v10171_v7  ;;  %v10260_v5 = vld [vmem:[%s14612_s2 + $0x328] ss:$16 sps:$4 sm:$0xff]   ;;  %v10271_v7 = vld [vmem:[%s14612_s2 + $0x34c] ss:$16 sps:$4 sm:$0xff]  }
  0x46   : > { %2260 = vmatprep.subr.bf16.mxu0 %v10177_v9  ;;  %v10266_v9 = vld [vmem:[%s14612_s2 + $0x380] ss:$16 sps:$4 sm:$0xff]  }
  0x48   : > { %2626 = vmatpush1.bf16.msra.mxu1 %v10168_v6  ;;  %2180 = vmatmul.mubr.bf16.vlgmr.msra.gmra.mrb[0].mxu0 %v10172_v8  ;;  %v10268_v6 = vld [vmem:[%s14612_s2 + $0x384] ss:$16 sps:$4 sm:$0xff]  }
  0x49   : > { %2627 = vmatprep.subr.bf16.mxu1 %v10181_v10  ;;  %2261 = vmatpush1.bf16.msra.mxu0 %v10175_v11  ;;  %v10269_v10 = vld [vmem:[%s14612_s2 + $0x348] ss:$16 sps:$4 sm:$0xff]   ;;  %v10274_v11 = vld [vmem:[%s14612_s2 + $0x3a4] ss:$16 sps:$4 sm:$0xff]  }
  0x4a   : > { %2262 = vmatprep.subr.bf16.mxu0 %v10184_v14  ;;  %2189 = vmatprep.mubr.bf16.mxu0 %v10188_v16  ;;  %v10272_v14 = vld [vmem:[%s14612_s2 + $0x3a0] ss:$16 sps:$4 sm:$0xff]  }
  0x4b   : > { %8712 = vmatmul.mubr.msk.bf16.gmra.mrb[28].mxu1 %vm2122_vm0, %v10178_v12  ;;  %v10277_v12 = vld [vmem:[%s14612_s2 + $0x36c] ss:$16 sps:$4 sm:$0xff]  }
  0x4c   : > { %2628 = vmatpush1.bf16.msra.mxu1 %v10179_v13  ;;  %2631 = vmatprep.mubr.bf16.mxu1 %v10174_v60  ;;  %v10256_v60 = vld [vmem:[%s14612_s2 + $0x30c] ss:$16 sps:$4 sm:$0xff]  }
  0x4d   : > { %2629 = vmatprep.subr.bf16.mxu1 %v10187_v15  ;;  %2263 = vmatpush1.bf16.msra.mxu0 %v10182_v17  ;;  %v10278_v13 = vld [vmem:[%s11511_s20 + $0x18c] ss:$28 sps:$4 sm:$0xff]  }
  0x4e   : > { %2264 = vmatprep.subr.bf16.mxu0 %v10193_v19  ;;  %v10275_v15 = vld [vmem:[%s14612_s2 + $0x368] ss:$16 sps:$4 sm:$0xff]   ;;  %v10286_v17 = vld [vmem:[%s14612_s2 + $0x38c] ss:$16 sps:$4 sm:$0xff]   ;;  %v10281_v19 = vld [vmem:[%s14612_s2 + $0x3c0] ss:$16 sps:$4 sm:$0xff]  }
  0x50   : > { %2630 = vmatpush1.bf16.msra.mxu1 %v10185_v18  ;;  %2190 = vmatmul.mubr.bf16.gmra.mrb[4].mxu0 %v10190_v21  ;;  %v10280_v18 = vld [vmem:[%s11511_s20 + $0x188] ss:$28 sps:$4 sm:$0xff]  }
  0x51   : > { %2712 = vmatprep.subr.bf16.mxu1 %v10196_v20  ;;  %2265 = vmatpush1.bf16.msra.mxu0 %v10191_v22  ;;  %v10284_v20 = vld [vmem:[%s14612_s2 + $0x388] ss:$16 sps:$4 sm:$0xff]   ;;  %v10292_v22 = vld [vmem:[%s14612_s2 + $0x3ac] ss:$16 sps:$4 sm:$0xff]  }
  0x52   : > { %2266 = vmatprep.subr.bf16.mxu0 %v10199_v24  ;;  %2199 = vmatprep.mubr.bf16.mxu0 %v10203_v26  ;;  %v10287_v24 = vld [vmem:[%s14612_s2 + $0x3e0] ss:$16 sps:$4 sm:$0xff]  }
  0x53   : > { %2632 = vmatmul.mubr.bf16.vlgmr.msra.gmra.mrb[32].mxu1 %v10172_v8  ;;  %v10265_v8 = vld [vmem:[%s11511_s20 + $0x150] ss:$28 sps:$4 sm:$0xff]  }
  0x54   : > { %2713 = vmatpush1.bf16.msra.mxu1 %v10194_v23  ;;  %2641 = vmatprep.mubr.bf16.mxu1 %v10188_v16  ;;  %v10283_v16 = vld [vmem:[%s14612_s2 + $0x3c4] ss:$16 sps:$4 sm:$0xff]   ;;  %v10295_v23 = vld [vmem:[%s11511_s20 + $0xc] ss:$28 sps:$4 sm:$0xff]  }
  0x55   : > { %2714 = vmatprep.subr.bf16.mxu1 %v10202_v25  ;;  %2267 = vmatpush1.bf16.msra.mxu0 %v10197_v27  ;;  %v10290_v25 = vld [vmem:[%s14612_s2 + $0x3a8] ss:$16 sps:$4 sm:$0xff]   ;;  %v10301_v27 = vld [vmem:[%s14612_s2 + $0x3cc] ss:$16 sps:$4 sm:$0xff]  }
  0x56   : > { %2268 = vmatprep.subr.bf16.mxu0 %v10208_v29  ;;  %v10296_v29 = vld [vmem:[%s14612_s2 + $0x400] ss:$16 sps:$4 sm:$0xff]  }
  0x58   : > { %2715 = vmatpush1.bf16.msra.mxu1 %v10200_v28  ;;  %2200 = vmatmul.mubr.bf16.gmra.mrb[8].mxu0 %v10205_v31  ;;  %v10293_v28 = vld [vmem:[%s11511_s20 + $0x8] ss:$28 sps:$4 sm:$0xff]  }
  0x59   : > { %2716 = vmatprep.subr.bf16.mxu1 %v10211_v30  ;;  %2269 = vmatpush1.bf16.msra.mxu0 %v10206_v32  ;;  %v10299_v30 = vld [vmem:[%s14612_s2 + $0x3c8] ss:$16 sps:$4 sm:$0xff]   ;;  %v10307_v32 = vld [vmem:[%s14612_s2 + $0x3ec] ss:$16 sps:$4 sm:$0xff]  }
  0x5a   : > { %2270 = vmatprep.subr.bf16.mxu0 %v10214_v34  ;;  %2209 = vmatprep.mubr.bf16.mxu0 %v10218_v36  ;;  %v10302_v34 = vld [vmem:[%s14612_s2 + $0x420] ss:$16 sps:$4 sm:$0xff]  }
  0x5b   : > { %2642 = vmatmul.mubr.bf16.gmra.mrb[36].mxu1 %v10190_v21  ;;  %v10289_v21 = vld [vmem:[%s14612_s2 + $0x3e4] ss:$16 sps:$4 sm:$0xff]  }
  0x5c   : > { %2717 = vmatpush1.bf16.msra.mxu1 %v10209_v33  ;;  %2651 = vmatprep.mubr.bf16.mxu1 %v10203_v26  ;;  %v10298_v26 = vld [vmem:[%s14612_s2 + $0x404] ss:$16 sps:$4 sm:$0xff]  }
  0x5d   : > { %2718 = vmatprep.subr.bf16.mxu1 %v10217_v35  ;;  %2271 = vmatpush1.bf16.msra.mxu0 %v10212_v37  ;;  %v10308_v33 = vld [vmem:[%s11511_s20 + $0x44] ss:$28 sps:$4 sm:$0xff]   ;;  %v10305_v35 = vld [vmem:[%s14612_s2 + $0x3e8] ss:$16 sps:$4 sm:$0xff]   ;;  %v10316_v37 = vld [vmem:[%s14612_s2 + $0x40c] ss:$16 sps:$4 sm:$0xff]  }
  0x5e   : > { %2272 = vmatprep.subr.bf16.mxu0 %v10223_v39  ;;  %v10311_v39 = vld [vmem:[%s14612_s2 + $0x440] ss:$16 sps:$4 sm:$0xff]  }
  0x60   : > { %2719 = vmatpush1.bf16.msra.mxu1 %v10215_v38  ;;  %2210 = vmatmul.mubr.bf16.gmra.mrb[12].mxu0 %v10220_v41  ;;  %v10310_v38 = vld [vmem:[%s11511_s20 + $0x40] ss:$28 sps:$4 sm:$0xff]  }
  0x61   : > { %2720 = vmatprep.subr.bf16.mxu1 %v10226_v40  ;;  %2273 = vmatpush1.bf16.msra.mxu0 %v10221_v42  ;;  %v10314_v40 = vld [vmem:[%s14612_s2 + $0x408] ss:$16 sps:$4 sm:$0xff]   ;;  %v10322_v42 = vld [vmem:[%s14612_s2 + $0x42c] ss:$16 sps:$4 sm:$0xff]  }
  0x62   : > { %2274 = vmatprep.subr.bf16.mxu0 %v10229_v44  ;;  %2219 = vmatprep.mubr.bf16.mxu0 %v10233_v46  ;;  %v10317_v44 = vld [vmem:[%s14612_s2 + $0x460] ss:$16 sps:$4 sm:$0xff]  }
  0x63   : > { %2652 = vmatmul.mubr.bf16.gmra.mrb[40].mxu1 %v10205_v31  ;;  %v10304_v31 = vld [vmem:[%s14612_s2 + $0x424] ss:$16 sps:$4 sm:$0xff]  }
  0x64   : > { %2721 = vmatpush1.bf16.msra.mxu1 %v10224_v43  ;;  %2661 = vmatprep.mubr.bf16.mxu1 %v10218_v36  ;;  %v10313_v36 = vld [vmem:[%s14612_s2 + $0x444] ss:$16 sps:$4 sm:$0xff]   ;;  %v10323_v43 = vld [vmem:[%s11511_s20 + $0x7c] ss:$28 sps:$4 sm:$0xff]  }
  0x65   : > { %2722 = vmatprep.subr.bf16.mxu1 %v10232_v45  ;;  %2275 = vmatpush1.bf16.msra.mxu0 %v10227_v47  ;;  %v10320_v45 = vld [vmem:[%s14612_s2 + $0x428] ss:$16 sps:$4 sm:$0xff]   ;;  %v10331_v47 = vld [vmem:[%s14612_s2 + $0x44c] ss:$16 sps:$4 sm:$0xff]  }
  0x66   : > { %2276 = vmatprep.subr.bf16.mxu0 %v10238_v49  ;;  %v10326_v49 = vld [vmem:[%s14612_s2 + $0x480] ss:$16 sps:$4 sm:$0xff]  }
  0x68   : > { %2723 = vmatpush1.bf16.msra.mxu1 %v10230_v48  ;;  %2220 = vmatmul.mubr.bf16.gmra.mrb[16].mxu0 %v10235_v51  ;;  %v10325_v48 = vld [vmem:[%s11511_s20 + $0x78] ss:$28 sps:$4 sm:$0xff]  }
  0x69   : > { %2724 = vmatprep.subr.bf16.mxu1 %v10241_v50  ;;  %2277 = vmatpush1.bf16.msra.mxu0 %v10236_v52  ;;  %v10329_v50 = vld [vmem:[%s14612_s2 + $0x448] ss:$16 sps:$4 sm:$0xff]   ;;  %v10337_v52 = vld [vmem:[%s14612_s2 + $0x46c] ss:$16 sps:$4 sm:$0xff]  }
  0x6a   : > { %2278 = vmatprep.subr.bf16.mxu0 %v10244_v54  ;;  %2229 = vmatprep.mubr.bf16.mxu0 %v10248_v56  ;;  %v10332_v54 = vld [vmem:[%s14612_s2 + $0x4a0] ss:$16 sps:$4 sm:$0xff]  }
  0x6b   : > { %2662 = vmatmul.mubr.bf16.gmra.mrb[44].mxu1 %v10220_v41  ;;  %v10319_v41 = vld [vmem:[%s14612_s2 + $0x464] ss:$16 sps:$4 sm:$0xff]  }
  0x6c   : > { %2725 = vmatpush1.bf16.msra.mxu1 %v10239_v53  ;;  %2671 = vmatprep.mubr.bf16.mxu1 %v10233_v46  ;;  %v10328_v46 = vld [vmem:[%s14612_s2 + $0x484] ss:$16 sps:$4 sm:$0xff]  }
  0x6d   : > { %2726 = vmatprep.subr.bf16.mxu1 %v10247_v55  ;;  %2279 = vmatpush1.bf16.msra.mxu0 %v10242_v57  ;;  %v10338_v53 = vld [vmem:[%s11511_s20 + $0xb4] ss:$28 sps:$4 sm:$0xff]   ;;  %v10335_v55 = vld [vmem:[%s14612_s2 + $0x468] ss:$16 sps:$4 sm:$0xff]   ;;  %v10346_v57 = vld [vmem:[%s14612_s2 + $0x48c] ss:$16 sps:$4 sm:$0xff]  }
  0x6e   : > { %2280 = vmatprep.subr.bf16.mxu0 %v10253_v59  ;;  %v10341_v59 = vld [vmem:[%s14612_s2 + $0x4c0] ss:$16 sps:$4 sm:$0xff]  }
  0x70   : > { %2727 = vmatpush1.bf16.msra.mxu1 %v10245_v58  ;;  %2230 = vmatmul.mubr.bf16.gmra.mrb[20].mxu0 %v10250_v61  ;;  %v10340_v58 = vld [vmem:[%s11511_s20 + $0xb0] ss:$28 sps:$4 sm:$0xff]  }
  0x71   : > { %2728 = vmatprep.subr.bf16.mxu1 %v10256_v60  ;;  %2281 = vmatpush1.bf16.msra.mxu0 %v10251_v62  ;;  %v10344_v60 = vld [vmem:[%s14612_s2 + $0x488] ss:$16 sps:$4 sm:$0xff]   ;;  %v10352_v62 = vld [vmem:[%s14612_s2 + $0x4ac] ss:$16 sps:$4 sm:$0xff]  }
  0x72   : > { %2282 = vmatprep.subr.bf16.mxu0 %v10259_v0  ;;  %2239 = vmatprep.mubr.bf16.mxu0 %v10263_v3  ;;  %v10347_v0 = vld [vmem:[%s14612_s2 + $0x4e0] ss:$16 sps:$4 sm:$0xff]  }
  0x73   : > { %2672 = vmatmul.mubr.bf16.gmra.mrb[48].mxu1 %v10235_v51  ;;  %v10334_v51 = vld [vmem:[%s14612_s2 + $0x4a4] ss:$16 sps:$4 sm:$0xff]  }
  0x74   : > { %2729 = vmatpush1.bf16.msra.mxu1 %v10254_v63  ;;  %2681 = vmatprep.mubr.bf16.mxu1 %v10248_v56  ;;  %v10343_v56 = vld [vmem:[%s14612_s2 + $0x4c4] ss:$16 sps:$4 sm:$0xff]   ;;  %v10353_v63 = vld [vmem:[%s11511_s20 + $0xec] ss:$28 sps:$4 sm:$0xff]  }
  0x75   : > { %2730 = vmatprep.subr.bf16.mxu1 %v10262_v1  ;;  %2283 = vmatpush1.bf16.msra.mxu0 %v10257_v4  ;;  %v10350_v1 = vld [vmem:[%s14612_s2 + $0x4a8] ss:$16 sps:$4 sm:$0xff]   ;;  %v10361_v4 = vld [vmem:[%s14612_s2 + $0x4cc] ss:$16 sps:$4 sm:$0xff]  }
  0x76   : > { %2284 = vmatprep.subr.bf16.mxu0 %v10268_v6  ;;  %v10356_v6 = vld [vmem:[%s14612_s2 + $0x500] ss:$16 sps:$4 sm:$0xff]  }
  0x78   : > { %2731 = vmatpush1.bf16.msra.mxu1 %v10260_v5  ;;  %2240 = vmatmul.mubr.bf16.gmra.mrb[24].mxu0 %v10265_v8  ;;  %v10355_v5 = vld [vmem:[%s11511_s20 + $0xe8] ss:$28 sps:$4 sm:$0xff]  }
  0x79   : > { %2732 = vmatprep.subr.bf16.mxu1 %v10271_v7  ;;  %2285 = vmatpush1.bf16.msra.mxu0 %v10266_v9  ;;  %v10359_v7 = vld [vmem:[%s14612_s2 + $0x4c8] ss:$16 sps:$4 sm:$0xff]   ;;  %v10367_v9 = vld [vmem:[%s14612_s2 + $0x4ec] ss:$16 sps:$4 sm:$0xff]  }
  0x7a   : > { %2286 = vmatprep.subr.bf16.mxu0 %v10274_v11  ;;  %2249 = vmatprep.mubr.bf16.mxu0 %v10278_v13  ;;  %v10362_v11 = vld [vmem:[%s14612_s2 + $0x520] ss:$16 sps:$4 sm:$0xff]  }
  0x7b   : > { %2682 = vmatmul.mubr.bf16.gmra.mrb[52].mxu1 %v10250_v61  ;;  %v10349_v61 = vld [vmem:[%s14612_s2 + $0x4e4] ss:$16 sps:$4 sm:$0xff]  }
  0x7c   : > { %2733 = vmatpush1.bf16.msra.mxu1 %v10269_v10  ;;  %2691 = vmatprep.mubr.bf16.mxu1 %v10263_v3  ;;  %v10358_v3 = vld [vmem:[%s14612_s2 + $0x504] ss:$16 sps:$4 sm:$0xff]  }
  0x7d   : > { %2734 = vmatprep.subr.bf16.mxu1 %v10277_v12  ;;  %2287 = vmatpush1.bf16.msra.mxu0 %v10272_v14  ;;  %v10368_v10 = vld [vmem:[%s11511_s20 + $0x124] ss:$28 sps:$4 sm:$0xff]   ;;  %v10365_v12 = vld [vmem:[%s14612_s2 + $0x4e8] ss:$16 sps:$4 sm:$0xff]   ;;  %v10376_v14 = vld [vmem:[%s14612_s2 + $0x50c] ss:$16 sps:$4 sm:$0xff]  }
  0x7e   : > { %2288 = vmatprep.subr.bf16.mxu0 %v10283_v16  ;;  %v10371_v16 = vld [vmem:[%s14612_s2 + $0x540] ss:$16 sps:$4 sm:$0xff]  }
  0x80   : > { %2735 = vmatpush1.bf16.msra.mxu1 %v10275_v15  ;;  %2250 = vmatmul.mubr.bf16.gmra.mrb[28].mxu0 %v10280_v18  ;;  %v10370_v15 = vld [vmem:[%s11511_s20 + $0x120] ss:$28 sps:$4 sm:$0xff]  }
  0x81   : > { %2736 = vmatprep.subr.bf16.mxu1 %v10286_v17  ;;  %2289 = vmatpush1.bf16.msra.mxu0 %v10281_v19  ;;  %v10374_v17 = vld [vmem:[%s14612_s2 + $0x508] ss:$16 sps:$4 sm:$0xff]   ;;  %v10382_v19 = vld [vmem:[%s14612_s2 + $0x52c] ss:$16 sps:$4 sm:$0xff]  }
  0x82   : > { %2290 = vmatprep.subr.bf16.mxu0 %v10289_v21  ;;  %2292 = vmatprep.mubr.bf16.mxu0 %v10295_v23  ;;  %v10377_v21 = vld [vmem:[%s14612_s2 + $0x560] ss:$16 sps:$4 sm:$0xff]  }
  0x83   : > { %2692 = vmatmul.mubr.bf16.gmra.mrb[56].mxu1 %v10265_v8  ;;  %v10364_v8 = vld [vmem:[%s14612_s2 + $0x524] ss:$16 sps:$4 sm:$0xff]  }
  0x84   : > { %2737 = vmatpush1.bf16.msra.mxu1 %v10284_v20  ;;  %2701 = vmatprep.mubr.bf16.mxu1 %v10278_v13  ;;  %v10373_v13 = vld [vmem:[%s14612_s2 + $0x544] ss:$16 sps:$4 sm:$0xff]   ;;  %v10383_v20 = vld [vmem:[%s11511_s20 + $0x15c] ss:$28 sps:$4 sm:$0xff]  }
  0x85   : > { %2738 = vmatprep.subr.bf16.mxu1 %v10292_v22  ;;  %2291 = vmatpush1.bf16.msra.mxu0 %v10287_v24  ;;  %v10380_v22 = vld [vmem:[%s14612_s2 + $0x528] ss:$16 sps:$4 sm:$0xff]   ;;  %v10388_v24 = vld [vmem:[%s14612_s2 + $0x584] ss:$16 sps:$4 sm:$0xff]  }
  0x86   : > { %2373 = vmatprep.subr.bf16.mxu0 %v10298_v26  ;;  %v10391_v26 = vld [vmem:[%s14612_s2 + $0x54c] ss:$16 sps:$4 sm:$0xff]  }
  0x88   : > { %2739 = vmatpush1.bf16.msra.mxu1 %v10290_v25  ;;  %2293 = vmatmul.mubr.bf16.vlgmr.msra.gmra.mrb[0].mxu0 %v10293_v28  ;;  %v10386_v25 = vld [vmem:[%s14612_s2 + $0x580] ss:$16 sps:$4 sm:$0xff]  }
  0x89   : > { %2740 = vmatprep.subr.bf16.mxu1 %v10301_v27  ;;  %2374 = vmatpush1.bf16.msra.mxu0 %v10296_v29  ;;  %v10389_v27 = vld [vmem:[%s14612_s2 + $0x548] ss:$16 sps:$4 sm:$0xff]   ;;  %v10397_v29 = vld [vmem:[%s14612_s2 + $0x56c] ss:$16 sps:$4 sm:$0xff]  }
  0x8a   : > { %2375 = vmatprep.subr.bf16.mxu0 %v10304_v31  ;;  %2302 = vmatprep.mubr.bf16.mxu0 %v10308_v33  ;;  %v10392_v31 = vld [vmem:[%s14612_s2 + $0x5a0] ss:$16 sps:$4 sm:$0xff]  }
  0x8b   : > { %2702 = vmatmul.mubr.bf16.gmra.mrb[60].mxu1 %v10280_v18  ;;  %v10379_v18 = vld [vmem:[%s14612_s2 + $0x564] ss:$16 sps:$4 sm:$0xff]  }
  0x8c   : > { %2741 = vmatpush1.bf16.msra.mxu1 %v10299_v30  ;;  %2744 = vmatprep.mubr.bf16.mxu1 %v10295_v23  ;;  %v10385_v23 = vld [vmem:[%s11511_s20 + $0x158] ss:$28 sps:$4 sm:$0xff]  }
  0x8d   : > { %2742 = vmatprep.subr.bf16.mxu1 %v10307_v32  ;;  %2376 = vmatpush1.bf16.msra.mxu0 %v10302_v34  ;;  %v10398_v30 = vld [vmem:[%s11511_s20 + $0x194] ss:$28 sps:$4 sm:$0xff]   ;;  %v10395_v32 = vld [vmem:[%s14612_s2 + $0x568] ss:$16 sps:$4 sm:$0xff]  }
  0x8e   : > { %2377 = vmatprep.subr.bf16.mxu0 %v10313_v36  ;;  %v10403_v34 = vld [vmem:[%s14612_s2 + $0x5c4] ss:$16 sps:$4 sm:$0xff]   ;;  %v10401_v36 = vld [vmem:[%s14612_s2 + $0x5c0] ss:$16 sps:$4 sm:$0xff]  }
  0x90   : > { %2743 = vmatpush1.bf16.msra.mxu1 %v10305_v35  ;;  %2303 = vmatmul.mubr.bf16.gmra.mrb[4].mxu0 %v10310_v38  ;;  %v10406_v35 = vld [vmem:[%s14612_s2 + $0x58c] ss:$16 sps:$4 sm:$0xff]  }
  0x91   : > { %2825 = vmatprep.subr.bf16.mxu1 %v10316_v37  ;;  %2378 = vmatpush1.bf16.msra.mxu0 %v10311_v39  ;;  %v10404_v37 = vld [vmem:[%s14612_s2 + $0x588] ss:$16 sps:$4 sm:$0xff]   ;;  %v10412_v39 = vld [vmem:[%s14612_s2 + $0x5ac] ss:$16 sps:$4 sm:$0xff]  }
  0x92   : > { %2379 = vmatprep.subr.bf16.mxu0 %v10319_v41  ;;  %2312 = vmatprep.mubr.bf16.mxu0 %v10323_v43  ;;  %v10407_v41 = vld [vmem:[%s14612_s2 + $0x5e0] ss:$16 sps:$4 sm:$0xff]  }
  0x93   : > { %2745 = vmatmul.mubr.bf16.vlgmr.msra.gmra.mrb[32].mxu1 %v10293_v28  ;;  %v10394_v28 = vld [vmem:[%s14612_s2 + $0x5a4] ss:$16 sps:$4 sm:$0xff]  }
  0x94   : > { %2826 = vmatpush1.bf16.msra.mxu1 %v10314_v40  ;;  %2754 = vmatprep.mubr.bf16.mxu1 %v10308_v33  ;;  %v10400_v33 = vld [vmem:[%s11511_s20 + $0x190] ss:$28 sps:$4 sm:$0xff]  }
  0x95   : > { %2827 = vmatprep.subr.bf16.mxu1 %v10322_v42  ;;  %2380 = vmatpush1.bf16.msra.mxu0 %v10317_v44  ;;  %v10415_v40 = vld [vmem:[%s11511_s20 + $0x14] ss:$28 sps:$4 sm:$0xff]   ;;  %v10410_v42 = vld [vmem:[%s14612_s2 + $0x5a8] ss:$16 sps:$4 sm:$0xff]   ;;  %v10418_v44 = vld [vmem:[%s14612_s2 + $0x5cc] ss:$16 sps:$4 sm:$0xff]  }
  0x96   : > { %2381 = vmatprep.subr.bf16.mxu0 %v10328_v46  ;;  %v10419_v46 = vld [vmem:[%s14612_s2 + $0x608] ss:$16 sps:$4 sm:$0xff]  }
  0x98   : > { %2828 = vmatpush1.bf16.msra.mxu1 %v10320_v45  ;;  %2313 = vmatmul.mubr.bf16.gmra.mrb[8].mxu0 %v10325_v48  ;;  %v10413_v45 = vld [vmem:[%s11511_s20 + $0x10] ss:$28 sps:$4 sm:$0xff]  }
  0x99   : > { %2829 = vmatprep.subr.bf16.mxu1 %v10331_v47  ;;  %2382 = vmatpush1.bf16.msra.mxu0 %v10326_v49  ;;  %v10416_v47 = vld [vmem:[%s14612_s2 + $0x5c8] ss:$16 sps:$4 sm:$0xff]   ;;  %v10424_v49 = vld [vmem:[%s14612_s2 + $0x5ec] ss:$16 sps:$4 sm:$0xff]  }
  0x9a   : > { %2383 = vmatprep.subr.bf16.mxu0 %v10334_v51  ;;  %2322 = vmatprep.mubr.bf16.mxu0 %v10338_v53  ;;  %v10422_v51 = vld [vmem:[%s14612_s2 + $0x5e8] ss:$16 sps:$4 sm:$0xff]  }
  0x9b   : > { %2755 = vmatmul.mubr.bf16.gmra.mrb[36].mxu1 %v10310_v38  ;;  %v10409_v38 = vld [vmem:[%s14612_s2 + $0x5e4] ss:$16 sps:$4 sm:$0xff]  }
  0x9c   : > { %2830 = vmatpush1.bf16.msra.mxu1 %v10329_v50  ;;  %2764 = vmatprep.mubr.bf16.mxu1 %v10323_v43  ;;  %v10421_v43 = vld [vmem:[%s14612_s2 + $0x60c] ss:$16 sps:$4 sm:$0xff]   ;;  %v10446_v50 = vld [vmem:[%s14614_s4 + $0x40] sm:$0xff]  }
  0x9d   : > { %2831 = vmatprep.subr.bf16.mxu1 %v10337_v52  ;;  %2384 = vmatpush1.bf16.msra.mxu0 %v10332_v54  ;;  %v10427_v52 = vld [vmem:[%s11511_s20 + $0x48] ss:$28 sps:$4 sm:$0xff]   ;;  %v10430_v54 = vld [vmem:[%s11511_s20 + $0x80] ss:$28 sps:$4 sm:$0xff]  }
  0x9e   : > { %2385 = vmatprep.subr.bf16.mxu0 %v10343_v56  ;;  %v10433_v56 = vld [vmem:[%s11511_s20 + $0xb8] ss:$28 sps:$4 sm:$0xff]  }
  0xa0   : > { %2832 = vmatpush1.bf16.msra.mxu1 %v10335_v55  ;;  %2323 = vmatmul.mubr.bf16.gmra.mrb[12].mxu0 %v10340_v58  ;;  %v10431_v55 = vld [vmem:[%s11511_s20 + $0xbc] ss:$28 sps:$4 sm:$0xff]  }
  0xa1   : > { %2833 = vmatprep.subr.bf16.mxu1 %v10346_v57  ;;  %2386 = vmatpush1.bf16.msra.mxu0 %v10341_v59  ;;  %v10434_v57 = vld [vmem:[%s11511_s20 + $0xf4] ss:$28 sps:$4 sm:$0xff]   ;;  %v10437_v59 = vld [vmem:[%s11511_s20 + $0x12c] ss:$28 sps:$4 sm:$0xff]  }
  0xa2   : > { %2387 = vmatprep.subr.bf16.mxu0 %v10349_v61  ;;  %2332 = vmatprep.mubr.bf16.mxu0 %v10353_v63 }
  0xa3   : > { %2765 = vmatmul.mubr.bf16.gmra.mrb[40].mxu1 %v10325_v48  ;;  %v10425_v48 = vld [vmem:[%s11511_s20 + $0x4c] ss:$28 sps:$4 sm:$0xff]  }
  0xa4   : > { %2834 = vmatpush1.bf16.msra.mxu1 %v10344_v60  ;;  %2774 = vmatprep.mubr.bf16.mxu1 %v10338_v53  ;;  %v10428_v53 = vld [vmem:[%s11511_s20 + $0x84] ss:$28 sps:$4 sm:$0xff]  }
  0xa5   : > { %2835 = vmatprep.subr.bf16.mxu1 %v10352_v62  ;;  %2388 = vmatpush1.bf16.msra.mxu0 %v10347_v0  ;;  %v10439_v0 = vld [vmem:[%s11511_s20 + $0x128] ss:$28 sps:$4 sm:$0xff]  }
  0xa6   : > { %2389 = vmatprep.subr.bf16.mxu0 %v10358_v3 }
  0xa8   : > { %2836 = vmatpush1.bf16.msra.mxu1 %v10350_v1  ;;  %2333 = vmatmul.mubr.bf16.gmra.mrb[16].mxu0 %v10355_v5  ;;  %v10440_v1 = vld [vmem:[%s11511_s20 + $0x164] ss:$28 sps:$4 sm:$0xff]  }
  0xa9   : > { %2837 = vmatprep.subr.bf16.mxu1 %v10361_v4  ;;  %2390 = vmatpush1.bf16.msra.mxu0 %v10356_v6 }
  0xaa   : > { %2391 = vmatprep.subr.bf16.mxu0 %v10364_v8  ;;  %2342 = vmatprep.mubr.bf16.mxu0 %v10368_v10  ;;  %v10443_v8 = vld [vmem:[%s11511_s20 + $0x19c] ss:$28 sps:$4 sm:$0xff]  }
  0xab   : > { %2775 = vmatmul.mubr.bf16.gmra.mrb[44].mxu1 %v10340_v58  ;;  %v10436_v58 = vld [vmem:[%s11511_s20 + $0xf0] ss:$28 sps:$4 sm:$0xff]  }
  0xac   : > { %2838 = vmatpush1.bf16.msra.mxu1 %v10359_v7  ;;  %2784 = vmatprep.mubr.bf16.mxu1 %v10353_v63  ;;  %v10442_v7 = vld [vmem:[%s11511_s20 + $0x160] ss:$28 sps:$4 sm:$0xff]  }
  0xad   : > { %2839 = vmatprep.subr.bf16.mxu1 %v10367_v9  ;;  %2392 = vmatpush1.bf16.msra.mxu0 %v10362_v11 }
  0xae   : > { %2393 = vmatprep.subr.bf16.mxu0 %v10373_v13  ;;  %v10445_v13 = vld [vmem:[%s11511_s20 + $0x198] ss:$28 sps:$4 sm:$0xff]  }
  0xb0   : > { %2840 = vmatpush1.bf16.msra.mxu1 %v10365_v12  ;;  %2343 = vmatmul.mubr.bf16.gmra.mrb[20].mxu0 %v10370_v15 }
  0xb1   : > { %2841 = vmatprep.subr.bf16.mxu1 %v10376_v14  ;;  %2394 = vmatpush1.bf16.msra.mxu0 %v10371_v16 }
  0xb2   : > { %2395 = vmatprep.subr.bf16.mxu0 %v10379_v18  ;;  %2352 = vmatprep.mubr.bf16.mxu0 %v10383_v20 }
  0xb3   : > { %2785 = vmatmul.mubr.bf16.gmra.mrb[48].mxu1 %v10355_v5 }
  0xb4   : > { %2842 = vmatpush1.bf16.msra.mxu1 %v10374_v17  ;;  %2794 = vmatprep.mubr.bf16.mxu1 %v10368_v10 }
  0xb5   : > { %2843 = vmatprep.subr.bf16.mxu1 %v10382_v19  ;;  %2396 = vmatpush1.bf16.msra.mxu0 %v10377_v21  ;;  %v10447_v19 = vld [vmem:[%s14614_s4] sm:$0xff]   ;;  %v10448_v21 = vld [vmem:[%s14614_s4 + $0x48] sm:$0xff]  }
  0xb6   : > { %2397 = vmatprep.subr.bf16.mxu0 %v10388_v24  ;;  %v11358_v24 = vld [vmem:[%s11511_s20 + $0x18] ss:$28 sps:$4 sm:$0xff]  }
  0xb8   : > { %2844 = vmatpush1.bf16.msra.mxu1 %v10380_v22  ;;  %2353 = vmatmul.mubr.bf16.gmra.mrb[24].mxu0 %v10385_v23 }
  0xb9   : > { %2845 = vmatprep.subr.bf16.mxu1 %v10391_v26  ;;  %2398 = vmatpush1.bf16.msra.mxu0 %v10386_v25  ;;  %v10449_v25 = vld [vmem:[%s14614_s4 + $0x8] sm:$0xff]   ;;  %v10450_v26 = vld [vmem:[%s14614_s4 + $0x50] sm:$0xff]  }
  0xba   : > { %2399 = vmatprep.subr.bf16.mxu0 %v10394_v28  ;;  %2362 = vmatprep.mubr.bf16.mxu0 %v10398_v30  ;;  %v10451_v28 = vld [vmem:[%s14614_s4 + $0x10] sm:$0xff]  }
  0xbb   : > { %2795 = vmatmul.mubr.bf16.gmra.mrb[52].mxu1 %v10370_v15 }
  0xbc   : > { %2846 = vmatpush1.bf16.msra.mxu1 %v10389_v27  ;;  %2804 = vmatprep.mubr.bf16.mxu1 %v10383_v20 }
  0xbd   : > { %2847 = vmatprep.subr.bf16.mxu1 %v10397_v29  ;;  %2400 = vmatpush1.bf16.msra.mxu0 %v10392_v31 }
  0xbe   : > { %2401 = vmatprep.subr.bf16.mxu0 %v10403_v34  ;;  %v10453_v34 = vld [vmem:[%s14614_s4 + $0x18] sm:$0xff]  }
  0xc0   : > { %2848 = vmatpush1.bf16.msra.mxu1 %v10395_v32  ;;  %2363 = vmatmul.mubr.bf16.gmra.mrb[28].mxu0 %v10400_v33 }
  0xc1   : > { %2849 = vmatprep.subr.bf16.mxu1 %v10406_v35  ;;  %2402 = vmatpush1.bf16.msra.mxu0 %v10401_v36  ;;  %v11360_v35 = vld [vmem:[%s11511_s20 + $0xf8] ss:$28 sps:$4 sm:$0xff]   ;;  %v10454_v36 = vld [vmem:[%s14614_s4 + $0x60] sm:$0xff]  }
  0xc2   : > { %2403 = vmatprep.subr.bf16.mxu0 %v10409_v38  ;;  %2405 = vmatprep.mubr.bf16.mxu0 %v10415_v40  ;;  %v10455_v38 = vld [vmem:[%s14614_s4 + $0x20] sm:$0xff]  }
  0xc3   : > { %2805 = vmatmul.mubr.bf16.gmra.mrb[56].mxu1 %v10385_v23 }
  0xc4   : > { %2850 = vmatpush1.bf16.msra.mxu1 %v10404_v37  ;;  %2814 = vmatprep.mubr.bf16.mxu1 %v10398_v30  ;;  %v10452_v30 = vld [vmem:[%s14614_s4 + $0x58] sm:$0xff]  }
  0xc5   : > { %2851 = vmatprep.subr.bf16.mxu1 %v10412_v39  ;;  %2404 = vmatpush1.bf16.msra.mxu0 %v10407_v41 }
  0xc6   : > { %2938 = vmatprep.subr.bf16.mxu0 %v10421_v43 }
  0xc8   : > { %2852 = vmatpush1.bf16.msra.mxu1 %v10410_v42  ;;  %2406 = vmatmul.mubr.bf16.vlgmr.msra.gmra.mrb[0].mxu0 %v10413_v45  ;;  %v11361_v42 = vld [vmem:[%s11511_s20 + $0x88] ss:$28 sps:$4 sm:$0xff]  }
  0xc9   : > { %2853 = vmatprep.subr.bf16.mxu1 %v10418_v44  ;;  %2939 = vmatpush1.bf16.msra.mxu0 %v10419_v46  ;;  %v10456_v44 = vld [vmem:[%s14614_s4 + $0x68] sm:$0xff]  }
  0xca   : > { %2415 = vmatprep.mubr.bf16.mxu0 %v10425_v48  ;;  %9277 = vmatprep.subr.bf16.mxu0 %v10446_v50  ;;  %v10458_v50 = vld [vmem:[%s14614_s4 + $0x70] sm:$0xff]  }
  0xcb   : > { %2815 = vmatmul.mubr.bf16.gmra.mrb[60].mxu1 %v10400_v33  ;;  %v11359_v33 = vld [vmem:[%s11511_s20 + $0x50] ss:$28 sps:$4 sm:$0xff]  }
  0xcc   : > { %2854 = vmatpush1.bf16.msra.mxu1 %v10416_v47  ;;  %2857 = vmatprep.mubr.bf16.mxu1 %v10415_v40 }
  0xcd   : > { %2855 = vmatprep.subr.bf16.mxu1 %v10424_v49 }
  0xd0   : > { %2856 = vmatpush1.bf16.msra.mxu1 %v10422_v51  ;;  %2416 = vmatmul.mubr.bf16.gmra.mrb[4].mxu0 %v10427_v52  ;;  %v11363_v51 = vld [vmem:[%s11511_s20 + $0xc0] ss:$28 sps:$4 sm:$0xff]  }
  0xd1   : > { %9581 = vmatprep.subr.bf16.mxu1 %v10421_v43  ;;  %2425 = vmatprep.mubr.bf16.mxu0 %v10428_v53  ;;  %v11362_v43 = vld [vmem:[%s11511_s20 + $0x130] ss:$28 sps:$4 sm:$0xff]  }
  0xd3   : > { %2858 = vmatmul.mubr.bf16.vlgmr.msra.gmra.mrb[32].mxu1 %v10413_v45 }
  0xd4   : > { %2867 = vmatprep.mubr.bf16.mxu1 %v10425_v48  ;;  %9582 = vmatpush1.bf16.msra.mxu1 %v10419_v46  ;;  %v10457_v46 = vld [vmem:[%s14614_s4 + $0x28] sm:$0xff]  }
  0xd8   : > { %2426 = vmatmul.mubr.bf16.gmra.mrb[8].mxu0 %v10430_v54 }
  0xd9   : > { %2435 = vmatprep.mubr.bf16.mxu0 %v10431_v55 }
  0xdb   : > { %2868 = vmatmul.mubr.bf16.gmra.mrb[36].mxu1 %v10427_v52  ;;  %v10459_v52 = vld [vmem:[%s14614_s4 + $0x30] sm:$0xff]  }
  0xdc   : > { %2877 = vmatprep.mubr.bf16.mxu1 %v10428_v53  ;;  %v11364_v53 = vld [vmem:[%s11511_s20 + $0x168] ss:$28 sps:$4 sm:$0xff]  }
  0xe0   : > { %2436 = vmatmul.mubr.bf16.gmra.mrb[12].mxu0 %v10433_v56 }
  0xe1   : > { %2445 = vmatprep.mubr.bf16.mxu0 %v10434_v57 }
  0xe3   : > { %2878 = vmatmul.mubr.bf16.gmra.mrb[40].mxu1 %v10430_v54  ;;  %v10460_v54 = vld [vmem:[%s14614_s4 + $0x78] sm:$0xff]  }
  0xe4   : > { %2887 = vmatprep.mubr.bf16.mxu1 %v10431_v55  ;;  %v10461_v55 = vld [vmem:[%s14614_s4 + $0x38] sm:$0xff]  }
  0xe6   : > { %v12140_v60 = vpop.f32.mrb[0].mxu1 }
  0xe7   : > { %v12142_v61 = vpop.f32.mrb[1].mxu1 }
  0xe8   : > { %v12144_v62 = vpop.f32.mrb[2].mxu1  ;;  %2446 = vmatmul.mubr.bf16.gmra.mrb[16].mxu0 %v10436_v58 }
  0xe9   : > { %v12146_v63 = vpop.f32.mrb[3].mxu1  ;;  %2455 = vmatprep.mubr.bf16.mxu0 %v10437_v59 }
  0xeb   : > { %2888 = vmatmul.mubr.bf16.gmra.mrb[44].mxu1 %v10433_v56  ;;  %v11365_v56 = vld [vmem:[%s11511_s20 + $0x1a0] ss:$28 sps:$4 sm:$0xff]  }
  0xec   : > { %2897 = vmatprep.mubr.bf16.mxu1 %v10434_v57  ;;  %v10462_v57 = vld [vmem:[%s14614_s4 + $0xc0] sm:$0xff]  }
  0xed   : > { %9341 = vmatprep.subr.bf16.mxu1 %v10462_v57 }
  0xee   : > { %v12150_v3 = vpop.f32.mrb[4].mxu1 }
  0xef   : > { %v12152_v4 = vpop.f32.mrb[5].mxu1 }
  0xf0   : > { %v12154_v5 = vpop.f32.mrb[6].mxu1  ;;  %2456 = vmatmul.mubr.bf16.gmra.mrb[20].mxu0 %v10439_v0 }
  0xf1   : > { %v12156_v6 = vpop.f32.mrb[7].mxu1  ;;  %2465 = vmatprep.mubr.bf16.mxu0 %v10440_v1 }
  0xf3   : > { %2898 = vmatmul.mubr.bf16.gmra.mrb[48].mxu1 %v10436_v58  ;;  %v10463_v58 = vld [vmem:[%s14614_s4 + $0x80] sm:$0xff]  }
  0xf4   : > { %2907 = vmatprep.mubr.bf16.mxu1 %v10437_v59  ;;  %v10464_v59 = vld [vmem:[%s14614_s4 + $0xc8] sm:$0xff]  }
  0xf6   : > { %v12160_v9 = vpop.f32.mrb[8].mxu1 }
  0xf7   : > { %v12162_v10 = vpop.f32.mrb[9].mxu1 }
  0xf8   : > { %v12164_v11 = vpop.f32.mrb[10].mxu1  ;;  %2466 = vmatmul.mubr.bf16.gmra.mrb[24].mxu0 %v10442_v7 }
  0xf9   : > { %v12166_v12 = vpop.f32.mrb[11].mxu1  ;;  %2475 = vmatprep.mubr.bf16.mxu0 %v10443_v8 }
  0xfb   : > { %2908 = vmatmul.mubr.bf16.gmra.mrb[52].mxu1 %v10439_v0  ;;  %v10465_v0 = vld [vmem:[%s14614_s4 + $0x88] sm:$0xff]  }
  0xfc   : > { %2917 = vmatprep.mubr.bf16.mxu1 %v10440_v1  ;;  %v10466_v1 = vld [vmem:[%s14614_s4 + $0xd0] sm:$0xff]  }
  0xfe   : > { %v12169_v14 = vpop.f32.mrb[12].mxu1 }
  0xff   : > { %v12171_v15 = vpop.f32.mrb[13].mxu1 }
 0x100   : > { %v12173_v16 = vpop.f32.mrb[14].mxu1  ;;  %2476 = vmatmul.mubr.bf16.gmra.mrb[28].mxu0 %v10445_v13 }
 0x101   : > { %v12175_v17 = vpop.f32.mrb[15].mxu1  ;;  %2970 = vmatprep.mubr.bf16.mxu0 %v11375_v2 }
 0x103   : > { %2918 = vmatmul.mubr.bf16.gmra.mrb[56].mxu1 %v10442_v7  ;;  %v10467_v7 = vld [vmem:[%s14614_s4 + $0x90] sm:$0xff]  }
 0x104   : > { %2927 = vmatprep.mubr.bf16.mxu1 %v10443_v8  ;;  %v10468_v8 = vld [vmem:[%s14614_s4 + $0xd8] sm:$0xff]  }
 0x106   : > { %v12178_v18 = vpop.f32.mrb[16].mxu1 }
 0x107   : > { %v12183_v20 = vpop.f32.mrb[17].mxu1 }
 0x108   : > { %v12188_v22 = vpop.f32.mrb[18].mxu1  ;;  %8713 = vmatmul.mubr.msk.bf16.vlgmr.msra.gmra.mrb[32].mxu0 %vm2122_vm0, %v11358_v24  ;;  %v10472_v24 = vld [vmem:[%s14614_s4 + $0xe8] sm:$0xff]  }
 0x109   : > { %v12190_v23 = vpop.f32.mrb[19].mxu1  ;;  %2980 = vmatprep.mubr.bf16.mxu0 %v11375_v2  ;;  %9278 = vmatpush3.bf16.msra.mxu0 %v10447_v19  ;;  %v10470_v19 = vld [vmem:[%s14614_s4 + $0xe0] sm:$0xff]  }
 0x10a   : > { %9279 = vmatprep.subr.bf16.mxu0 %v10448_v21  ;;  %v10471_v21 = vld [vmem:[%s14614_s4 + $0xa0] sm:$0xff]  }
 0x10b   : > { %2928 = vmatmul.mubr.bf16.gmra.mrb[60].mxu1 %v10445_v13  ;;  %v10469_v13 = vld [vmem:[%s14614_s4 + $0x98] sm:$0xff]  }
 0x10c   : > { %3010 = vmatprep.mubr.bf16.mxu1 %v11375_v2 }
 0x10d   : > { %9280 = vmatpush3.bf16.msra.mxu0 %v10449_v25  ;;  %v10473_v25 = vld [vmem:[%s14614_s4 + $0xa8] sm:$0xff]  }
 0x10e   : > { %v12202_v27 = vpop.f32.mrb[20].mxu1  ;;  %9281 = vmatprep.subr.bf16.mxu0 %v10450_v26  ;;  %v10474_v26 = vld [vmem:[%s14614_s4 + $0xf0] sm:$0xff]  }
 0x10f   : > { %v12207_v29 = vpop.f32.mrb[21].mxu1 }
 0x110   : > { %v12212_v31 = vpop.f32.mrb[22].mxu1  ;;  %8714 = vmatmul.mubr.msk.bf16.gmra.mrb[36].mxu0 %vm2122_vm0, %v11359_v33  ;;  %v10477_v33 = vld [vmem:[%s14614_s4 + $0xb8] sm:$0xff]  }
 0x111   : > { %v12214_v32 = vpop.f32.mrb[23].mxu1  ;;  %2990 = vmatprep.mubr.bf16.mxu0 %v11375_v2  ;;  %9282 = vmatpush3.bf16.msra.mxu0 %v10451_v28  ;;  %v10475_v28 = vld [vmem:[%s14614_s4 + $0xb0] sm:$0xff]  }
 0x112   : > { %9283 = vmatprep.subr.bf16.mxu0 %v10452_v30  ;;  %v10476_v30 = vld [vmem:[%s14614_s4 + $0xf8] sm:$0xff]  }
 0x113   : > { %8717 = vmatmul.mubr.msk.bf16.vlgmr.msra.gmra.mrb[48].mxu1 %vm2122_vm0, %v11360_v35 }
 0x114   : > { %3020 = vmatprep.mubr.bf16.mxu1 %v11375_v2  ;;  %9342 = vmatpush3.bf16.msra.mxu1 %v10463_v58 }
 0x115   : > { %9284 = vmatpush3.bf16.msra.mxu0 %v10453_v34  ;;  %9343 = vmatprep.subr.bf16.mxu1 %v10464_v59  ;;  %v842_v34 = vlaneseq }
 0x116   : > { %v12228_v37 = vpop.f32.mrb[24].mxu1  ;;  %9285 = vmatprep.subr.bf16.mxu0 %v10454_v36 }
 0x117   : > { %v12233_v39 = vpop.f32.mrb[25].mxu1  ;;  %v12327_v35 = vshrl.u32 %v842_v34, 7 }
 0x118   : > { %v12235_v40 = vpop.f32.mrb[26].mxu1  ;;  %8715 = vmatmul.mubr.msk.bf16.gmra.mrb[40].mxu0 %vm2122_vm0, %v11361_v42  ;;  %9344 = vmatpush3.bf16.msra.mxu1 %v10465_v0 }
 0x119   : > { %v12237_v41 = vpop.f32.mrb[27].mxu1  ;;  %3000 = vmatprep.mubr.bf16.mxu0 %v11375_v2  ;;  %9286 = vmatpush3.bf16.msra.mxu0 %v10455_v38  ;;  %v12330_v36 = vsub.s32 0, %v12327_v35  ;;  %v12335_v38 = vld [vmem:[%s14613_s3] sm:$0xf]  ;;  %v12338_v42 = vsub.s32 1, %v12327_v35 }
 0x11a   : > { %9287 = vmatprep.subr.bf16.mxu0 %v10456_v44  ;;  %9345 = vmatprep.subr.bf16.mxu1 %v10466_v1 }
 0x11b   : > { %8718 = vmatmul.mubr.msk.bf16.gmra.mrb[52].mxu1 %vm2122_vm0, %v11362_v43  ;;  %v12342_v43 = vrot.slane %v12335_v38, %v12330_v36  ;;  %v12346_v44 = vrot.slane %v12335_v38, %v12338_v42 }
 0x11c   : > { %3030 = vmatprep.mubr.bf16.mxu1 %v11375_v2  ;;  %9346 = vmatpush3.bf16.msra.mxu1 %v10467_v7 }
 0x11d   : > { %9288 = vmatpush3.bf16.msra.mxu0 %v10457_v46  ;;  %9347 = vmatprep.subr.bf16.mxu1 %v10468_v8 }
 0x11e   : > { %v12248_v45 = vpop.f32.mrb[28].mxu1  ;;  %9289 = vmatprep.subr.bf16.mxu0 %v10458_v50 }
 0x11f   : > { %v12253_v47 = vpop.f32.mrb[29].mxu1 }
 0x120   : > { %v12255_v48 = vpop.f32.mrb[30].mxu1  ;;  %8716 = vmatmul.mubr.msk.bf16.gmra.mrb[44].mxu0 %vm2122_vm0, %v11363_v51  ;;  %9348 = vmatpush3.bf16.msra.mxu1 %v10469_v13 }
 0x121   : > { %v12257_v49 = vpop.f32.mrb[31].mxu1  ;;  %9290 = vmatpush3.bf16.msra.mxu0 %v10459_v52  ;;  %9349 = vmatprep.subr.bf16.mxu1 %v10470_v19 }
 0x122   : > { %9291 = vmatprep.subr.bf16.mxu0 %v10460_v54 }
 0x123   : > { %8719 = vmatmul.mubr.msk.bf16.gmra.mrb[56].mxu1 %vm2122_vm0, %v11364_v53 }
 0x124   : > { %3040 = vmatprep.mubr.bf16.mxu1 %v11375_v2  ;;  %9350 = vmatpush3.bf16.msra.mxu1 %v10471_v21 }
 0x125   : > { %9292 = vmatpush3.bf16.msra.mxu0 %v10461_v55  ;;  %9351 = vmatprep.subr.bf16.mxu1 %v10472_v24 }
 0x128   : > { %9352 = vmatpush3.bf16.msra.mxu1 %v10473_v25 }
 0x129   : > { %9353 = vmatprep.subr.bf16.mxu1 %v10474_v26 }
 0x12b   : > { %8720 = vmatmul.mubr.msk.bf16.gmra.mrb[60].mxu1 %vm2122_vm0, %v11365_v56 }
 0x12c   : > { %9354 = vmatpush3.bf16.msra.mxu1 %v10475_v28 }
 0x12d   : > { %9355 = vmatprep.subr.bf16.mxu1 %v10476_v30 }
 0x130   : > { %9356 = vmatpush3.bf16.msra.mxu1 %v10477_v33 }
 0x19b   : > { %v2407_v46 = vpop.f32.mrb[0].mxu0 }
 0x19c   : > { %v9599_v50 = vadd.f32 %v2407_v46, %v12342_v43  ;;  %v2409_v51 = vpop.f32.mrb[1].mxu0 }
 0x19d   : > { %v9601_v52 = vadd.f32 %v2409_v51, %v12346_v44  ;;  %v2411_v53 = vpop.f32.mrb[2].mxu0 }
 0x19e   : > { %v9600_v54 = vadd.f32 %v9599_v50, %v12140_v60  ;;  %v9603_v55 = vadd.f32 %v2411_v53, %v12342_v43  ;;  %v2413_v56 = vpop.f32.mrb[3].mxu0 }
 0x19f   : > { %v9602_v57 = vadd.f32 %v9601_v52, %v12142_v61  ;;  %v9605_v58 = vadd.f32 %v2413_v56, %v12346_v44 }
 0x1a0   : > { %v9604_v59 = vadd.f32 %v9603_v55, %v12144_v62  ;;  %v3051_v1 = vmax.f32 %v9600_v54, 0.0 }
 0x1a1   : > { %v9606_v0 = vadd.f32 %v9605_v58, %v12146_v63  ;;  %v3052_v8 = vmax.f32 %v9602_v57, 0.0 }
 0x1a2   : > { %v3055_v7 = vmax.f32 %v9604_v59, 0.0 }
 0x1a3   : > { %v3056_v13 = vmax.f32 %v9606_v0, 0.0  ;;  %v2417_v19 = vpop.f32.mrb[4].mxu0 }
 0x1a4   : > { %v3115_v21 = vpack.c.bf16 %v3055_v7, %v3051_v1  ;;  %v9607_v24 = vadd.f32 %v2417_v19, %v12342_v43  ;;  %v2419_v25 = vpop.f32.mrb[5].mxu0 }
 0x1a5   : > { %v9609_v26 = vadd.f32 %v2419_v25, %v12346_v44  ;;  %v2421_v28 = vpop.f32.mrb[6].mxu0  ;;  %v3116_v30 = vpack.c.bf16 %v3056_v13, %v3052_v8 }
 0x1a6   : > { %v12357_v60 = vpop.f32.mrb[32].mxu1  ;;  %v9608_v62 = vadd.f32 %v9607_v24, %v12150_v3  ;;  %v9611_v63 = vadd.f32 %v2421_v28, %v12342_v43  ;;  %v2423_v46 = vpop.f32.mrb[7].mxu0 }
 0x1a7   : > { %v12360_v61 = vpop.f32.mrb[33].mxu1  ;;  %v9610_v50 = vadd.f32 %v9609_v26, %v12152_v4  ;;  %v9613_v51 = vadd.f32 %v2423_v46, %v12346_v44  ;;  %3442 = vmatprep.mubr.bf16.mxu0 %v3116_v30 }
 0x1a8   : > { %v12364_v33 = vpop.f32.mrb[34].mxu1  ;;  %v9612_v53 = vadd.f32 %v9611_v63, %v12154_v5  ;;  %3443 = vmatmul.mubr.bf16.vlgmr.msra.gmra.mrb[48].mxu0 %v3115_v21  ;;  %v3059_v55 = vmax.f32 %v9608_v62, 0.0 }
 0x1a9   : > { %v12368_v52 = vpop.f32.mrb[35].mxu1  ;;  %v9614_v54 = vadd.f32 %v9613_v51, %v12156_v6  ;;  %v3060_v3 = vmax.f32 %v9610_v50, 0.0 }
 0x1aa   : > { %v3063_v56 = vmax.f32 %v9612_v53, 0.0 }
 0x1ab   : > { %v3064_v57 = vmax.f32 %v9614_v54, 0.0  ;;  %v2427_v58 = vpop.f32.mrb[8].mxu0 }
 0x1ac   : > { %v9615_v59 = vadd.f32 %v2427_v58, %v12342_v43  ;;  %v2429_v4 = vpop.f32.mrb[9].mxu0  ;;  %v3119_v1 = vpack.c.bf16 %v3063_v56, %v3059_v55 }
 0x1ad   : > { %v9617_v7 = vadd.f32 %v2429_v4, %v12346_v44  ;;  %v2431_v13 = vpop.f32.mrb[10].mxu0  ;;  %v3120_v5 = vpack.c.bf16 %v3064_v57, %v3060_v3 }
 0x1ae   : > { %v12373_v0 = vpop.f32.mrb[36].mxu1  ;;  %v9616_v19 = vadd.f32 %v9615_v59, %v12160_v9  ;;  %v9619_v6 = vadd.f32 %v2431_v13, %v12342_v43  ;;  %v2433_v24 = vpop.f32.mrb[11].mxu0 }
 0x1af   : > { %v12376_v8 = vpop.f32.mrb[37].mxu1  ;;  %v9618_v25 = vadd.f32 %v9617_v7, %v12162_v10  ;;  %v9621_v26 = vadd.f32 %v2433_v24, %v12346_v44  ;;  %3450 = vmatprep.mubr.bf16.mxu0 %v3120_v5 }
 0x1b0   : > { %v12380_v21 = vpop.f32.mrb[38].mxu1  ;;  %v9620_v30 = vadd.f32 %v9619_v6, %v12164_v11  ;;  %3451 = vmatmul.mubr.bf16.gmra.mrb[52].mxu0 %v3119_v1  ;;  %v3067_v63 = vmax.f32 %v9616_v19, 0.0 }
 0x1b1   : > { %v12384_v28 = vpop.f32.mrb[39].mxu1  ;;  %v9622_v62 = vadd.f32 %v9621_v26, %v12166_v12  ;;  %v3068_v9 = vmax.f32 %v9618_v25, 0.0 }
 0x1b2   : > { %v3071_v46 = vmax.f32 %v9620_v30, 0.0 }
 0x1b3   : > { %v3072_v50 = vmax.f32 %v9622_v62, 0.0  ;;  %v2437_v51 = vpop.f32.mrb[12].mxu0 }
 0x1b4   : > { %v9623_v53 = vadd.f32 %v2437_v51, %v12342_v43  ;;  %v2439_v10 = vpop.f32.mrb[13].mxu0  ;;  %v3123_v55 = vpack.c.bf16 %v3071_v46, %v3067_v63 }
 0x1b5   : > { %v9625_v56 = vadd.f32 %v2439_v10, %v12346_v44  ;;  %v2441_v57 = vpop.f32.mrb[14].mxu0  ;;  %v3124_v11 = vpack.c.bf16 %v3072_v50, %v3068_v9 }
 0x1b6   : > { %v12389_v54 = vpop.f32.mrb[40].mxu1  ;;  %v9624_v58 = vadd.f32 %v9623_v53, %v12169_v14  ;;  %v9627_v12 = vadd.f32 %v2441_v57, %v12342_v43  ;;  %v2443_v4 = vpop.f32.mrb[15].mxu0 }
 0x1b7   : > { %v12392_v3 = vpop.f32.mrb[41].mxu1  ;;  %v9626_v1 = vadd.f32 %v9625_v56, %v12171_v15  ;;  %v9629_v7 = vadd.f32 %v2443_v4, %v12346_v44  ;;  %3458 = vmatprep.mubr.bf16.mxu0 %v3124_v11 }
 0x1b8   : > { %v12396_v59 = vpop.f32.mrb[42].mxu1  ;;  %v9628_v5 = vadd.f32 %v9627_v12, %v12173_v16  ;;  %3459 = vmatmul.mubr.bf16.gmra.mrb[56].mxu0 %v3123_v55  ;;  %v3075_v6 = vmax.f32 %v9624_v58, 0.0 }
 0x1b9   : > { %v12400_v13 = vpop.f32.mrb[43].mxu1  ;;  %v9630_v19 = vadd.f32 %v9629_v7, %v12175_v17  ;;  %v3076_v14 = vmax.f32 %v9626_v1, 0.0 }
 0x1ba   : > { %v3079_v24 = vmax.f32 %v9628_v5, 0.0 }
 0x1bb   : > { %v3080_v25 = vmax.f32 %v9630_v19, 0.0  ;;  %v2447_v26 = vpop.f32.mrb[16].mxu0 }
 0x1bc   : > { %v9631_v30 = vadd.f32 %v2447_v26, %v12342_v43  ;;  %v2449_v15 = vpop.f32.mrb[17].mxu0  ;;  %v3127_v63 = vpack.c.bf16 %v3079_v24, %v3075_v6 }
 0x1bd   : > { %v9633_v46 = vadd.f32 %v2449_v15, %v12346_v44  ;;  %v2451_v50 = vpop.f32.mrb[18].mxu0  ;;  %v3128_v16 = vpack.c.bf16 %v3080_v25, %v3076_v14 }
 0x1be   : > { %v12405_v62 = vpop.f32.mrb[44].mxu1  ;;  %v9632_v51 = vadd.f32 %v9631_v30, %v12178_v18  ;;  %v9635_v17 = vadd.f32 %v2451_v50, %v12342_v43  ;;  %v2453_v10 = vpop.f32.mrb[19].mxu0 }
 0x1bf   : > { %v12408_v9 = vpop.f32.mrb[45].mxu1  ;;  %v9634_v55 = vadd.f32 %v9633_v46, %v12183_v20  ;;  %v9637_v56 = vadd.f32 %v2453_v10, %v12346_v44  ;;  %3466 = vmatprep.mubr.bf16.mxu0 %v3128_v16 }
 0x1c0   : > { %v12412_v53 = vpop.f32.mrb[46].mxu1  ;;  %v9636_v11 = vadd.f32 %v9635_v17, %v12188_v22  ;;  %3467 = vmatmul.mubr.bf16.gmra.mrb[60].mxu0 %v3127_v63  ;;  %v3083_v12 = vmax.f32 %v9632_v51, 0.0 }
 0x1c1   : > { %v12416_v57 = vpop.f32.mrb[47].mxu1  ;;  %v9638_v58 = vadd.f32 %v9637_v56, %v12190_v23  ;;  %v3084_v18 = vmax.f32 %v9634_v55, 0.0 }
 0x1c2   : > { %v3087_v4 = vmax.f32 %v9636_v11, 0.0 }
 0x1c3   : > { %v3088_v1 = vmax.f32 %v9638_v58, 0.0  ;;  %v2457_v7 = vpop.f32.mrb[20].mxu0 }
 0x1c4   : > { %v9639_v5 = vadd.f32 %v2457_v7, %v12342_v43  ;;  %v2459_v19 = vpop.f32.mrb[21].mxu0  ;;  %v3131_v6 = vpack.c.bf16 %v3087_v4, %v3083_v12  ;;  %v12437_v7 = vsub.s32 2, %v12327_v35 }
 0x1c5   : > { %v9641_v20 = vadd.f32 %v2459_v19, %v12346_v44  ;;  %v2461_v24 = vpop.f32.mrb[22].mxu0  ;;  %v3132_v14 = vpack.c.bf16 %v3088_v1, %v3084_v18 }
 0x1c6   : > { %v9640_v25 = vadd.f32 %v9639_v5, %v12202_v27  ;;  %v9643_v22 = vadd.f32 %v2461_v24, %v12342_v43  ;;  %v2463_v26 = vpop.f32.mrb[23].mxu0 }
 0x1c7   : > { %v9642_v23 = vadd.f32 %v9641_v20, %v12207_v29  ;;  %v9645_v30 = vadd.f32 %v2463_v26, %v12346_v44  ;;  %3474 = vmatprep.mubr.bf16.mxu0 %v3132_v14 }
 0x1c8   : > { %v9644_v15 = vadd.f32 %v9643_v22, %v12212_v31  ;;  %3475 = vmatmul.mubr.bf16.gmra.mrb[64].mxu0 %v3131_v6  ;;  %v3091_v46 = vmax.f32 %v9640_v25, 0.0 }
 0x1c9   : > { %v9646_v63 = vadd.f32 %v9645_v30, %v12214_v32  ;;  %v3092_v16 = vmax.f32 %v9642_v23, 0.0 }
 0x1ca   : > { %v3095_v50 = vmax.f32 %v9644_v15, 0.0 }
 0x1cb   : > { %v3096_v51 = vmax.f32 %v9646_v63, 0.0  ;;  %v2467_v17 = vpop.f32.mrb[24].mxu0 }
 0x1cc   : > { %v9647_v27 = vadd.f32 %v2467_v17, %v12342_v43  ;;  %v2469_v10 = vpop.f32.mrb[25].mxu0  ;;  %v3135_v55 = vpack.c.bf16 %v3095_v50, %v3091_v46 }
 0x1cd   : > { %v9649_v56 = vadd.f32 %v2469_v10, %v12346_v44  ;;  %v2471_v29 = vpop.f32.mrb[26].mxu0  ;;  %v3136_v11 = vpack.c.bf16 %v3096_v51, %v3092_v16 }
 0x1ce   : > { %v9648_v58 = vadd.f32 %v9647_v27, %v12228_v37  ;;  %v9651_v31 = vadd.f32 %v2471_v29, %v12342_v43  ;;  %v2473_v12 = vpop.f32.mrb[27].mxu0  ;;  %v12440_v37 = vsub.s32 3, %v12327_v35 }
 0x1cf   : > { %v9650_v32 = vadd.f32 %v9649_v56, %v12233_v39  ;;  %v9653_v4 = vadd.f32 %v2473_v12, %v12346_v44  ;;  %3482 = vmatprep.mubr.bf16.mxu0 %v3136_v11 }
 0x1d0   : > { %v9652_v18 = vadd.f32 %v9651_v31, %v12235_v40  ;;  %3483 = vmatmul.mubr.bf16.gmra.mrb[68].mxu0 %v3135_v55  ;;  %v3099_v5 = vmax.f32 %v9648_v58, 0.0  ;;  %v12452_v63 = vrot.slane %v12335_v38, %v12440_v37 }
 0x1d1   : > { %v9654_v1 = vadd.f32 %v9653_v4, %v12237_v41  ;;  %v3100_v6 = vmax.f32 %v9650_v32, 0.0  ;;  %v12446_v41 = vrot.slane %v12335_v38, %v12437_v7 }
 0x1d2   : > { %v3103_v19 = vmax.f32 %v9652_v18, 0.0  ;;  %v9665_v27 = vadd.f32 %v12360_v61, %v12452_v63 }
 0x1d3   : > { %v3104_v20 = vmax.f32 %v9654_v1, 0.0  ;;  %v2477_v24 = vpop.f32.mrb[28].mxu0 }
 0x1d4   : > { %v9655_v39 = vadd.f32 %v2477_v24, %v12342_v43  ;;  %v2479_v14 = vpop.f32.mrb[29].mxu0  ;;  %v3139_v25 = vpack.c.bf16 %v3103_v19, %v3099_v5 }
 0x1d5   : > { %v9657_v40 = vadd.f32 %v2479_v14, %v12346_v44  ;;  %v2481_v22 = vpop.f32.mrb[30].mxu0  ;;  %v3140_v26 = vpack.c.bf16 %v3104_v20, %v3100_v6  ;;  %v9675_v6 = vadd.f32 %v12380_v21, %v12446_v41  ;;  %v9677_v14 = vadd.f32 %v12384_v28, %v12452_v63 }
 0x1d6   : > { %v9656_v23 = vadd.f32 %v9655_v39, %v12248_v45  ;;  %v9659_v30 = vadd.f32 %v2481_v22, %v12342_v43  ;;  %v2483_v15 = vpop.f32.mrb[31].mxu0  ;;  %v9663_v45 = vadd.f32 %v12357_v60, %v12446_v41 }
 0x1d7   : > { %v9658_v46 = vadd.f32 %v9657_v40, %v12253_v47  ;;  %v9661_v50 = vadd.f32 %v2483_v15, %v12346_v44  ;;  %3490 = vmatprep.mubr.bf16.mxu0 %v3140_v26  ;;  %v9667_v47 = vadd.f32 %v12364_v33, %v12446_v41  ;;  %v9671_v33 = vadd.f32 %v12373_v0, %v12446_v41 }
 0x1d8   : > { %v9660_v16 = vadd.f32 %v9659_v30, %v12255_v48  ;;  %3491 = vmatmul.mubr.bf16.gmra.mrb[72].mxu0 %v3139_v25  ;;  %v3107_v17 = vmax.f32 %v9656_v23, 0.0 }
 0x1d9   : > { %v9662_v51 = vadd.f32 %v9661_v50, %v12257_v49  ;;  %v3108_v38 = vmax.f32 %v9658_v46, 0.0  ;;  %v9669_v49 = vadd.f32 %v12368_v52, %v12452_v63  ;;  %v9673_v52 = vadd.f32 %v12376_v8, %v12452_v63 }
 0x1da   : > { %v3111_v43 = vmax.f32 %v9660_v16, 0.0 }
 0x1db   : > { %v3112_v10 = vmax.f32 %v9662_v51, 0.0  ;;  %v2972_v55 = vpop.f32.mrb[32].mxu0 }
 0x1dc   : > { %v9664_v44 = vadd.f32 %v9663_v45, %v2972_v55  ;;  %v2974_v56 = vpop.f32.mrb[33].mxu0  ;;  %v3143_v48 = vpack.c.bf16 %v3111_v43, %v3107_v17 }
 0x1dd   : > { %v9666_v29 = vadd.f32 %v9665_v27, %v2974_v56  ;;  %v2976_v11 = vpop.f32.mrb[34].mxu0  ;;  %v3144_v60 = vpack.c.bf16 %v3112_v10, %v3108_v38  ;;  %v9679_v27 = vadd.f32 %v12389_v54, %v12446_v41  ;;  %v9685_v54 = vadd.f32 %v12400_v13, %v12452_v63 }
 0x1de   : > { %v9668_v58 = vadd.f32 %v9667_v47, %v2976_v11  ;;  %v2978_v31 = vpop.f32.mrb[35].mxu0  ;;  %v3053_v61 = vmax.f32 %v9664_v44, 0.0  ;;  %v9681_v47 = vadd.f32 %v12392_v3, %v12452_v63 }
 0x1df   : > { %v9670_v12 = vadd.f32 %v9669_v49, %v2978_v31  ;;  %3498 = vmatprep.mubr.bf16.mxu0 %v3144_v60  ;;  %v3054_v4 = vmax.f32 %v9666_v29, 0.0  ;;  %v9683_v49 = vadd.f32 %v12396_v59, %v12446_v41 }
 0x1e0   : > { %v3057_v32 = vmax.f32 %v9668_v58, 0.0  ;;  %3499 = vmatmul.mubr.bf16.gmra.mrb[76].mxu0 %v3143_v48 }
 0x1e1   : > { %v3058_v18 = vmax.f32 %v9670_v12, 0.0  ;;  %3768 = vmatprep.mubr.bf16.mxu0 %v11375_v2 }
 0x1e2   : > { %v3117_v1 = vpack.c.bf16 %v3057_v32, %v3053_v61 }
 0x1e3   : > { %v3118_v5 = vpack.c.bf16 %v3058_v18, %v3054_v4  ;;  %v2982_v19 = vpop.f32.mrb[36].mxu0 }
 0x1e4   : > { %v9672_v20 = vadd.f32 %v9671_v33, %v2982_v19  ;;  %v2984_v39 = vpop.f32.mrb[37].mxu0 }
 0x1e5   : > { %v9674_v40 = vadd.f32 %v9673_v52, %v2984_v39  ;;  %v2986_v0 = vpop.f32.mrb[38].mxu0  ;;  %3539 = vmatprep.mubr.bf16.mxu1 %v3118_v5 }
 0x1e6   : > { %v3012_v24 = vpop.f32.mrb[48].mxu1  ;;  %v9676_v8 = vadd.f32 %v9675_v6, %v2986_v0  ;;  %v2988_v30 = vpop.f32.mrb[39].mxu0  ;;  %3540 = vmatmul.mubr.bf16.vlgmr.msra.gmra.mrb[64].mxu1 %v3117_v1  ;;  %v3061_v50 = vmax.f32 %v9672_v20, 0.0  ;;  %v9689_v0 = vadd.f32 %v12408_v9, %v12452_v63 }
 0x1e7   : > { %v9695_v25 = vadd.f32 %v3012_v24, %v12446_v41  ;;  %v3014_v22 = vpop.f32.mrb[49].mxu1  ;;  %v9678_v15 = vadd.f32 %v9677_v14, %v2988_v30  ;;  %v3062_v45 = vmax.f32 %v9674_v40, 0.0  ;;  %v9687_v14 = vadd.f32 %v12405_v62, %v12446_v41 }
 0x1e8   : > { %v9696_v26 = vadd.f32 %v3014_v22, %v12452_v63  ;;  %v3016_v23 = vpop.f32.mrb[50].mxu1  ;;  %v3065_v16 = vmax.f32 %v9676_v8, 0.0  ;;  %v9691_v30 = vadd.f32 %v12412_v53, %v12446_v41 }
 0x1e9   : > { %v9697_v21 = vadd.f32 %v3016_v23, %v12446_v41  ;;  %v3018_v46 = vpop.f32.mrb[51].mxu1  ;;  %v3085_v51 = vmax.f32 %v9695_v25, 0.0  ;;  %v3066_v43 = vmax.f32 %v9678_v15, 0.0 }
 0x1ea   : > { %v9698_v28 = vadd.f32 %v3018_v46, %v12452_v63  ;;  %v3086_v38 = vmax.f32 %v9696_v26, 0.0  ;;  %v3121_v10 = vpack.c.bf16 %v3065_v16, %v3061_v50  ;;  %v9693_v16 = vadd.f32 %v12416_v57, %v12452_v63 }
 0x1eb   : > { %v3089_v17 = vmax.f32 %v9697_v21, 0.0  ;;  %v3122_v56 = vpack.c.bf16 %v3066_v43, %v3062_v45  ;;  %v2992_v48 = vpop.f32.mrb[40].mxu0 }
 0x1ec   : > { %v3090_v55 = vmax.f32 %v9698_v28, 0.0  ;;  %v9680_v11 = vadd.f32 %v9679_v27, %v2992_v48  ;;  %v2994_v58 = vpop.f32.mrb[41].mxu0 }
 0x1ed   : > { %v12483_v44 = vpack.c.bf16 %v3089_v17, %v3085_v51  ;;  %v9682_v12 = vadd.f32 %v9681_v47, %v2994_v58  ;;  %v2996_v3 = vpop.f32.mrb[42].mxu0  ;;  %3547 = vmatprep.mubr.bf16.mxu1 %v3122_v56 }
 0x1ee   : > { %v12487_v29 = vpack.c.bf16 %v3090_v55, %v3086_v38  ;;  %v3022_v60 = vpop.f32.mrb[52].mxu1  ;;  %v9684_v4 = vadd.f32 %v9683_v49, %v2996_v3  ;;  %v2998_v33 = vpop.f32.mrb[43].mxu0  ;;  %3548 = vmatmul.mubr.bf16.gmra.mrb[68].mxu1 %v3121_v10  ;;  %v3069_v5 = vmax.f32 %v9680_v11, 0.0 }
 0x1ef   : > { %v9699_v31 = vadd.f32 %v3022_v60, %v12446_v41  ;;  %v3024_v61 = vpop.f32.mrb[53].mxu1  ;;  %v9686_v1 = vadd.f32 %v9685_v54, %v2998_v33  ;;  %v3070_v20 = vmax.f32 %v9682_v12, 0.0 }
 0x1f0   : > { %v9700_v32 = vadd.f32 %v3024_v61, %v12452_v63  ;;  %v3026_v18 = vpop.f32.mrb[54].mxu1  ;;  %v3073_v19 = vmax.f32 %v9684_v4, 0.0 }
 0x1f1   : > { %v9701_v59 = vadd.f32 %v3026_v18, %v12446_v41  ;;  %v3028_v52 = vpop.f32.mrb[55].mxu1  ;;  %v3093_v6 = vmax.f32 %v9699_v31, 0.0  ;;  %v3074_v39 = vmax.f32 %v9686_v1, 0.0 }
 0x1f2   : > { %v9702_v13 = vadd.f32 %v3028_v52, %v12452_v63  ;;  %v3094_v25 = vmax.f32 %v9700_v32, 0.0  ;;  %v3125_v40 = vpack.c.bf16 %v3073_v19, %v3069_v5 }
 0x1f3   : > { %v3097_v24 = vmax.f32 %v9701_v59, 0.0  ;;  %v3126_v8 = vpack.c.bf16 %v3074_v39, %v3070_v20  ;;  %v3002_v23 = vpop.f32.mrb[44].mxu0  ;;  %v10478_v39 = vld [vmem:[%s14616_s6] ss:$8 sps:$4 sm:$0xff]  }
 0x1f4   : > { %v3098_v22 = vmax.f32 %v9702_v13, 0.0  ;;  %v9688_v15 = vadd.f32 %v9687_v14, %v3002_v23  ;;  %v3004_v50 = vpop.f32.mrb[45].mxu0  ;;  %v10486_v14 = vld [vmem:[%s14616_s6 + $0x24] ss:$8 sps:$4 sm:$0xff]   ;;  %v10496_v23 = vld [vmem:[%s14616_s6 + $0x60] ss:$8 sps:$4 sm:$0xff]  }
 0x1f5   : > { %v3137_v26 = vpack.c.bf16 %v3097_v24, %v3093_v6  ;;  %v9690_v28 = vadd.f32 %v9689_v0, %v3004_v50  ;;  %v3006_v45 = vpop.f32.mrb[46].mxu0  ;;  %3555 = vmatprep.mubr.bf16.mxu1 %v3126_v8  ;;  %v10492_v0 = vld [vmem:[%s14616_s6 + $0x44] ss:$8 sps:$4 sm:$0xff]   ;;  %v10495_v8 = vld [vmem:[%s14616_s6 + $0x54] ss:$8 sps:$4 sm:$0xff]  }
 0x1f6   : > { %v3138_v21 = vpack.c.bf16 %v3098_v22, %v3094_v25  ;;  %v3032_v46 = vpop.f32.mrb[56].mxu1  ;;  %v9692_v17 = vadd.f32 %v9691_v30, %v3006_v45  ;;  %v3008_v27 = vpop.f32.mrb[47].mxu0  ;;  %3556 = vmatmul.mubr.bf16.gmra.mrb[72].mxu1 %v3125_v40  ;;  %v3077_v55 = vmax.f32 %v9688_v15, 0.0  ;;  %v10487_v25 = vld [vmem:[%s14616_s6 + $0x30] ss:$8 sps:$4 sm:$0xff]   ;;  %v10503_v45 = vld [vmem:[%s14618_s8 + $0x8] sm:$0xff]  }
 0x1f7   : > { %v9703_v62 = vadd.f32 %v3032_v46, %v12446_v41  ;;  %v3034_v51 = vpop.f32.mrb[57].mxu1  ;;  %v9694_v38 = vadd.f32 %v9693_v16, %v3008_v27  ;;  %v3078_v48 = vmax.f32 %v9690_v28, 0.0  ;;  %v10489_v40 = vld [vmem:[%s14616_s6 + $0x34] ss:$8 sps:$4 sm:$0xff]   ;;  %v10490_v22 = vld [vmem:[%s14616_s6 + $0x40] ss:$8 sps:$4 sm:$0xff]  }
 0x1f8   : > { %v9704_v9 = vadd.f32 %v3034_v51, %v12452_v63  ;;  %v3036_v43 = vpop.f32.mrb[58].mxu1  ;;  %v3081_v47 = vmax.f32 %v9692_v17, 0.0  ;;  %v10498_v30 = vld [vmem:[%s14616_s6 + $0x64] ss:$8 sps:$4 sm:$0xff]   ;;  %v10499_v15 = vld [vmem:[%s14616_s6 + $0x70] ss:$8 sps:$4 sm:$0xff]  }
 0x1f9   : > { %v9705_v53 = vadd.f32 %v3036_v43, %v12446_v41  ;;  %v3038_v10 = vpop.f32.mrb[59].mxu1  ;;  %v3101_v56 = vmax.f32 %v9703_v62, 0.0  ;;  %v3082_v11 = vmax.f32 %v9694_v38, 0.0  ;;  %v10502_v28 = vld [vmem:[%s14618_s8] sm:$0xff]   ;;  %v3932_v17 = vld [vmem:[%s12573_s0 + $0x10] sm:$0xff]  ;;  %v3933_v27 = vld [vmem:[%s12573_s0 + $0x18] sm:$0xff] }
 0x1fa   : > { %v9706_v57 = vadd.f32 %v3038_v10, %v12452_v63  ;;  %v3102_v60 = vmax.f32 %v9704_v9, 0.0  ;;  %v3129_v58 = vpack.c.bf16 %v3081_v47, %v3077_v55  ;;  %v3930_v43 = vld [vmem:[%s12573_s0] sm:$0xff]  ;;  %9549 = vmatprep.subr.bf16.mxu1 %v10502_v28  ;;  %3961 = vperm.xlu1 %10059, %v3932_v17   ;;  %v10504_v55 = vld [vmem:[%s14618_s8 + $0x10] sm:$0xff]  }
 0x1fb   : > { %v3105_v49 = vmax.f32 %v9705_v53, 0.0  ;;  %v3130_v12 = vpack.c.bf16 %v3082_v11, %v3078_v48  ;;  %3951 = vperm.xlu0 %10058, %v3930_v43   ;;  %v3931_v53 = vld [vmem:[%s12573_s0 + $0x8] sm:$0xff]  ;;  %9550 = vmatpush3.bf16.msra.mxu1 %v10502_v28  ;;  %v10505_v11 = vld [vmem:[%s14618_s8 + $0x18] sm:$0xff]   ;;  %v3942_v28 = vld [vmem:[%s12573_s0 + $0x60] sm:$0xff] }
 0x1fc   : > { %v3106_v54 = vmax.f32 %v9706_v57, 0.0  ;;  %9551 = vmatprep.subr.bf16.mxu1 %v10503_v45 }
 0x1fd   : > { %v3141_v31 = vpack.c.bf16 %v3105_v49, %v3101_v56  ;;  %3563 = vmatprep.mubr.bf16.mxu1 %v3130_v12  ;;  %v11376_v49 = vmov 1  }
 0x1fe   : > { %v3142_v61 = vpack.c.bf16 %v3106_v54, %v3102_v60  ;;  %v3042_v3 = vpop.f32.mrb[60].mxu1  ;;  %3564 = vmatmul.mubr.bf16.gmra.mrb[76].mxu1 %v3129_v58  ;;  %3966 = vperm.xlu1 %10059, %v3933_v27  }
 0x1ff   : > { %v9707_v32 = vadd.f32 %v3042_v3, %v12446_v41  ;;  %v3044_v4 = vpop.f32.mrb[61].mxu1  ;;  %3571 = vmatprep.mubr.bf16.mxu1 %v12487_v29  ;;  %v10484_v29 = vld [vmem:[%s14616_s6 + $0x20] ss:$8 sps:$4 sm:$0xff]   ;;  %3956 = vperm.xlu0 %10058, %v3931_v53  }
 0x200   : > { %v9708_v18 = vadd.f32 %v3044_v4, %v12452_v63  ;;  %v3046_v33 = vpop.f32.mrb[62].mxu1  ;;  %9552 = vmatpush3.bf16.msra.mxu1 %v10503_v45  ;;  %v3934_v3 = vld [vmem:[%s12573_s0 + $0x20] sm:$0xff]  ;;  %v3936_v4 = vld [vmem:[%s12573_s0 + $0x30] sm:$0xff] }
 0x201   : > { %v9709_v59 = vadd.f32 %v3046_v33, %v12446_v41  ;;  %v3048_v1 = vpop.f32.mrb[63].mxu1  ;;  %v3109_v5 = vmax.f32 %v9707_v32, 0.0  ;;  %v10480_v41 = vld [vmem:[%s14616_s6 + $0x4] ss:$8 sps:$4 sm:$0xff]   ;;  %9553 = vmatprep.subr.bf16.mxu1 %v10504_v55  ;;  %v3937_v33 = vld [vmem:[%s12573_s0 + $0x38] sm:$0xff] }
 0x202   : > { %v9710_v52 = vadd.f32 %v3048_v1, %v12452_v63  ;;  %v3110_v13 = vmax.f32 %v9708_v18, 0.0  ;;  %3736 = vmatprep.subr.bf16.mxu0 %v10480_v41  ;;  %v10481_v63 = vld [vmem:[%s14616_s6 + $0x10] ss:$8 sps:$4 sm:$0xff]   ;;  %10061 = vset.pattern.permute.xlu1 %v11376_v49 }
 0x203   : > { %v3113_v19 = vmax.f32 %v9709_v59, 0.0  ;;  %3737 = vmatpush1.bf16.msra.mxu0 %v10478_v39  ;;  %10060 = vset.pattern.permute.xlu0 %v11376_v49 }
 0x204   : > { %v3114_v6 = vmax.f32 %v9710_v52, 0.0  ;;  %4051 = vperm.xlu1 %10061, %v3931_v53   ;;  %4047 = vperm.xlu0 %10060, %v3930_v43  }
 0x205   : > { %v3145_v20 = vpack.c.bf16 %v3113_v19, %v3109_v5  ;;  %9554 = vmatpush3.bf16.msra.mxu1 %v10504_v55  ;;  %v3935_v19 = vld [vmem:[%s12573_s0 + $0x28] sm:$0xff] }
 0x206   : > { %v3146_v24 = vpack.c.bf16 %v3114_v6, %v3110_v13  ;;  %3572 = vmatmul.mubr.bf16.gmra.mrb[80].mxu1 %v12483_v44  ;;  %v10483_v44 = vld [vmem:[%s14616_s6 + $0x14] ss:$8 sps:$4 sm:$0xff]   ;;  %9555 = vmatprep.subr.bf16.mxu1 %v10505_v11  ;;  %v3939_v6 = vld [vmem:[%s12573_s0 + $0x48] sm:$0xff] }
 0x207   : > { %3579 = vmatprep.mubr.bf16.mxu1 %v3138_v21  ;;  %3738 = vmatprep.subr.bf16.mxu0 %v10483_v44  ;;  %v10501_v21 = vld [vmem:[%s14616_s6 + $0x74] ss:$8 sps:$4 sm:$0xff]   ;;  %v3938_v44 = vld [vmem:[%s12573_s0 + $0x40] sm:$0xff] }
 0x208   : > { %3739 = vmatpush1.bf16.msra.mxu0 %v10481_v63  ;;  %4055 = vperm.xlu1 %10061, %v3932_v17   ;;  %v3945_v17 = vld [vmem:[%s12573_s0 + $0x78] sm:$0xff] }
 0x209   : > { %3740 = vmatprep.subr.bf16.mxu0 %v10486_v14  ;;  %4059 = vperm.xlu0 %10060, %v3933_v27  }
 0x20a   : > { %9556 = vmatpush3.bf16.msra.mxu1 %v10505_v11 }
 0x20c   : > { %3741 = vmatpush1.bf16.msra.mxu0 %v10484_v29  ;;  %10062 = vset.pattern.permute.xlu1 %v11375_v2 }
 0x20d   : > { %3742 = vmatprep.subr.bf16.mxu0 %v10489_v40  ;;  %4063 = vperm.xlu0 %10060, %v3934_v3  }
 0x20e   : > { %3580 = vmatmul.mubr.bf16.gmra.mrb[84].mxu1 %v3137_v26  ;;  %v10493_v26 = vld [vmem:[%s14616_s6 + $0x50] ss:$8 sps:$4 sm:$0xff]   ;;  %3971 = vperm.xlu1 %10062, %v3934_v3  }
 0x20f   : > { %3587 = vmatprep.mubr.bf16.mxu1 %v3142_v61 }
 0x210   : > { %3743 = vmatpush1.bf16.msra.mxu0 %v10487_v25 }
 0x211   : > { %3744 = vmatprep.subr.bf16.mxu0 %v10492_v0  ;;  %4075 = vperm.xlu0 %10060, %v3937_v33   ;;  %v3941_v0 = vld [vmem:[%s12573_s0 + $0x58] sm:$0xff] }
 0x212   : > { %3981 = vperm.xlu1 %10062, %v3936_v4  }
 0x214   : > { %3745 = vmatpush1.bf16.msra.mxu0 %v10490_v22 }
 0x215   : > { %3746 = vmatprep.subr.bf16.mxu0 %v10495_v8  ;;  %10064 = vset.pattern.permute.xlu0 %v11375_v2  ;;  %v3940_v8 = vld [vmem:[%s12573_s0 + $0x50] sm:$0xff] }
 0x216   : > { %3588 = vmatmul.mubr.bf16.gmra.mrb[88].mxu1 %v3141_v31  ;;  %3986 = vperm.xlu1 %10062, %v3937_v33  }
 0x217   : > { %3595 = vmatprep.mubr.bf16.mxu1 %v3146_v24  ;;  %3976 = vperm.xlu0 %10064, %v3935_v19  }
 0x218   : > { %3747 = vmatpush1.bf16.msra.mxu0 %v10493_v26 }
 0x219   : > { %3748 = vmatprep.subr.bf16.mxu0 %v10498_v30 }
 0x21a   : > { %10063 = vset.pattern.permute.xlu1 %v11376_v49 }
 0x21b   : > { %3996 = vperm.xlu0 %10064, %v3939_v6   ;;  %4067 = vperm.xlu1 %10063, %v3935_v19  }
 0x21c   : > { %3749 = vmatpush1.bf16.msra.mxu0 %v10496_v23  ;;  %v12626_v23 = vld [vmem:[%s12573_s0 + $0x68] sm:$0xff] }
 0x21d   : > { %3750 = vmatprep.subr.bf16.mxu0 %v10501_v21 }
 0x21e   : > { %3596 = vmatmul.mubr.bf16.gmra.mrb[92].mxu1 %v3145_v20 }
 0x21f   : > { %10066 = vset.pattern.permute.xlu0 %v11376_v49  ;;  %4071 = vperm.xlu1 %10063, %v3936_v4   ;;  %v3944_v4 = vld [vmem:[%s12573_s0 + $0x70] sm:$0xff] }
 0x220   : > { %3751 = vmatpush1.bf16.msra.mxu0 %v10499_v15  ;;  %4079 = vperm.xlu0 %10066, %v3938_v44  }
 0x223   : > { %10065 = vset.pattern.permute.xlu1 %v11375_v2 }
 0x224   : > { %4091 = vperm.xlu0 %10066, %v3941_v0   ;;  %3991 = vperm.xlu1 %10065, %v3938_v44  }
 0x228   : > { %10069 = vset.pattern.permute.xlu0 %v11375_v2  ;;  %4001 = vperm.xlu1 %10065, %v3940_v8  }
 0x229   : > { %4016 = vperm.xlu0 %10069, %v12626_v23  }
 0x22c   : > { %4006 = vperm.xlu1 %10065, %v3941_v0  }
 0x22d   : > { %10070 = vset.pattern.permute.xlu0 %v11376_v49 }
 0x22e   : > { %4095 = vperm.xlu0 %10070, %v3942_v28  }
 0x230   : > { %10067 = vset.pattern.permute.xlu1 %v11376_v49 }
 0x231   : > { %4083 = vperm.xlu1 %10067, %v3939_v6  }
 0x232   : > { %4107 = vperm.xlu0 %10070, %v3945_v17  }
 0x235   : > { %4087 = vperm.xlu1 %10067, %v3940_v8  }
 0x239   : > { %10068 = vset.pattern.permute.xlu1 %v11375_v2 }
 0x23a   : > { %4011 = vperm.xlu1 %10068, %v3942_v28  }
 0x23e   : > { %4021 = vperm.xlu1 %10068, %v3944_v4  }
 0x242   : > { %4026 = vperm.xlu1 %10068, %v3945_v17  }
 0x246   : > { %10071 = vset.pattern.permute.xlu1 %v11376_v49 }
 0x247   : > { %4099 = vperm.xlu1 %10071, %v12626_v23  }
 0x24b   : > { %4103 = vperm.xlu1 %10071, %v3944_v4  }
 0x27b   : > { %v9293_v46 = vpop.f32.mrb[48].mxu0 }
 0x27c   : > { %v9294_v50 = vpop.f32.mrb[49].mxu0 }
 0x27d   : > { %v12561_v16 = vadd.f32 %v9294_v50, %v9293_v46  ;;  %v9296_v62 = vpop.f32.mrb[50].mxu0 }
 0x27e   : > { %v9297_v51 = vpop.f32.mrb[51].mxu0 }
 0x27f   : > { %v12578_v9 = vadd.f32 %v9297_v51, %v9296_v62 }
 0x283   : > { %v9299_v38 = vpop.f32.mrb[52].mxu0 }
 0x284   : > { %v9300_v10 = vpop.f32.mrb[53].mxu0 }
 0x285   : > { %v12587_v47 = vadd.f32 %v9300_v10, %v9299_v38  ;;  %v9302_v57 = vpop.f32.mrb[54].mxu0  ;;  %v12645_v10 = vld [vmem:[%s14615_s5] ss:$0 sm:$0xff] }
 0x286   : > { %v9303_v56 = vpop.f32.mrb[55].mxu0 }
 0x287   : > { %v12589_v48 = vadd.f32 %v9303_v56, %v9302_v57  ;;  %v3445_v56 = vadd.f32 %v12561_v16, %v12645_v10  ;;  %v3453_v16 = vadd.f32 %v12587_v47, %v12645_v10 }
 0x28b   : > { %v9305_v60 = vpop.f32.mrb[56].mxu0 }
 0x28c   : > { %v9306_v58 = vpop.f32.mrb[57].mxu0 }
 0x28d   : > { %v12596_v54 = vadd.f32 %v9306_v58, %v9305_v60  ;;  %v9308_v31 = vpop.f32.mrb[58].mxu0 }
 0x28e   : > { %v9309_v12 = vpop.f32.mrb[59].mxu0 }
 0x28f   : > { %v12598_v61 = vadd.f32 %v9309_v12, %v9308_v31  ;;  %v3448_v31 = vadd.f32 %v12578_v9, %v12645_v10  ;;  %v3456_v9 = vadd.f32 %v12589_v48, %v12645_v10  ;;  %v3461_v47 = vadd.f32 %v12596_v54, %v12645_v10 }
 0x293   : > { %v9311_v32 = vpop.f32.mrb[60].mxu0 }
 0x294   : > { %v9312_v18 = vpop.f32.mrb[61].mxu0 }
 0x295   : > { %v12604_v59 = vadd.f32 %v9312_v18, %v9311_v32  ;;  %v9314_v1 = vpop.f32.mrb[62].mxu0 }
 0x296   : > { %v9315_v52 = vpop.f32.mrb[63].mxu0 }
 0x297   : > { %v12606_v5 = vadd.f32 %v9315_v52, %v9314_v1  ;;  %v3469_v17 = vadd.f32 %v12604_v59, %v12645_v10 }
 0x29b   : > { %v9317_v13 = vpop.f32.mrb[64].mxu0 }
 0x29c   : > { %v9318_v20 = vpop.f32.mrb[65].mxu0 }
 0x29d   : > { %v12611_v24 = vadd.f32 %v9318_v20, %v9317_v13  ;;  %v9320_v39 = vpop.f32.mrb[66].mxu0 }
 0x29e   : > { %v9321_v41 = vpop.f32.mrb[67].mxu0 }
 0x29f   : > { %v12614_v63 = vadd.f32 %v9321_v41, %v9320_v39  ;;  %v3477_v59 = vadd.f32 %v12611_v24, %v12645_v10 }
 0x2a3   : > { %v9323_v29 = vpop.f32.mrb[68].mxu0 }
 0x2a4   : > { %v9324_v14 = vpop.f32.mrb[69].mxu0 }
 0x2a5   : > { %v12618_v25 = vadd.f32 %v9324_v14, %v9323_v29  ;;  %v9326_v40 = vpop.f32.mrb[70].mxu0 }
 0x2a6   : > { %v9327_v22 = vpop.f32.mrb[71].mxu0 }
 0x2a7   : > { %v12621_v26 = vadd.f32 %v9327_v22, %v9326_v40  ;;  %v3485_v24 = vadd.f32 %v12618_v25, %v12645_v10 }
 0x2ab   : > { %v9329_v30 = vpop.f32.mrb[72].mxu0 }
 0x2ac   : > { %v9330_v21 = vpop.f32.mrb[73].mxu0 }
 0x2ad   : > { %v12630_v15 = vadd.f32 %v9330_v21, %v9329_v30  ;;  %v9332_v46 = vpop.f32.mrb[74].mxu0  ;;  %v3464_v21 = vadd.f32 %v12598_v61, %v12645_v10  ;;  %v3472_v61 = vadd.f32 %v12606_v5, %v12645_v10  ;;  %v3480_v5 = vadd.f32 %v12614_v63, %v12645_v10 }
 0x2ae   : > { %v9333_v50 = vpop.f32.mrb[75].mxu0  ;;  %v3488_v63 = vadd.f32 %v12621_v26, %v12645_v10 }
 0x2af   : > { %v12632_v62 = vadd.f32 %v9333_v50, %v9332_v46  ;;  %v3493_v25 = vadd.f32 %v12630_v15, %v12645_v10 }
 0x2b1   : > { %v3496_v26 = vadd.f32 %v12632_v62, %v12645_v10 }
 0x2b3   : > { %v9335_v51 = vpop.f32.mrb[76].mxu0 }
 0x2b4   : > { %v9336_v45 = vpop.f32.mrb[77].mxu0 }
 0x2b5   : > { %v12638_v43 = vadd.f32 %v9336_v45, %v9335_v51  ;;  %v9338_v27 = vpop.f32.mrb[78].mxu0 }
 0x2b6   : > { %v9339_v53 = vpop.f32.mrb[79].mxu0 }
 0x2b7   : > { %v12640_v38 = vadd.f32 %v9339_v53, %v9338_v27  ;;  %v3501_v15 = vadd.f32 %v12638_v43, %v12645_v10  ;;  %v10506_v43 = vld [vmem:[%s14618_s8 + $0x20] sm:$0xff]  }
 0x2b8   : > { %9557 = vmatprep.subr.bf16.mxu1 %v10506_v43 }
 0x2b9   : > { %v9357_v55 = vpop.f32.mrb[64].mxu1  ;;  %v3504_v62 = vadd.f32 %v12640_v38, %v12645_v10  ;;  %9558 = vmatpush3.bf16.msra.mxu1 %v10506_v43  ;;  %v10507_v38 = vld [vmem:[%s14618_s8 + $0x28] sm:$0xff]   ;;  %v10508_v10 = vld [vmem:[%s14618_s8 + $0x30] sm:$0xff]  }
 0x2ba   : > { %v9358_v57 = vpop.f32.mrb[65].mxu1  ;;  %9559 = vmatprep.subr.bf16.mxu1 %v10507_v38 }
 0x2bb   : > { %v9359_v11 = vadd.f32 %v9358_v57, %v9357_v55  ;;  %v9360_v60 = vpop.f32.mrb[66].mxu1 }
 0x2bc   : > { %v9361_v58 = vpop.f32.mrb[67].mxu1 }
 0x2bd   : > { %v3542_v12 = vadd.f32 %v9359_v11, %v3445_v56  ;;  %v9362_v3 = vadd.f32 %v9361_v58, %v9360_v60  ;;  %9560 = vmatpush3.bf16.msra.mxu1 %v10507_v38 }
 0x2be   : > { %9561 = vmatprep.subr.bf16.mxu1 %v10508_v10 }
 0x2bf   : > { %v3545_v32 = vadd.f32 %v9362_v3, %v3448_v31  ;;  %v3604_v18 = vmax.f32 %v3542_v12, 0.0 }
 0x2c1   : > { %v3605_v33 = vmax.f32 %v3545_v32, 0.0  ;;  %v9363_v1 = vpop.f32.mrb[68].mxu1  ;;  %9562 = vmatpush3.bf16.msra.mxu1 %v10508_v10 }
 0x2c2   : > { %v9364_v52 = vpop.f32.mrb[69].mxu1 }
 0x2c3   : > { %v3620_v19 = vpack.c.bf16 %v3605_v33, %v3604_v18  ;;  %v9365_v13 = vadd.f32 %v9364_v52, %v9363_v1  ;;  %v9366_v6 = vpop.f32.mrb[70].mxu1 }
 0x2c4   : > { %v9367_v20 = vpop.f32.mrb[71].mxu1 }
 0x2c5   : > { %v3550_v39 = vadd.f32 %v9365_v13, %v3453_v16  ;;  %v9368_v41 = vadd.f32 %v9367_v20, %v9366_v6  ;;  %3769 = vmatmul.mubr.bf16.vlgmr.msra.gmra.mrb[80].mxu0 %v3620_v19 }
 0x2c6   : > { %3778 = vmatprep.mubr.bf16.mxu0 %v11375_v2 }
 0x2c7   : > { %v3553_v44 = vadd.f32 %v9368_v41, %v3456_v9  ;;  %v3606_v29 = vmax.f32 %v3550_v39, 0.0 }
 0x2c9   : > { %v3607_v14 = vmax.f32 %v3553_v44, 0.0  ;;  %v9369_v40 = vpop.f32.mrb[72].mxu1 }
 0x2ca   : > { %v9370_v22 = vpop.f32.mrb[73].mxu1 }
 0x2cb   : > { %v9371_v0 = vadd.f32 %v9370_v22, %v9369_v40  ;;  %v9372_v8 = vpop.f32.mrb[74].mxu1  ;;  %v3621_v30 = vpack.c.bf16 %v3607_v14, %v3606_v29 }
 0x2cc   : > { %v9373_v48 = vpop.f32.mrb[75].mxu1 }
 0x2cd   : > { %v3558_v46 = vadd.f32 %v9371_v0, %v3461_v47  ;;  %v9374_v50 = vadd.f32 %v9373_v48, %v9372_v8  ;;  %3779 = vmatmul.mubr.bf16.gmra.mrb[84].mxu0 %v3621_v30 }
 0x2ce   : > { %3788 = vmatprep.mubr.bf16.mxu0 %v11375_v2 }
 0x2cf   : > { %v3561_v28 = vadd.f32 %v9374_v50, %v3464_v21  ;;  %v3608_v49 = vmax.f32 %v3558_v46, 0.0 }
 0x2d1   : > { %v3609_v51 = vmax.f32 %v3561_v28, 0.0  ;;  %v9375_v45 = vpop.f32.mrb[76].mxu1 }
 0x2d2   : > { %v9376_v54 = vpop.f32.mrb[77].mxu1 }
 0x2d3   : > { %v9377_v27 = vadd.f32 %v9376_v54, %v9375_v45  ;;  %v9378_v23 = vpop.f32.mrb[78].mxu1  ;;  %v3622_v53 = vpack.c.bf16 %v3609_v51, %v3608_v49 }
 0x2d4   : > { %v9379_v55 = vpop.f32.mrb[79].mxu1 }
 0x2d5   : > { %v3566_v57 = vadd.f32 %v9377_v27, %v3469_v17  ;;  %v9380_v56 = vadd.f32 %v9379_v55, %v9378_v23  ;;  %3789 = vmatmul.mubr.bf16.gmra.mrb[88].mxu0 %v3622_v53 }
 0x2d6   : > { %3798 = vmatprep.mubr.bf16.mxu0 %v11375_v2 }
 0x2d7   : > { %v3569_v11 = vadd.f32 %v9380_v56, %v3472_v61  ;;  %v3610_v60 = vmax.f32 %v3566_v57, 0.0 }
 0x2d9   : > { %v3611_v58 = vmax.f32 %v3569_v11, 0.0  ;;  %v9381_v31 = vpop.f32.mrb[80].mxu1 }
 0x2da   : > { %v9382_v12 = vpop.f32.mrb[81].mxu1 }
 0x2db   : > { %v9383_v3 = vadd.f32 %v9382_v12, %v9381_v31  ;;  %v9384_v32 = vpop.f32.mrb[82].mxu1  ;;  %v3623_v4 = vpack.c.bf16 %v3611_v58, %v3610_v60  ;;  %v10509_v58 = vld [vmem:[%s14618_s8 + $0x38] sm:$0xff]   ;;  %v10512_v31 = vld [vmem:[%s14620_s10 + $0x4] ss:$16 sps:$4 sm:$0xff]  }
 0x2dc   : > { %v9385_v18 = vpop.f32.mrb[83].mxu1  ;;  %9563 = vmatprep.subr.bf16.mxu1 %v10509_v58  ;;  %v10513_v12 = vld [vmem:[%s14620_s10 + $0x8] ss:$16 sps:$4 sm:$0xff]  }
 0x2dd   : > { %v3574_v33 = vadd.f32 %v9383_v3, %v3477_v59  ;;  %v9386_v1 = vadd.f32 %v9385_v18, %v9384_v32  ;;  %3799 = vmatmul.mubr.bf16.gmra.mrb[92].mxu0 %v3623_v4  ;;  %9564 = vmatpush3.bf16.msra.mxu1 %v10509_v58  ;;  %v10515_v59 = vld [vmem:[%s14620_s10 + $0xc] ss:$16 sps:$4 sm:$0xff]   ;;  %v10519_v32 = vld [vmem:[%s14620_s10 + $0x28] ss:$16 sps:$4 sm:$0xff]  }
 0x2de   : > { %3808 = vmatprep.mubr.bf16.mxu0 %v11375_v2  ;;  %4572 = vmatprep.subr.bf16.mxu1 %v10512_v31  ;;  %v10521_v3 = vld [vmem:[%s14620_s10 + $0x2c] ss:$16 sps:$4 sm:$0xff]   ;;  %v10525_v18 = vld [vmem:[%s14620_s10 + $0x48] ss:$16 sps:$4 sm:$0xff]  }
 0x2df   : > { %v3577_v52 = vadd.f32 %v9386_v1, %v3480_v5  ;;  %v3612_v16 = vmax.f32 %v3574_v33, 0.0  ;;  %4685 = vmatprep.subr.bf16.mxu0 %v10515_v59  ;;  %v10527_v4 = vld [vmem:[%s14620_s10 + $0x4c] ss:$16 sps:$4 sm:$0xff]   ;;  %v12727_v33 = vpop.permute.xlu1 %3961  ;;  %v10531_v1 = vld [vmem:[%s14620_s10 + $0x68] ss:$16 sps:$4 sm:$0xff]  }
 0x2e0   : > { %4686 = vmatpush1.bf16.msra.mxu0 %v10513_v12  ;;  %v10533_v5 = vld [vmem:[%s14620_s10 + $0x6c] ss:$16 sps:$4 sm:$0xff]  }
 0x2e1   : > { %v3613_v19 = vmax.f32 %v3577_v52, 0.0  ;;  %v9387_v13 = vpop.f32.mrb[84].mxu1  ;;  %4687 = vmatprep.subr.bf16.mxu0 %v10521_v3  ;;  %v10539_v52 = vld [vmem:[%s14620_s10 + $0x8c] ss:$16 sps:$4 sm:$0xff]  }
 0x2e2   : > { %v9388_v6 = vpop.f32.mrb[85].mxu1 }
 0x2e3   : > { %v9389_v20 = vadd.f32 %v9388_v6, %v9387_v13  ;;  %v9390_v9 = vpop.f32.mrb[86].mxu1  ;;  %v3624_v39 = vpack.c.bf16 %v3613_v19, %v3612_v16  ;;  %v10537_v16 = vld [vmem:[%s14620_s10 + $0x88] ss:$16 sps:$4 sm:$0xff]   ;;  %v12738_v19 = vpop.permute.xlu1 %3966  ;;  %v10545_v13 = vld [vmem:[%s14620_s10 + $0xac] ss:$16 sps:$4 sm:$0xff]  }
 0x2e4   : > { %v9391_v41 = vpop.f32.mrb[87].mxu1  ;;  %4688 = vmatpush1.bf16.msra.mxu0 %v10519_v32  ;;  %v10543_v6 = vld [vmem:[%s14620_s10 + $0xa8] ss:$16 sps:$4 sm:$0xff]  }
 0x2e5   : > { %v3582_v44 = vadd.f32 %v9389_v20, %v3485_v24  ;;  %v9392_v29 = vadd.f32 %v9391_v41, %v9390_v9  ;;  %3809 = vmatmul.mubr.bf16.gmra.mrb[96].mxu0 %v3624_v39  ;;  %4689 = vmatprep.subr.bf16.mxu0 %v10527_v4  ;;  %v3644_v39 = vld [vmem:[%s14617_s7] sm:$0x3] }
 0x2e6   : > { %3818 = vmatprep.mubr.bf16.mxu0 %v11375_v2 }
 0x2e7   : > { %v3585_v14 = vadd.f32 %v9392_v29, %v3488_v63  ;;  %v3614_v40 = vmax.f32 %v3582_v44, 0.0  ;;  %v12746_v24 = vpop.permute.xlu1 %4051  ;;  %v12758_v63 = vrot.slane %v3644_v39, %v12330_v36  ;;  %v3952_v44 = vpop.permute.xlu0 %3951  ;;  %v12761_v29 = vrot.slane %v3644_v39, %v12338_v42 }
 0x2e8   : > { %4690 = vmatpush1.bf16.msra.mxu0 %v10525_v18 }
 0x2e9   : > { %v3615_v22 = vmax.f32 %v3585_v14, 0.0  ;;  %v9393_v47 = vpop.f32.mrb[88].mxu1  ;;  %4691 = vmatprep.subr.bf16.mxu0 %v10533_v5 }
 0x2ea   : > { %v9394_v0 = vpop.f32.mrb[89].mxu1 }
 0x2eb   : > { %v9395_v8 = vadd.f32 %v9394_v0, %v9393_v47  ;;  %v9396_v30 = vpop.f32.mrb[90].mxu1  ;;  %v3625_v48 = vpack.c.bf16 %v3615_v22, %v3614_v40  ;;  %v12748_v20 = vpop.permute.xlu1 %4055 }
 0x2ec   : > { %v9397_v21 = vpop.f32.mrb[91].mxu1  ;;  %4692 = vmatpush1.bf16.msra.mxu0 %v10531_v1 }
 0x2ed   : > { %v3590_v46 = vadd.f32 %v9395_v8, %v3493_v25  ;;  %v9398_v50 = vadd.f32 %v9397_v21, %v9396_v30  ;;  %3819 = vmatmul.mubr.bf16.gmra.mrb[100].mxu0 %v3625_v48  ;;  %4693 = vmatprep.subr.bf16.mxu0 %v10539_v52  ;;  %v3957_v48 = vpop.permute.xlu0 %3956 }
 0x2ee   : > { %3828 = vmatprep.mubr.bf16.mxu0 %v11375_v2 }
 0x2ef   : > { %v3593_v28 = vadd.f32 %v9398_v50, %v3496_v26  ;;  %v3616_v49 = vmax.f32 %v3590_v46, 0.0  ;;  %v12750_v9 = vpop.permute.xlu1 %3971 }
 0x2f0   : > { %4694 = vmatpush1.bf16.msra.mxu0 %v10537_v16 }
 0x2f1   : > { %v3617_v51 = vmax.f32 %v3593_v28, 0.0  ;;  %v9399_v45 = vpop.f32.mrb[92].mxu1  ;;  %4695 = vmatprep.subr.bf16.mxu0 %v10545_v13 }
 0x2f2   : > { %v9400_v54 = vpop.f32.mrb[93].mxu1 }
 0x2f3   : > { %v9401_v17 = vadd.f32 %v9400_v54, %v9399_v45  ;;  %v9402_v27 = vpop.f32.mrb[94].mxu1  ;;  %v3626_v23 = vpack.c.bf16 %v3617_v51, %v3616_v49  ;;  %v12755_v41 = vpop.permute.xlu1 %3981 }
 0x2f4   : > { %v9403_v53 = vpop.f32.mrb[95].mxu1  ;;  %4696 = vmatpush1.bf16.msra.mxu0 %v10543_v6 }
 0x2f5   : > { %v3598_v55 = vadd.f32 %v9401_v17, %v3501_v15  ;;  %v9404_v61 = vadd.f32 %v9403_v53, %v9402_v27  ;;  %3829 = vmatmul.mubr.bf16.gmra.mrb[104].mxu0 %v3626_v23  ;;  %v12801_v15 = vand.u32 127, %v842_v34  ;;  %v4048_v17 = vpop.permute.xlu0 %4047 }
 0x2f6   : > { %3838 = vmatprep.mubr.bf16.mxu0 %v11375_v2 }
 0x2f7   : > { %v3601_v57 = vadd.f32 %v9404_v61, %v3504_v62  ;;  %v3618_v56 = vmax.f32 %v3598_v55, 0.0  ;;  %v12779_v25 = vpop.permute.xlu1 %3986  ;;  %vm3948_vm2 = vcmp.eq.s32.totalorder %v12801_v15, 0  ;;  %vm4045_vm3 = vcmp.eq.s32.totalorder %v12801_v15, 1  ;;  %v10546_v15 = vld [vmem:[%s14620_s10 + $0xc0] ss:$16 sps:$4 sm:$0xff]  }
 0x2f8   : > { %v4030_v10 = vsel %vm3948_vm2, %v3957_v48, 0.0 }
 0x2f9   : > { %v3619_v11 = vmax.f32 %v3601_v57, 0.0  ;;  %v4111_v16 = vsel %vm4045_vm3, %v12746_v24, %v4030_v10  ;;  %v4031_v24 = vsel %vm3948_vm2, %v12727_v33, 0.0 }
 0x2fa   : > { %v4112_v33 = vsel %vm4045_vm3, %v12748_v20, %v4031_v24 }
 0x2fb   : > { %v3627_v60 = vpack.c.bf16 %v3619_v11, %v3618_v56  ;;  %v12795_v51 = vpop.permute.xlu1 %4067  ;;  %v4029_v11 = vsel %vm3948_vm2, %v3952_v44, 0.0 }
 0x2fc   : > { %v4110_v59 = vsel %vm4045_vm3, %v4048_v17, %v4029_v11 }
 0x2fd   : > { %3839 = vmatmul.mubr.bf16.gmra.mrb[108].mxu0 %v3627_v60  ;;  %v4060_v60 = vpop.permute.xlu0 %4059 }
 0x2fe   : > { %4717 = vmatprep.mubr.bf16.mxu0 %v11375_v2 }
 0x2ff   : > { %v12819_v56 = vpop.permute.xlu1 %4071 }
 0x301   : > { %v4064_v13 = vpop.permute.xlu0 %4063 }
 0x303   : > { %v12832_v4 = vpop.permute.xlu1 %3991 }
 0x398   : > { %v3770_v14 = vpop.f32.mrb[80].mxu0 }
 0x399   : > { %v12770_v40 = vadd.f32 %v3770_v14, %v12758_v63  ;;  %v3772_v22 = vpop.f32.mrb[81].mxu0 }
 0x39a   : > { %v3773_v47 = vadd.f32 %v3772_v22, %v12761_v29  ;;  %v3774_v0 = vpop.f32.mrb[82].mxu0 }
 0x39b   : > { %3850 = vst.msk [vmem:[%s12767_s19] sm:$0xff] %vm3849_vm1, %v12770_v40  ;;  %v12785_v8 = vadd.f32 %v3774_v0, %v12758_v63  ;;  %v3776_v30 = vpop.f32.mrb[83].mxu0 }
 0x39c   : > { %3866 = vst.msk [vmem:[%s12776_s26] sm:$0xff] %vm3849_vm1, %v3773_v47  ;;  %v3882_v21 = vmul.f32 0.5, %v3773_v47  ;;  %v3777_v26 = vadd.f32 %v3776_v30, %v12761_v29 }
 0x39d   : > { %3851 = vst.msk [vmem:[%s12767_s19 + $0x8] sm:$0xff] %vm3849_vm1, %v12785_v8 }
 0x39e   : > { %v3898_v46 = vmul.f32 1.442695, %v3882_v21  ;;  %3867 = vst.msk [vmem:[%s12776_s26 + $0x8] sm:$0xff] %vm3849_vm1, %v3777_v26  ;;  %v3883_v50 = vmul.f32 0.5, %v3777_v26  ;;  %v12856_v21 = vpop.permute.xlu1 %4001 }
 0x3a0   : > { %10878 = vpow2.f32 %v3898_v46  ;;  %v3900_v28 = vmul.f32 1.442695, %v3883_v50  ;;  %v3780_v49 = vpop.f32.mrb[84].mxu0 }
 0x3a1   : > { %v12798_v45 = vadd.f32 %v3780_v49, %v12758_v63  ;;  %v3782_v54 = vpop.f32.mrb[85].mxu0 }
 0x3a2   : > { %10880 = vpow2.f32 %v3900_v28  ;;  %v3783_v27 = vadd.f32 %v3782_v54, %v12761_v29  ;;  %v3784_v23 = vpop.f32.mrb[86].mxu0 }
 0x3a3   : > { %3852 = vst.msk [vmem:[%s12767_s19 + $0x10] sm:$0xff] %vm3849_vm1, %v12798_v45  ;;  %v12808_v53 = vadd.f32 %v3784_v23, %v12758_v63  ;;  %v3786_v62 = vpop.f32.mrb[87].mxu0 }
 0x3a4   : > { %3868 = vst.msk [vmem:[%s12776_s26 + $0x10] sm:$0xff] %vm3849_vm1, %v3783_v27  ;;  %v3884_v55 = vmul.f32 0.5, %v3783_v27  ;;  %v3787_v61 = vadd.f32 %v3786_v62, %v12761_v29 }
 0x3a5   : > { %3853 = vst.msk [vmem:[%s12767_s19 + $0x18] sm:$0xff] %vm3849_vm1, %v12808_v53 }
 0x3a6   : > { %v3902_v34 = vmul.f32 1.442695, %v3884_v55  ;;  %3869 = vst.msk [vmem:[%s12776_s26 + $0x18] sm:$0xff] %vm3849_vm1, %v3787_v61  ;;  %v3885_v57 = vmul.f32 0.5, %v3787_v61 }
 0x3a8   : > { %10882 = vpow2.f32 %v3902_v34  ;;  %v3904_v43 = vmul.f32 1.442695, %v3885_v57  ;;  %v3790_v38 = vpop.f32.mrb[88].mxu0 }
 0x3a9   : > { %v12827_v58 = vadd.f32 %v3790_v38, %v12758_v63  ;;  %v3792_v31 = vpop.f32.mrb[89].mxu0  ;;  %v12887_v38 = vpop.permute.xlu1 %4006 }
 0x3aa   : > { %v10879_v12 = vpop.eup %10878  ;;  %10884 = vpow2.f32 %v3904_v43  ;;  %v3793_v3 = vadd.f32 %v3792_v31, %v12761_v29  ;;  %v3794_v32 = vpop.f32.mrb[90].mxu0 }
 0x3ab   : > { %3854 = vst.msk [vmem:[%s12767_s19 + $0x20] sm:$0xff] %vm3849_vm1, %v12827_v58  ;;  %v12838_v18 = vadd.f32 %v3794_v32, %v12758_v63  ;;  %v3796_v5 = vpop.f32.mrb[91].mxu0  ;;  %v4126_v1 = vmul.f32 %v10879_v12, %v4110_v59 }
 0x3ac   : > { %v10881_v52 = vpop.eup %10880  ;;  %3870 = vst.msk [vmem:[%s12776_s26 + $0x20] sm:$0xff] %vm3849_vm1, %v3793_v3  ;;  %v3886_v6 = vmul.f32 0.5, %v3793_v3  ;;  %v3797_v39 = vadd.f32 %v3796_v5, %v12761_v29 }
 0x3ad   : > { %3855 = vst.msk [vmem:[%s12767_s19 + $0x28] sm:$0xff] %vm3849_vm1, %v12838_v18  ;;  %v4127_v44 = vmul.f32 %v10881_v52, %v4111_v16  ;;  %v4142_v14 = vadd.f32 %v4126_v1, %v12770_v40  ;;  %v4032_v40 = vsel %vm3948_vm2, %v12738_v19, 0.0 }
 0x3ae   : > { %v3906_v22 = vmul.f32 1.442695, %v3886_v6  ;;  %3871 = vst.msk [vmem:[%s12776_s26 + $0x28] sm:$0xff] %vm3849_vm1, %v3797_v39  ;;  %v3887_v47 = vmul.f32 0.5, %v3797_v39  ;;  %v4113_v20 = vsel %vm4045_vm3, %v4060_v60, %v4032_v40  ;;  %v4033_v60 = vsel %vm3948_vm2, %v12750_v9, 0.0 }
 0x3af   : > { %v4143_v0 = vadd.f32 %v4127_v44, %v12785_v8  ;;  %v12867_v8 = vpop.permute.xlu0 %4075  ;;  %v10518_v9 = vld [vmem:[%s14620_s10 + $0x24] ss:$16 sps:$4 sm:$0xff]   ;;  %v4114_v1 = vsel %vm4045_vm3, %v4064_v13, %v4033_v60 }
 0x3b0   : > { %10886 = vpow2.f32 %v3906_v22  ;;  %v3908_v30 = vmul.f32 1.442695, %v3887_v47  ;;  %v3800_v48 = vpop.f32.mrb[92].mxu0  ;;  %v12918_v47 = vpop.permute.xlu1 %4083 }
 0x3b1   : > { %v12862_v26 = vadd.f32 %v3800_v48, %v12758_v63  ;;  %v3802_v46 = vpop.f32.mrb[93].mxu0  ;;  %v4158_v50 = vpack.c.bf16 %v4143_v0, %v4142_v14  ;;  %v10516_v0 = vld [vmem:[%s14620_s10 + $0x20] ss:$16 sps:$4 sm:$0xff]  }
 0x3b2   : > { %v10883_v28 = vpop.eup %10882  ;;  %10888 = vpow2.f32 %v3908_v30  ;;  %v3803_v49 = vadd.f32 %v3802_v46, %v12761_v29  ;;  %v3804_v54 = vpop.f32.mrb[94].mxu0 }
 0x3b3   : > { %v4128_v19 = vmul.f32 %v10883_v28, %v4112_v33  ;;  %3856 = vst.msk [vmem:[%s12767_s19 + $0x30] sm:$0xff] %vm3849_vm1, %v12862_v26  ;;  %v12874_v17 = vadd.f32 %v3804_v54, %v12758_v63  ;;  %v3806_v27 = vpop.f32.mrb[95].mxu0  ;;  %9565 = vmatprep.mubr.bf16.mxu1 %v4158_v50  ;;  %v3977_v11 = vpop.permute.xlu0 %3976  ;;  %v4035_v50 = vsel %vm3948_vm2, %v12755_v41, 0.0  ;;  %v4036_v54 = vsel %vm3948_vm2, %v12779_v25, 0.0 }
 0x3b4   : > { %v10885_v23 = vpop.eup %10884  ;;  %3872 = vst.msk [vmem:[%s12776_s26 + $0x30] sm:$0xff] %vm3849_vm1, %v3803_v49  ;;  %v3888_v62 = vmul.f32 0.5, %v3803_v49  ;;  %v3807_v55 = vadd.f32 %v3806_v27, %v12761_v29  ;;  %v4034_v59 = vsel %vm3948_vm2, %v3977_v11, 0.0 }
 0x3b5   : > { %v4129_v61 = vmul.f32 %v10885_v23, %v4113_v20  ;;  %3857 = vst.msk [vmem:[%s12767_s19 + $0x38] sm:$0xff] %vm3849_vm1, %v12874_v17  ;;  %v4144_v34 = vadd.f32 %v4128_v19, %v12798_v45  ;;  %v10510_v45 = vld [vmem:[%s14620_s10] ss:$16 sps:$4 sm:$0xff]   ;;  %v4115_v13 = vsel %vm4045_vm3, %v12795_v51, %v4034_v59  ;;  %v10524_v51 = vld [vmem:[%s14620_s10 + $0x44] ss:$16 sps:$4 sm:$0xff]   ;;  %v4116_v20 = vsel %vm4045_vm3, %v12819_v56, %v4035_v50 }
 0x3b6   : > { %v3910_v57 = vmul.f32 1.442695, %v3888_v62  ;;  %3873 = vst.msk [vmem:[%s12776_s26 + $0x38] sm:$0xff] %vm3849_vm1, %v3807_v55  ;;  %v3889_v43 = vmul.f32 0.5, %v3807_v55  ;;  %v12952_v62 = vpop.permute.xlu1 %4087  ;;  %v4117_v56 = vsel %vm4045_vm3, %v12867_v8, %v4036_v54  ;;  %v10536_v8 = vld [vmem:[%s14620_s10 + $0x84] ss:$16 sps:$4 sm:$0xff]  }
 0x3b7   : > { %v4145_v10 = vadd.f32 %v4129_v61, %v12808_v53  ;;  %v3997_v61 = vpop.permute.xlu0 %3996 }
 0x3b8   : > { %10890 = vpow2.f32 %v3910_v57  ;;  %v3912_v31 = vmul.f32 1.442695, %v3889_v43  ;;  %v3810_v12 = vpop.f32.mrb[96].mxu0 }
 0x3b9   : > { %v12899_v3 = vadd.f32 %v3810_v12, %v12758_v63  ;;  %v3812_v32 = vpop.f32.mrb[97].mxu0  ;;  %v4159_v5 = vpack.c.bf16 %v4145_v10, %v4144_v34 }
 0x3ba   : > { %v10887_v53 = vpop.eup %10886  ;;  %10892 = vpow2.f32 %v3912_v31  ;;  %v3813_v52 = vadd.f32 %v3812_v32, %v12761_v29  ;;  %v3814_v16 = vpop.f32.mrb[98].mxu0  ;;  %v10528_v31 = vld [vmem:[%s14620_s10 + $0x60] ss:$16 sps:$4 sm:$0xff]  }
 0x3bb   : > { %3858 = vst.msk [vmem:[%s12767_s19 + $0x40] sm:$0xff] %vm3849_vm1, %v12899_v3  ;;  %v12911_v6 = vadd.f32 %v3814_v16, %v12758_v63  ;;  %v3816_v39 = vpop.f32.mrb[99].mxu0  ;;  %9566 = vmatmul.mubr.bf16.vlgmr.msra.gmra.mrb[96].mxu1 %v4159_v5  ;;  %v4130_v44 = vmul.f32 %v10887_v53, %v4114_v1  ;;  %v12979_v5 = vpop.permute.xlu1 %4011  ;;  %v4038_v16 = vsel %vm3948_vm2, %v3997_v61, 0.0 }
 0x3bc   : > { %v10889_v14 = vpop.eup %10888  ;;  %3874 = vst.msk [vmem:[%s12776_s26 + $0x40] sm:$0xff] %vm3849_vm1, %v3813_v52  ;;  %v3890_v22 = vmul.f32 0.5, %v3813_v52  ;;  %v3817_v24 = vadd.f32 %v3816_v39, %v12761_v29  ;;  %4573 = vmatpush1.bf16.msra.mxu1 %v10510_v45  ;;  %v10534_v52 = vld [vmem:[%s14620_s10 + $0x80] ss:$16 sps:$4 sm:$0xff]   ;;  %v4080_v39 = vpop.permute.xlu0 %4079 }
 0x3bd   : > { %v4131_v30 = vmul.f32 %v10889_v14, %v4115_v13  ;;  %3859 = vst.msk [vmem:[%s12767_s19 + $0x48] sm:$0xff] %vm3849_vm1, %v12911_v6  ;;  %v4146_v48 = vadd.f32 %v4130_v44, %v12827_v58  ;;  %4574 = vmatprep.subr.bf16.mxu1 %v10518_v9  ;;  %v10522_v58 = vld [vmem:[%s14620_s10 + $0x40] ss:$16 sps:$4 sm:$0xff]   ;;  %v4037_v9 = vsel %vm3948_vm2, %v12832_v4, 0.0 }
 0x3be   : > { %v3914_v40 = vmul.f32 1.442695, %v3890_v22  ;;  %3875 = vst.msk [vmem:[%s12776_s26 + $0x48] sm:$0xff] %vm3849_vm1, %v3817_v24  ;;  %v3891_v46 = vmul.f32 0.5, %v3817_v24  ;;  %v4118_v22 = vsel %vm4045_vm3, %v4080_v39, %v4037_v9 }
 0x3bf   : > { %v4147_v28 = vadd.f32 %v4131_v30, %v12838_v18  ;;  %v10530_v18 = vld [vmem:[%s14620_s10 + $0x64] ss:$16 sps:$4 sm:$0xff]   ;;  %v13008_v50 = vpop.permute.xlu1 %4021 }
 0x3c0   : > { %10894 = vpow2.f32 %v3914_v40  ;;  %v3916_v33 = vmul.f32 1.442695, %v3891_v46  ;;  %v3820_v49 = vpop.f32.mrb[100].mxu0  ;;  %4575 = vmatpush1.bf16.msra.mxu1 %v10516_v0  ;;  %v4119_v46 = vsel %vm4045_vm3, %v12918_v47, %v4038_v16 }
 0x3c1   : > { %v12944_v19 = vadd.f32 %v3820_v49, %v12758_v63  ;;  %v3822_v27 = vpop.f32.mrb[101].mxu0  ;;  %v4160_v41 = vpack.c.bf16 %v4147_v28, %v4146_v48  ;;  %4576 = vmatprep.subr.bf16.mxu1 %v10524_v51  ;;  %v10540_v49 = vld [vmem:[%s14620_s10 + $0xa0] ss:$16 sps:$4 sm:$0xff]  }
 0x3c2   : > { %v10891_v23 = vpop.eup %10890  ;;  %10896 = vpow2.f32 %v3916_v33  ;;  %v3823_v25 = vadd.f32 %v3822_v27, %v12761_v29  ;;  %v3824_v55 = vpop.f32.mrb[102].mxu0 }
 0x3c3   : > { %3860 = vst.msk [vmem:[%s12767_s19 + $0x50] sm:$0xff] %vm3849_vm1, %v12944_v19  ;;  %v12959_v34 = vadd.f32 %v3824_v55, %v12758_v63  ;;  %v3826_v57 = vpop.f32.mrb[103].mxu0  ;;  %9569 = vmatprep.mubr.bf16.mxu1 %v4160_v41  ;;  %v4132_v11 = vmul.f32 %v10891_v23, %v4116_v20  ;;  %v4039_v41 = vsel %vm3948_vm2, %v12856_v21, 0.0 }
 0x3c4   : > { %v10893_v43 = vpop.eup %10892  ;;  %3876 = vst.msk [vmem:[%s12776_s26 + $0x50] sm:$0xff] %vm3849_vm1, %v3823_v25  ;;  %v3892_v60 = vmul.f32 0.5, %v3823_v25  ;;  %v3827_v10 = vadd.f32 %v3826_v57, %v12761_v29  ;;  %4577 = vmatpush1.bf16.msra.mxu1 %v10522_v58  ;;  %v4040_v25 = vsel %vm3948_vm2, %v12887_v38, 0.0  ;;  %v4120_v21 = vsel %vm4045_vm3, %v12952_v62, %v4039_v41  ;;  %v10549_v41 = vld [vmem:[%s14620_s10 + $0xc8] ss:$16 sps:$4 sm:$0xff]  }
 0x3c5   : > { %3861 = vst.msk [vmem:[%s12767_s19 + $0x58] sm:$0xff] %vm3849_vm1, %v12959_v34  ;;  %v4133_v12 = vmul.f32 %v10893_v43, %v4117_v56  ;;  %v4148_v45 = vadd.f32 %v4132_v11, %v12862_v26  ;;  %4578 = vmatprep.subr.bf16.mxu1 %v10530_v18  ;;  %v4092_v18 = vpop.permute.xlu0 %4091 }
 0x3c6   : > { %v3918_v59 = vmul.f32 1.442695, %v3892_v60  ;;  %3877 = vst.msk [vmem:[%s12776_s26 + $0x58] sm:$0xff] %vm3849_vm1, %v3827_v10  ;;  %v3893_v32 = vmul.f32 0.5, %v3827_v10 }
 0x3c7   : > { %v4149_v53 = vadd.f32 %v4133_v12, %v12874_v17  ;;  %v10542_v17 = vld [vmem:[%s14620_s10 + $0xa4] ss:$16 sps:$4 sm:$0xff]  }
 0x3c8   : > { %10898 = vpow2.f32 %v3918_v59  ;;  %v3920_v1 = vmul.f32 1.442695, %v3893_v32  ;;  %v3830_v26 = vpop.f32.mrb[104].mxu0  ;;  %4579 = vmatpush1.bf16.msra.mxu1 %v10528_v31 }
 0x3c9   : > { %v12991_v44 = vadd.f32 %v3830_v26, %v12758_v63  ;;  %v3832_v14 = vpop.f32.mrb[105].mxu0  ;;  %v4161_v4 = vpack.c.bf16 %v4149_v53, %v4148_v45  ;;  %4580 = vmatprep.subr.bf16.mxu1 %v10536_v8  ;;  %v4017_v60 = vpop.permute.xlu0 %4016  ;;  %v4121_v45 = vsel %vm4045_vm3, %v4092_v18, %v4040_v25  ;;  %v4041_v53 = vsel %vm3948_vm2, %v12979_v5, 0.0  ;;  %v10554_v18 = vld [vmem:[%s14620_s10 + $0xe4] ss:$16 sps:$4 sm:$0xff]  }
 0x3ca   : > { %v10895_v13 = vpop.eup %10894  ;;  %10900 = vpow2.f32 %v3920_v1  ;;  %v3833_v24 = vadd.f32 %v3832_v14, %v12761_v29  ;;  %v3834_v0 = vpop.f32.mrb[106].mxu0  ;;  %v4042_v1 = vsel %vm3948_vm2, %v4017_v60, 0.0  ;;  %v10560_v25 = vld [vmem:[%s14622_s12 + $0x4] ss:$28 sps:$4 sm:$0xff]  }
 0x3cb   : > { %v4134_v30 = vmul.f32 %v10895_v13, %v4118_v22  ;;  %3862 = vst.msk [vmem:[%s12767_s19 + $0x60] sm:$0xff] %vm3849_vm1, %v12991_v44  ;;  %v13003_v48 = vadd.f32 %v3834_v0, %v12758_v63  ;;  %v3836_v51 = vpop.f32.mrb[107].mxu0  ;;  %9570 = vmatmul.mubr.bf16.gmra.mrb[100].mxu1 %v4161_v4 }
 0x3cc   : > { %v10897_v40 = vpop.eup %10896  ;;  %3878 = vst.msk [vmem:[%s12776_s26 + $0x60] sm:$0xff] %vm3849_vm1, %v3833_v24  ;;  %v3894_v28 = vmul.f32 0.5, %v3833_v24  ;;  %v3837_v33 = vadd.f32 %v3836_v51, %v12761_v29  ;;  %4581 = vmatpush1.bf16.msra.mxu1 %v10534_v52 }
 0x3cd   : > { %v4150_v58 = vadd.f32 %v4134_v30, %v12899_v3  ;;  %3863 = vst.msk [vmem:[%s12767_s19 + $0x68] sm:$0xff] %vm3849_vm1, %v13003_v48  ;;  %v4135_v54 = vmul.f32 %v10897_v40, %v4119_v46  ;;  %4582 = vmatprep.subr.bf16.mxu1 %v10542_v17  ;;  %v4096_v16 = vpop.permute.xlu0 %4095 }
 0x3ce   : > { %v3922_v47 = vmul.f32 1.442695, %v3894_v28  ;;  %3879 = vst.msk [vmem:[%s12776_s26 + $0x68] sm:$0xff] %vm3849_vm1, %v3837_v33  ;;  %v3895_v27 = vmul.f32 0.5, %v3837_v33  ;;  %v4122_v4 = vsel %vm4045_vm3, %v4096_v16, %v4041_v53  ;;  %v10564_v53 = vld [vmem:[%s14622_s12 + $0x38] ss:$28 sps:$4 sm:$0xff]  }
 0x3cf   : > { %v4151_v23 = vadd.f32 %v4135_v54, %v12911_v6  ;;  %v4027_v6 = vpop.permute.xlu1 %4026  ;;  %v10570_v16 = vld [vmem:[%s14622_s12 + $0x70] ss:$28 sps:$4 sm:$0xff]  }
 0x3d0   : > { %10902 = vpow2.f32 %v3922_v47  ;;  %v3924_v20 = vmul.f32 1.442695, %v3895_v27  ;;  %v3840_v3 = vpop.f32.mrb[108].mxu0  ;;  %4583 = vmatpush1.bf16.msra.mxu1 %v10540_v49  ;;  %v4044_v30 = vsel %vm3948_vm2, %v4027_v6, 0.0  ;;  %v10548_v47 = vld [vmem:[%s14620_s10 + $0xc4] ss:$16 sps:$4 sm:$0xff]  }
 0x3d1   : > { %v3841_v55 = vadd.f32 %v3840_v3, %v12758_v63  ;;  %v3842_v61 = vpop.f32.mrb[109].mxu0  ;;  %v4162_v57 = vpack.c.bf16 %v4151_v23, %v4150_v58  ;;  %v4108_v51 = vpop.permute.xlu0 %4107  ;;  %v10551_v27 = vld [vmem:[%s14620_s10 + $0xcc] ss:$16 sps:$4 sm:$0xff]   ;;  %4584 = vmatprep.subr.bf16.mxu1 %v10548_v47  ;;  %v10555_v3 = vld [vmem:[%s14620_s10 + $0xe8] ss:$16 sps:$4 sm:$0xff]  }
 0x3d2   : > { %v10899_v11 = vpop.eup %10898  ;;  %10904 = vpow2.f32 %v3924_v20  ;;  %v3843_v43 = vadd.f32 %v3842_v61, %v12761_v29  ;;  %v3844_v56 = vpop.f32.mrb[110].mxu0  ;;  %4697 = vmatprep.subr.bf16.mxu0 %v10551_v27  ;;  %v10557_v23 = vld [vmem:[%s14620_s10 + $0xec] ss:$16 sps:$4 sm:$0xff]   ;;  %v10552_v20 = vld [vmem:[%s14620_s10 + $0xe0] ss:$16 sps:$4 sm:$0xff]  }
 0x3d3   : > { %3864 = vst.msk [vmem:[%s12767_s19 + $0x70] sm:$0xff] %vm3849_vm1, %v3841_v55  ;;  %v3845_v38 = vadd.f32 %v3844_v56, %v12758_v63  ;;  %v3846_v10 = vpop.f32.mrb[111].mxu0  ;;  %9573 = vmatprep.mubr.bf16.mxu1 %v4162_v57  ;;  %v4136_v31 = vmul.f32 %v10899_v11, %v4120_v21  ;;  %v4100_v52 = vpop.permute.xlu1 %4099  ;;  %4698 = vmatpush1.bf16.msra.mxu0 %v10549_v41  ;;  %v13102_v61 = vld [vmem:[%s14619_s9] ss:$0 sm:$0xff]  ;;  %v10588_v27 = vld [vmem:[%s14622_s12 + $0x118] ss:$28 sps:$4 sm:$0xff]  }
 0x3d4   : > { %v10901_v12 = vpop.eup %10900  ;;  %3880 = vst.msk [vmem:[%s12776_s26 + $0x70] sm:$0xff] %vm3849_vm1, %v3843_v43  ;;  %v3896_v62 = vmul.f32 0.5, %v3843_v43  ;;  %v3847_v8 = vadd.f32 %v3846_v10, %v12761_v29  ;;  %4585 = vmatpush1.bf16.msra.mxu1 %v10546_v15  ;;  %4699 = vmatprep.subr.bf16.mxu0 %v10557_v23  ;;  %v10593_v47 = vld [vmem:[%s14622_s12 + $0x124] ss:$28 sps:$4 sm:$0xff]   ;;  %v10596_v41 = vld [vmem:[%s14622_s12 + $0x154] ss:$28 sps:$4 sm:$0xff]  }
 0x3d5   : > { %3865 = vst.msk [vmem:[%s12767_s19 + $0x78] sm:$0xff] %vm3849_vm1, %v3845_v38  ;;  %v4137_v59 = vmul.f32 %v10901_v12, %v4121_v45  ;;  %v4152_v32 = vadd.f32 %v4136_v31, %v12944_v19  ;;  %v4123_v19 = vsel %vm4045_vm3, %v4100_v52, %v4042_v1  ;;  %4586 = vmatprep.subr.bf16.mxu1 %v10554_v18  ;;  %v10567_v1 = vld [vmem:[%s14622_s12 + $0x40] ss:$28 sps:$4 sm:$0xff]  }
 0x3d6   : > { %v3926_v9 = vmul.f32 1.442695, %v3896_v62  ;;  %3881 = vst.msk [vmem:[%s12776_s26 + $0x78] sm:$0xff] %vm3849_vm1, %v3847_v8  ;;  %v3897_v63 = vmul.f32 0.5, %v3847_v8  ;;  %v10591_v15 = vld [vmem:[%s14622_s12 + $0x120] ss:$28 sps:$4 sm:$0xff]  }
 0x3d7   : > { %v4153_v26 = vadd.f32 %v4137_v59, %v12959_v34  ;;  %v4043_v34 = vsel %vm3948_vm2, %v13008_v50, 0.0  ;;  %v4104_v0 = vpop.permute.xlu1 %4103  ;;  %4700 = vmatpush1.bf16.msra.mxu0 %v10555_v3  ;;  %v10558_v59 = vld [vmem:[%s14622_s12] ss:$28 sps:$4 sm:$0xff]   ;;  %v10597_v3 = vld [vmem:[%s14622_s12 + $0x158] ss:$28 sps:$4 sm:$0xff]  }
 0x3d8   : > { %10906 = vpow2.f32 %v3926_v9  ;;  %v3928_v29 = vmul.f32 1.442695, %v3897_v63  ;;  %v4124_v28 = vsel %vm4045_vm3, %v4104_v0, %v4043_v34  ;;  %4587 = vmatpush1.bf16.msra.mxu1 %v10552_v20  ;;  %v10566_v9 = vld [vmem:[%s14622_s12 + $0x3c] ss:$28 sps:$4 sm:$0xff]   ;;  %v10569_v63 = vld [vmem:[%s14622_s12 + $0x44] ss:$28 sps:$4 sm:$0xff]  }
 0x3d9   : > { %v4163_v39 = vpack.c.bf16 %v4153_v26, %v4152_v32  ;;  %6339 = vmatprep.subr.bf16.mxu1 %v10560_v25  ;;  %v10561_v32 = vld [vmem:[%s14622_s12 + $0x8] ss:$28 sps:$4 sm:$0xff]   ;;  %v10572_v26 = vld [vmem:[%s14622_s12 + $0x74] ss:$28 sps:$4 sm:$0xff]   ;;  %v10599_v18 = vld [vmem:[%s14622_s12 + $0x15c] ss:$28 sps:$4 sm:$0xff]  }
 0x3da   : > { %v10903_v14 = vpop.eup %10902  ;;  %10908 = vpow2.f32 %v3928_v29  ;;  %v10575_v29 = vld [vmem:[%s14622_s12 + $0x7c] ss:$28 sps:$4 sm:$0xff]   ;;  %v10576_v0 = vld [vmem:[%s14622_s12 + $0xa8] ss:$28 sps:$4 sm:$0xff]   ;;  %v10594_v20 = vld [vmem:[%s14622_s12 + $0x150] ss:$28 sps:$4 sm:$0xff]  }
 0x3db   : > { %v4138_v17 = vmul.f32 %v10903_v14, %v4122_v4  ;;  %9574 = vmatmul.mubr.bf16.gmra.mrb[104].mxu1 %v4163_v39  ;;  %v10573_v39 = vld [vmem:[%s14622_s12 + $0x78] ss:$28 sps:$4 sm:$0xff]   ;;  %v10578_v4 = vld [vmem:[%s14622_s12 + $0xac] ss:$28 sps:$4 sm:$0xff]  }
 0x3dc   : > { %v10905_v5 = vpop.eup %10904 }
 0x3dd   : > { %v4139_v13 = vmul.f32 %v10905_v5, %v4123_v19  ;;  %v4154_v22 = vadd.f32 %v4138_v17, %v12991_v44  ;;  %v4125_v44 = vsel %vm4045_vm3, %v4108_v51, %v4044_v30  ;;  %v10581_v17 = vld [vmem:[%s14622_s12 + $0xb4] ss:$28 sps:$4 sm:$0xff]  }
 0x3de   : > { %v10579_v30 = vld [vmem:[%s14622_s12 + $0xb0] ss:$28 sps:$4 sm:$0xff]  }
 0x3df   : > { %v4155_v24 = vadd.f32 %v4139_v13, %v13003_v48 }
 0x3e1   : > { %v4164_v40 = vpack.c.bf16 %v4155_v24, %v4154_v22 }
 0x3e2   : > { %v10907_v46 = vpop.eup %10906 }
 0x3e3   : > { %v4140_v33 = vmul.f32 %v10907_v46, %v4124_v28  ;;  %9577 = vmatprep.mubr.bf16.mxu1 %v4164_v40  ;;  %v10584_v46 = vld [vmem:[%s14622_s12 + $0xe4] ss:$28 sps:$4 sm:$0xff]   ;;  %v10587_v28 = vld [vmem:[%s14622_s12 + $0xec] ss:$28 sps:$4 sm:$0xff]  }
 0x3e4   : > { %v10909_v49 = vpop.eup %10908 }
 0x3e5   : > { %v4156_v58 = vadd.f32 %v4140_v33, %v3841_v55  ;;  %v4141_v50 = vmul.f32 %v10909_v49, %v4125_v44  ;;  %v10563_v55 = vld [vmem:[%s14622_s12 + $0xc] ss:$28 sps:$4 sm:$0xff]  }
 0x3e6   : > { %6565 = vmatprep.subr.bf16.mxu0 %v10563_v55 }
 0x3e7   : > { %v4157_v54 = vadd.f32 %v4141_v50, %v3845_v38  ;;  %v10582_v50 = vld [vmem:[%s14622_s12 + $0xe0] ss:$28 sps:$4 sm:$0xff]  }
 0x3e9   : > { %v4165_v48 = vpack.c.bf16 %v4157_v54, %v4156_v58  ;;  %v10585_v54 = vld [vmem:[%s14622_s12 + $0xe8] ss:$28 sps:$4 sm:$0xff]  }
 0x3eb   : > { %9578 = vmatmul.mubr.bf16.gmra.mrb[108].mxu1 %v4165_v48  ;;  %v10590_v48 = vld [vmem:[%s14622_s12 + $0x11c] ss:$28 sps:$4 sm:$0xff]  }
 0x3ec   : > { %4604 = vmatprep.mubr.bf16.mxu1 %v11375_v2 }
 0x48e   : > { %v9567_v57 = vpop.f32.mrb[96].mxu1 }
 0x48f   : > { %v4280_v11 = vadd.f32 %v9567_v57, %v13102_v61  ;;  %v4271_v21 = vpop.f32.mrb[97].mxu1  ;;  %v10602_v57 = vld [vmem:[%s14622_s12 + $0x18c] ss:$28 sps:$4 sm:$0xff]  }
 0x490   : > { %v4272_v6 = vadd.f32 %v13102_v61, %v4271_v21  ;;  %v9568_v43 = vpop.f32.mrb[98].mxu1 }
 0x491   : > { %v4283_v56 = vadd.f32 %v9568_v43, %v13102_v61  ;;  %v4274_v60 = vpop.f32.mrb[99].mxu1  ;;  %v4336_v10 = vmax.f32 %v4280_v11, 0.0  ;;  %v10605_v11 = vld [vmem:[%s14622_s12 + $0x194] ss:$28 sps:$4 sm:$0xff]  }
 0x492   : > { %v4275_v38 = vadd.f32 %v13102_v61, %v4274_v60  ;;  %v4334_v12 = vmax.f32 %v4272_v6, 0.0 }
 0x493   : > { %v4337_v31 = vmax.f32 %v4283_v56, 0.0 }
 0x494   : > { %v4335_v45 = vmax.f32 %v4275_v38, 0.0  ;;  %v10600_v38 = vld [vmem:[%s14622_s12 + $0x188] ss:$28 sps:$4 sm:$0xff]  }
 0x495   : > { %v4351_v62 = vpack.c.bf16 %v4337_v31, %v4336_v10  ;;  %v10603_v10 = vld [vmem:[%s14622_s12 + $0x190] ss:$28 sps:$4 sm:$0xff]  }
 0x496   : > { %v4350_v8 = vpack.c.bf16 %v4335_v45, %v4334_v12  ;;  %v10608_v45 = vld [vmem:[%s14622_s12 + $0x1c4] ss:$28 sps:$4 sm:$0xff]  }
 0x498   : > { %4605 = vmatmul.mubr.bf16.vlgmr.msra.gmra.mrb[112].mxu1 %v4350_v8  ;;  %4718 = vmatmul.mubr.bf16.vlgmr.msra.gmra.mrb[112].mxu0 %v4350_v8 }
 0x499   : > { %4614 = vmatprep.mubr.bf16.mxu1 %v11375_v2  ;;  %4727 = vmatprep.mubr.bf16.mxu0 %v11375_v2 }
 0x49a   : > { %6340 = vmatpush1.bf16.msra.mxu1 %v10558_v59  ;;  %6566 = vmatpush1.bf16.msra.mxu0 %v10561_v32 }
 0x49b   : > { %6341 = vmatprep.subr.bf16.mxu1 %v10566_v9  ;;  %6567 = vmatprep.subr.bf16.mxu0 %v10569_v63  ;;  %v10606_v63 = vld [vmem:[%s14622_s12 + $0x1c0] ss:$28 sps:$4 sm:$0xff]  }
 0x49e   : > { %v9571_v52 = vpop.f32.mrb[100].mxu1  ;;  %6342 = vmatpush1.bf16.msra.mxu1 %v10564_v53  ;;  %6568 = vmatpush1.bf16.msra.mxu0 %v10567_v1  ;;  %v10609_v53 = vld [vmem:[%s14622_s12 + $0x1c8] ss:$28 sps:$4 sm:$0xff]   ;;  %v10614_v1 = vld [vmem:[%s14622_s12 + $0x1fc] ss:$28 sps:$4 sm:$0xff]  }
 0x49f   : > { %v4296_v14 = vadd.f32 %v9571_v52, %v13102_v61  ;;  %v4287_v19 = vpop.f32.mrb[101].mxu1  ;;  %6343 = vmatprep.subr.bf16.mxu1 %v10572_v26  ;;  %6569 = vmatprep.subr.bf16.mxu0 %v10575_v29  ;;  %v10617_v26 = vld [vmem:[%s14622_s12 + $0x204] ss:$28 sps:$4 sm:$0xff]   ;;  %v10612_v29 = vld [vmem:[%s14622_s12 + $0x1f8] ss:$28 sps:$4 sm:$0xff]  }
 0x4a0   : > { %v4288_v5 = vadd.f32 %v13102_v61, %v4287_v19  ;;  %v9572_v13 = vpop.f32.mrb[102].mxu1  ;;  %4615 = vmatmul.mubr.bf16.gmra.mrb[116].mxu1 %v4351_v62  ;;  %4728 = vmatmul.mubr.bf16.gmra.mrb[116].mxu0 %v4351_v62  ;;  %v10611_v62 = vld [vmem:[%s14622_s12 + $0x1cc] ss:$28 sps:$4 sm:$0xff]   ;;  %v10615_v52 = vld [vmem:[%s14622_s12 + $0x200] ss:$28 sps:$4 sm:$0xff]  }
 0x4a1   : > { %v4299_v22 = vadd.f32 %v9572_v13, %v13102_v61  ;;  %v4290_v34 = vpop.f32.mrb[103].mxu1  ;;  %4624 = vmatprep.mubr.bf16.mxu1 %v11375_v2  ;;  %4737 = vmatprep.mubr.bf16.mxu0 %v11375_v2  ;;  %v4340_v51 = vmax.f32 %v4296_v14, 0.0  ;;  %v10618_v19 = vld [vmem:[%s14622_s12 + $0x230] ss:$28 sps:$4 sm:$0xff]  }
 0x4a2   : > { %v4291_v24 = vadd.f32 %v13102_v61, %v4290_v34  ;;  %6344 = vmatpush1.bf16.msra.mxu1 %v10570_v16  ;;  %6570 = vmatpush1.bf16.msra.mxu0 %v10573_v39  ;;  %v4338_v33 = vmax.f32 %v4288_v5, 0.0  ;;  %v10620_v16 = vld [vmem:[%s14622_s12 + $0x234] ss:$28 sps:$4 sm:$0xff]   ;;  %v10623_v39 = vld [vmem:[%s14622_s12 + $0x23c] ss:$28 sps:$4 sm:$0xff]  }
 0x4a3   : > { %v4341_v40 = vmax.f32 %v4299_v22, 0.0  ;;  %6345 = vmatprep.subr.bf16.mxu1 %v10578_v4  ;;  %6571 = vmatprep.subr.bf16.mxu0 %v10581_v17  ;;  %v10621_v4 = vld [vmem:[%s14622_s12 + $0x238] ss:$28 sps:$4 sm:$0xff]   ;;  %v10626_v13 = vld [vmem:[%s14622_s12 + $0x26c] ss:$28 sps:$4 sm:$0xff]  }
 0x4a4   : > { %v4339_v49 = vmax.f32 %v4291_v24, 0.0  ;;  %v10629_v22 = vld [vmem:[%s14622_s12 + $0x274] ss:$28 sps:$4 sm:$0xff]  }
 0x4a5   : > { %v4353_v44 = vpack.c.bf16 %v4341_v40, %v4340_v51  ;;  %v10624_v40 = vld [vmem:[%s14622_s12 + $0x268] ss:$28 sps:$4 sm:$0xff]  }
 0x4a6   : > { %v4352_v58 = vpack.c.bf16 %v4339_v49, %v4338_v33  ;;  %6346 = vmatpush1.bf16.msra.mxu1 %v10576_v0  ;;  %6572 = vmatpush1.bf16.msra.mxu0 %v10579_v30  ;;  %v10632_v49 = vld [vmem:[%s14622_s12 + $0x2a4] ss:$28 sps:$4 sm:$0xff]  }
 0x4a7   : > { %6347 = vmatprep.subr.bf16.mxu1 %v10584_v46  ;;  %6573 = vmatprep.subr.bf16.mxu0 %v10587_v28  ;;  %v10627_v46 = vld [vmem:[%s14622_s12 + $0x270] ss:$28 sps:$4 sm:$0xff]  }
 0x4a8   : > { %4625 = vmatmul.mubr.bf16.gmra.mrb[120].mxu1 %v4352_v58  ;;  %4738 = vmatmul.mubr.bf16.gmra.mrb[120].mxu0 %v4352_v58 }
 0x4a9   : > { %4634 = vmatprep.mubr.bf16.mxu1 %v11375_v2  ;;  %4747 = vmatprep.mubr.bf16.mxu0 %v11375_v2 }
 0x4aa   : > { %6348 = vmatpush1.bf16.msra.mxu1 %v10582_v50  ;;  %6574 = vmatpush1.bf16.msra.mxu0 %v10585_v54 }
 0x4ab   : > { %6349 = vmatprep.subr.bf16.mxu1 %v10590_v48  ;;  %6575 = vmatprep.subr.bf16.mxu0 %v10593_v47  ;;  %v10630_v48 = vld [vmem:[%s14622_s12 + $0x2a0] ss:$28 sps:$4 sm:$0xff]   ;;  %v10633_v47 = vld [vmem:[%s14622_s12 + $0x2a8] ss:$28 sps:$4 sm:$0xff]  }
 0x4ae   : > { %v9575_v23 = vpop.f32.mrb[104].mxu1  ;;  %6350 = vmatpush1.bf16.msra.mxu1 %v10588_v27  ;;  %6576 = vmatpush1.bf16.msra.mxu0 %v10591_v15  ;;  %v10638_v27 = vld [vmem:[%s14622_s12 + $0x2dc] ss:$28 sps:$4 sm:$0xff]   ;;  %v10641_v15 = vld [vmem:[%s14622_s12 + $0x2e4] ss:$28 sps:$4 sm:$0xff]  }
 0x4af   : > { %v4312_v25 = vadd.f32 %v9575_v23, %v13102_v61  ;;  %v4303_v55 = vpop.f32.mrb[105].mxu1  ;;  %6351 = vmatprep.subr.bf16.mxu1 %v10596_v41  ;;  %6577 = vmatprep.subr.bf16.mxu0 %v10599_v18  ;;  %v10636_v41 = vld [vmem:[%s14622_s12 + $0x2d8] ss:$28 sps:$4 sm:$0xff]   ;;  %v10639_v18 = vld [vmem:[%s14622_s12 + $0x2e0] ss:$28 sps:$4 sm:$0xff]  }
 0x4b0   : > { %v4304_v21 = vadd.f32 %v13102_v61, %v4303_v55  ;;  %v9576_v6 = vpop.f32.mrb[106].mxu1  ;;  %4635 = vmatmul.mubr.bf16.gmra.mrb[124].mxu1 %v4353_v44  ;;  %4748 = vmatmul.mubr.bf16.gmra.mrb[124].mxu0 %v4353_v44  ;;  %v10647_v23 = vld [vmem:[%s14622_s12 + $0x31c] ss:$28 sps:$4 sm:$0xff]   ;;  %v10653_v55 = vld [vmem:[%s14622_s12 + $0x354] ss:$28 sps:$4 sm:$0xff]  }
 0x4b1   : > { %v4315_v43 = vadd.f32 %v9576_v6, %v13102_v61  ;;  %v4306_v56 = vpop.f32.mrb[107].mxu1  ;;  %4644 = vmatprep.mubr.bf16.mxu1 %v11375_v2  ;;  %4757 = vmatprep.mubr.bf16.mxu0 %v11375_v2  ;;  %v4344_v31 = vmax.f32 %v4312_v25, 0.0  ;;  %v10650_v25 = vld [vmem:[%s14622_s12 + $0x34c] ss:$28 sps:$4 sm:$0xff]  }
 0x4b2   : > { %v4307_v60 = vadd.f32 %v13102_v61, %v4306_v56  ;;  %6352 = vmatpush1.bf16.msra.mxu1 %v10594_v20  ;;  %6578 = vmatpush1.bf16.msra.mxu0 %v10597_v3  ;;  %v4342_v8 = vmax.f32 %v4304_v21, 0.0  ;;  %v10642_v20 = vld [vmem:[%s14622_s12 + $0x310] ss:$28 sps:$4 sm:$0xff]   ;;  %v10645_v3 = vld [vmem:[%s14622_s12 + $0x318] ss:$28 sps:$4 sm:$0xff]  }
 0x4b3   : > { %v4345_v12 = vmax.f32 %v4315_v43, 0.0  ;;  %6353 = vmatprep.subr.bf16.mxu1 %v10602_v57  ;;  %6579 = vmatprep.subr.bf16.mxu0 %v10605_v11  ;;  %v10648_v57 = vld [vmem:[%s14622_s12 + $0x348] ss:$28 sps:$4 sm:$0xff]   ;;  %v10651_v11 = vld [vmem:[%s14622_s12 + $0x350] ss:$28 sps:$4 sm:$0xff]  }
 0x4b4   : > { %v4343_v59 = vmax.f32 %v4307_v60, 0.0  ;;  %v10656_v21 = vld [vmem:[%s14622_s12 + $0x384] ss:$28 sps:$4 sm:$0xff]   ;;  %v10659_v6 = vld [vmem:[%s14622_s12 + $0x38c] ss:$28 sps:$4 sm:$0xff]  }
 0x4b5   : > { %v4355_v32 = vpack.c.bf16 %v4345_v12, %v4344_v31  ;;  %v4390_v43 = vld [vmem:[%s14621_s11] sm:$0xf] }
 0x4b6   : > { %v4354_v9 = vpack.c.bf16 %v4343_v59, %v4342_v8  ;;  %6354 = vmatpush1.bf16.msra.mxu1 %v10600_v38  ;;  %6580 = vmatpush1.bf16.msra.mxu0 %v10603_v10  ;;  %v13330_v56 = vrot.slane %v4390_v43, %v12330_v36  ;;  %v13333_v60 = vrot.slane %v4390_v43, %v12437_v7 }
 0x4b7   : > { %6355 = vmatprep.subr.bf16.mxu1 %v10608_v45  ;;  %6581 = vmatprep.subr.bf16.mxu0 %v10611_v62  ;;  %v13336_v38 = vrot.slane %v4390_v43, %v12338_v42  ;;  %v13339_v10 = vrot.slane %v4390_v43, %v12440_v37 }
 0x4b8   : > { %4645 = vmatmul.mubr.bf16.gmra.mrb[128].mxu1 %v4354_v9  ;;  %4758 = vmatmul.mubr.bf16.gmra.mrb[128].mxu0 %v4354_v9 }
 0x4b9   : > { %4654 = vmatprep.mubr.bf16.mxu1 %v11375_v2  ;;  %4767 = vmatprep.mubr.bf16.mxu0 %v11375_v2 }
 0x4ba   : > { %6356 = vmatpush1.bf16.msra.mxu1 %v10606_v63  ;;  %6582 = vmatpush1.bf16.msra.mxu0 %v10609_v53 }
 0x4bb   : > { %6357 = vmatprep.subr.bf16.mxu1 %v10614_v1  ;;  %6583 = vmatprep.subr.bf16.mxu0 %v10617_v26 }
 0x4be   : > { %v9579_v14 = vpop.f32.mrb[108].mxu1  ;;  %6358 = vmatpush1.bf16.msra.mxu1 %v10612_v29  ;;  %6584 = vmatpush1.bf16.msra.mxu0 %v10615_v52 }
 0x4bf   : > { %v4328_v17 = vadd.f32 %v9579_v14, %v13102_v61  ;;  %v4319_v5 = vpop.f32.mrb[109].mxu1  ;;  %6359 = vmatprep.subr.bf16.mxu1 %v10620_v16  ;;  %6585 = vmatprep.subr.bf16.mxu0 %v10623_v39 }
 0x4c0   : > { %v4320_v34 = vadd.f32 %v13102_v61, %v4319_v5  ;;  %v9580_v24 = vpop.f32.mrb[110].mxu1  ;;  %4655 = vmatmul.mubr.bf16.gmra.mrb[132].mxu1 %v4355_v32  ;;  %4768 = vmatmul.mubr.bf16.gmra.mrb[132].mxu0 %v4355_v32 }
 0x4c1   : > { %v4331_v0 = vadd.f32 %v9580_v24, %v13102_v61  ;;  %v4322_v30 = vpop.f32.mrb[111].mxu1  ;;  %4664 = vmatprep.mubr.bf16.mxu1 %v11375_v2  ;;  %4777 = vmatprep.mubr.bf16.mxu0 %v11375_v2  ;;  %v4348_v28 = vmax.f32 %v4328_v17, 0.0 }
 0x4c2   : > { %v4323_v51 = vadd.f32 %v13102_v61, %v4322_v30  ;;  %6360 = vmatpush1.bf16.msra.mxu1 %v10618_v19  ;;  %6586 = vmatpush1.bf16.msra.mxu0 %v10621_v4  ;;  %v10635_v61 = vld [vmem:[%s14622_s12 + $0x2ac] ss:$28 sps:$4 sm:$0xff]   ;;  %v4346_v44 = vmax.f32 %v4320_v34, 0.0 }
 0x4c3   : > { %v4349_v33 = vmax.f32 %v4331_v0, 0.0  ;;  %6361 = vmatprep.subr.bf16.mxu1 %v10626_v13  ;;  %6587 = vmatprep.subr.bf16.mxu0 %v10629_v22 }
 0x4c4   : > { %v4347_v58 = vmax.f32 %v4323_v51, 0.0 }
 0x4c5   : > { %v4357_v50 = vpack.c.bf16 %v4349_v33, %v4348_v28  ;;  %v10654_v28 = vld [vmem:[%s14622_s12 + $0x380] ss:$28 sps:$4 sm:$0xff]   ;;  %v10657_v33 = vld [vmem:[%s14622_s12 + $0x388] ss:$28 sps:$4 sm:$0xff]  }
 0x4c6   : > { %v4356_v54 = vpack.c.bf16 %v4347_v58, %v4346_v44  ;;  %6362 = vmatpush1.bf16.msra.mxu1 %v10624_v40  ;;  %6588 = vmatpush1.bf16.msra.mxu0 %v10627_v46 }
 0x4c7   : > { %6363 = vmatprep.subr.bf16.mxu1 %v10632_v49  ;;  %6589 = vmatprep.subr.bf16.mxu0 %v10635_v61 }
 0x4c8   : > { %4665 = vmatmul.mubr.bf16.gmra.mrb[136].mxu1 %v4356_v54  ;;  %4778 = vmatmul.mubr.bf16.gmra.mrb[136].mxu0 %v4356_v54  ;;  %v10665_v54 = vld [vmem:[%s14622_s12 + $0x3c4] ss:$28 sps:$4 sm:$0xff]  }
 0x4c9   : > { %4674 = vmatprep.mubr.bf16.mxu1 %v11375_v2  ;;  %4787 = vmatprep.mubr.bf16.mxu0 %v11375_v2  ;;  %v10644_v2 = vld [vmem:[%s14622_s12 + $0x314] ss:$28 sps:$4 sm:$0xff]  }
 0x4ca   : > { %6364 = vmatpush1.bf16.msra.mxu1 %v10630_v48  ;;  %6590 = vmatpush1.bf16.msra.mxu0 %v10633_v47 }
 0x4cb   : > { %6365 = vmatprep.subr.bf16.mxu1 %v10638_v27  ;;  %6591 = vmatprep.subr.bf16.mxu0 %v10641_v15 }
 0x4ce   : > { %6366 = vmatpush1.bf16.msra.mxu1 %v10636_v41  ;;  %6592 = vmatpush1.bf16.msra.mxu0 %v10639_v18 }
 0x4cf   : > { %6367 = vmatprep.subr.bf16.mxu1 %v10644_v2  ;;  %6593 = vmatprep.subr.bf16.mxu0 %v10647_v23 }
 0x4d0   : > { %4675 = vmatmul.mubr.bf16.gmra.mrb[140].mxu1 %v4357_v50  ;;  %4788 = vmatmul.mubr.bf16.gmra.mrb[140].mxu0 %v4357_v50  ;;  %v10662_v50 = vld [vmem:[%s14622_s12 + $0x3bc] ss:$28 sps:$4 sm:$0xff]  }
 0x4d2   : > { %6368 = vmatpush1.bf16.msra.mxu1 %v10642_v20  ;;  %6594 = vmatpush1.bf16.msra.mxu0 %v10645_v3 }
 0x4d3   : > { %6369 = vmatprep.subr.bf16.mxu1 %v10650_v25  ;;  %6595 = vmatprep.subr.bf16.mxu0 %v10653_v55  ;;  %v10660_v25 = vld [vmem:[%s14622_s12 + $0x3b8] ss:$28 sps:$4 sm:$0xff]   ;;  %v10663_v55 = vld [vmem:[%s14622_s12 + $0x3c0] ss:$28 sps:$4 sm:$0xff]  }
 0x4d6   : > { %6370 = vmatpush1.bf16.msra.mxu1 %v10648_v57  ;;  %6596 = vmatpush1.bf16.msra.mxu0 %v10651_v11  ;;  %v10668_v57 = vld [vmem:[%s14622_s12 + $0x3f4] ss:$28 sps:$4 sm:$0xff]  }
 0x4d7   : > { %6452 = vmatprep.subr.bf16.mxu1 %v10656_v21  ;;  %6678 = vmatprep.subr.bf16.mxu0 %v10659_v6 }
 0x56b   : > { %v4606_v31 = vpop.f32.mrb[112].mxu1  ;;  %v4719_v12 = vpop.f32.mrb[112].mxu0 }
 0x56c   : > { %v4607_v45 = vadd.f32 %v4606_v31, %v13330_v56  ;;  %v4720_v62 = vadd.f32 %v4719_v12, %v13333_v60  ;;  %v4608_v8 = vpop.f32.mrb[113].mxu1  ;;  %v4721_v59 = vpop.f32.mrb[113].mxu0  ;;  %v10671_v31 = vld [vmem:[%s14622_s12 + $0x3fc] ss:$28 sps:$4 sm:$0xff]  }
 0x56d   : > { %v4609_v32 = vadd.f32 %v4608_v8, %v13336_v38  ;;  %v4722_v9 = vadd.f32 %v4721_v59, %v13339_v10  ;;  %v4610_v63 = vpop.f32.mrb[114].mxu1  ;;  %v4723_v53 = vpop.f32.mrb[114].mxu0 }
 0x56e   : > { %v4611_v1 = vadd.f32 %v4610_v63, %v13330_v56  ;;  %v4724_v26 = vadd.f32 %v4723_v53, %v13333_v60  ;;  %v4612_v29 = vpop.f32.mrb[115].mxu1  ;;  %v4725_v52 = vpop.f32.mrb[115].mxu0  ;;  %v4798_v14 = vmax.f32 %v4607_v45, 0.0  ;;  %v4800_v19 = vmax.f32 %v4720_v62, 0.0 }
 0x56f   : > { %v4613_v16 = vadd.f32 %v4612_v29, %v13336_v38  ;;  %v4726_v39 = vadd.f32 %v4725_v52, %v13339_v10  ;;  %v4799_v5 = vmax.f32 %v4609_v32, 0.0  ;;  %v4801_v13 = vmax.f32 %v4722_v9, 0.0  ;;  %v10669_v29 = vld [vmem:[%s14622_s12 + $0x3f8] ss:$28 sps:$4 sm:$0xff]  }
 0x570   : > { %v4802_v4 = vmax.f32 %v4611_v1, 0.0  ;;  %v4804_v17 = vmax.f32 %v4724_v26, 0.0  ;;  %v10666_v26 = vld [vmem:[%s14622_s12 + $0x3f0] ss:$28 sps:$4 sm:$0xff]  }
 0x571   : > { %v4803_v22 = vmax.f32 %v4613_v16, 0.0  ;;  %v4805_v34 = vmax.f32 %v4726_v39, 0.0 }
 0x572   : > { %v13349_v24 = vpack.c.bf16 %v4802_v4, %v4798_v14  ;;  %v13351_v0 = vpack.c.bf16 %v4804_v17, %v4800_v19  ;;  %v10674_v19 = vld [vmem:[%s14622_s12 + $0x42c] ss:$28 sps:$4 sm:$0xff]   ;;  %v10677_v4 = vld [vmem:[%s14622_s12 + $0x434] ss:$28 sps:$4 sm:$0xff]  }
 0x573   : > { %v13353_v30 = vpack.c.bf16 %v4803_v22, %v4799_v5  ;;  %v13355_v51 = vpack.c.bf16 %v4805_v34, %v4801_v13  ;;  %v4616_v40 = vpop.f32.mrb[116].mxu1  ;;  %v4729_v46 = vpop.f32.mrb[116].mxu0 }
 0x574   : > { %v4617_v49 = vadd.f32 %v4616_v40, %v13330_v56  ;;  %v4730_v61 = vadd.f32 %v4729_v46, %v13333_v60  ;;  %v4618_v44 = vpop.f32.mrb[117].mxu1  ;;  %v4731_v58 = vpop.f32.mrb[117].mxu0 }
 0x575   : > { %v4619_v48 = vadd.f32 %v4618_v44, %v13336_v38  ;;  %v4732_v47 = vadd.f32 %v4731_v58, %v13339_v10  ;;  %v4620_v27 = vpop.f32.mrb[118].mxu1  ;;  %v4733_v15 = vpop.f32.mrb[118].mxu0  ;;  %6371 = vmatprep.mubr.bf16.mxu1 %v13353_v30  ;;  %6597 = vmatprep.mubr.bf16.mxu0 %v13353_v30  ;;  %v10675_v44 = vld [vmem:[%s14622_s12 + $0x430] ss:$28 sps:$4 sm:$0xff]   ;;  %v10680_v58 = vld [vmem:[%s14622_s12 + $0x464] ss:$28 sps:$4 sm:$0xff]  }
 0x576   : > { %v4621_v41 = vadd.f32 %v4620_v27, %v13330_v56  ;;  %v4734_v18 = vadd.f32 %v4733_v15, %v13333_v60  ;;  %v4622_v2 = vpop.f32.mrb[119].mxu1  ;;  %v4735_v23 = vpop.f32.mrb[119].mxu0  ;;  %6372 = vmatmul.mubr.bf16.vlgmr.msra.gmra.mrb[144].mxu1 %v13349_v24  ;;  %6598 = vmatmul.mubr.bf16.vlgmr.msra.gmra.mrb[144].mxu0 %v13349_v24  ;;  %v4806_v11 = vmax.f32 %v4617_v49, 0.0  ;;  %v4808_v21 = vmax.f32 %v4730_v61, 0.0  ;;  %v10672_v61 = vld [vmem:[%s14622_s12 + $0x428] ss:$28 sps:$4 sm:$0xff]  }
 0x577   : > { %v4623_v20 = vadd.f32 %v4622_v2, %v13336_v38  ;;  %v4736_v3 = vadd.f32 %v4735_v23, %v13339_v10  ;;  %6453 = vmatpush1.bf16.msra.mxu1 %v10654_v28  ;;  %6679 = vmatpush1.bf16.msra.mxu0 %v10657_v33  ;;  %v4807_v12 = vmax.f32 %v4619_v48, 0.0  ;;  %v4809_v45 = vmax.f32 %v4732_v47, 0.0  ;;  %v10683_v27 = vld [vmem:[%s14622_s12 + $0x46c] ss:$28 sps:$4 sm:$0xff]  }
 0x578   : > { %v4810_v6 = vmax.f32 %v4621_v41, 0.0  ;;  %v4812_v43 = vmax.f32 %v4734_v18, 0.0  ;;  %6454 = vmatprep.subr.bf16.mxu1 %v10662_v50  ;;  %6680 = vmatprep.subr.bf16.mxu0 %v10665_v54 }
 0x579   : > { %v4811_v62 = vmax.f32 %v4623_v20, 0.0  ;;  %v4813_v8 = vmax.f32 %v4736_v3, 0.0 }
 0x57a   : > { %v13393_v59 = vpack.c.bf16 %v4810_v6, %v4806_v11  ;;  %v13395_v32 = vpack.c.bf16 %v4812_v43, %v4808_v21  ;;  %v10678_v11 = vld [vmem:[%s14622_s12 + $0x460] ss:$28 sps:$4 sm:$0xff]   ;;  %v10681_v21 = vld [vmem:[%s14622_s12 + $0x468] ss:$28 sps:$4 sm:$0xff]  }
 0x57b   : > { %v13397_v9 = vpack.c.bf16 %v4811_v62, %v4807_v12  ;;  %v13399_v63 = vpack.c.bf16 %v4813_v8, %v4809_v45  ;;  %v4626_v53 = vpop.f32.mrb[120].mxu1  ;;  %v4739_v1 = vpop.f32.mrb[120].mxu0  ;;  %6455 = vmatpush1.bf16.msra.mxu1 %v10660_v25  ;;  %6681 = vmatpush1.bf16.msra.mxu0 %v10663_v55  ;;  %v10686_v45 = vld [vmem:[%s14622_s12 + $0x49c] ss:$28 sps:$4 sm:$0xff]   ;;  %v10689_v62 = vld [vmem:[%s14622_s12 + $0x4a4] ss:$28 sps:$4 sm:$0xff]  }
 0x57c   : > { %v4627_v52 = vadd.f32 %v4626_v53, %v13330_v56  ;;  %v4740_v16 = vadd.f32 %v4739_v1, %v13333_v60  ;;  %v4628_v39 = vpop.f32.mrb[121].mxu1  ;;  %v4741_v14 = vpop.f32.mrb[121].mxu0  ;;  %6456 = vmatprep.subr.bf16.mxu1 %v10668_v57  ;;  %6682 = vmatprep.subr.bf16.mxu0 %v10671_v31 }
 0x57d   : > { %v4629_v17 = vadd.f32 %v4628_v39, %v13336_v38  ;;  %v4742_v5 = vadd.f32 %v4741_v14, %v13339_v10  ;;  %v4630_v13 = vpop.f32.mrb[122].mxu1  ;;  %v4743_v22 = vpop.f32.mrb[122].mxu0  ;;  %6381 = vmatprep.mubr.bf16.mxu1 %v13397_v9  ;;  %6607 = vmatprep.mubr.bf16.mxu0 %v13397_v9 }
 0x57e   : > { %v4631_v34 = vadd.f32 %v4630_v13, %v13330_v56  ;;  %v4744_v40 = vadd.f32 %v4743_v22, %v13333_v60  ;;  %v4632_v46 = vpop.f32.mrb[123].mxu1  ;;  %v4745_v28 = vpop.f32.mrb[123].mxu0  ;;  %6382 = vmatmul.mubr.bf16.gmra.mrb[148].mxu1 %v13393_v59  ;;  %6608 = vmatmul.mubr.bf16.gmra.mrb[148].mxu0 %v13393_v59  ;;  %v4814_v50 = vmax.f32 %v4627_v52, 0.0  ;;  %v4816_v54 = vmax.f32 %v4740_v16, 0.0 }
 0x57f   : > { %v4633_v33 = vadd.f32 %v4632_v46, %v13336_v38  ;;  %v4746_v49 = vadd.f32 %v4745_v28, %v13339_v10  ;;  %6457 = vmatpush1.bf16.msra.mxu1 %v10666_v26  ;;  %6683 = vmatpush1.bf16.msra.mxu0 %v10669_v29  ;;  %v4815_v15 = vmax.f32 %v4629_v17, 0.0  ;;  %v4817_v41 = vmax.f32 %v4742_v5, 0.0  ;;  %v10687_v17 = vld [vmem:[%s14622_s12 + $0x4a0] ss:$28 sps:$4 sm:$0xff]   ;;  %v10692_v5 = vld [vmem:[%s14622_s12 + $0x4d4] ss:$28 sps:$4 sm:$0xff]  }
 0x580   : > { %v4818_v48 = vmax.f32 %v4631_v34, 0.0  ;;  %v4820_v47 = vmax.f32 %v4744_v40, 0.0  ;;  %6458 = vmatprep.subr.bf16.mxu1 %v10674_v19  ;;  %6684 = vmatprep.subr.bf16.mxu0 %v10677_v4  ;;  %v10684_v4 = vld [vmem:[%s14622_s12 + $0x498] ss:$28 sps:$4 sm:$0xff]  }
 0x581   : > { %v4819_v18 = vmax.f32 %v4633_v33, 0.0  ;;  %v4821_v2 = vmax.f32 %v4746_v49, 0.0  ;;  %v10695_v46 = vld [vmem:[%s14622_s12 + $0x4dc] ss:$28 sps:$4 sm:$0xff]  }
 0x582   : > { %v13437_v23 = vpack.c.bf16 %v4818_v48, %v4814_v50  ;;  %v13439_v20 = vpack.c.bf16 %v4820_v47, %v4816_v54 }
 0x583   : > { %v13441_v3 = vpack.c.bf16 %v4819_v18, %v4815_v15  ;;  %v13443_v25 = vpack.c.bf16 %v4821_v2, %v4817_v41  ;;  %v4636_v55 = vpop.f32.mrb[124].mxu1  ;;  %v4749_v57 = vpop.f32.mrb[124].mxu0  ;;  %6459 = vmatpush1.bf16.msra.mxu1 %v10672_v61  ;;  %6685 = vmatpush1.bf16.msra.mxu0 %v10675_v44  ;;  %v10693_v15 = vld [vmem:[%s14622_s12 + $0x4d8] ss:$28 sps:$4 sm:$0xff]  }
 0x584   : > { %v4637_v6 = vadd.f32 %v4636_v55, %v13330_v56  ;;  %v4750_v43 = vadd.f32 %v4749_v57, %v13333_v60  ;;  %v4638_v31 = vpop.f32.mrb[125].mxu1  ;;  %v4751_v12 = vpop.f32.mrb[125].mxu0  ;;  %6460 = vmatprep.subr.bf16.mxu1 %v10680_v58  ;;  %6686 = vmatprep.subr.bf16.mxu0 %v10683_v27  ;;  %v10690_v27 = vld [vmem:[%s14622_s12 + $0x4d0] ss:$28 sps:$4 sm:$0xff]  }
 0x585   : > { %v4639_v8 = vadd.f32 %v4638_v31, %v13336_v38  ;;  %v4752_v53 = vadd.f32 %v4751_v12, %v13339_v10  ;;  %v4640_v1 = vpop.f32.mrb[126].mxu1  ;;  %v4753_v26 = vpop.f32.mrb[126].mxu0  ;;  %6391 = vmatprep.mubr.bf16.mxu1 %v13441_v3  ;;  %6617 = vmatprep.mubr.bf16.mxu0 %v13441_v3  ;;  %v10698_v57 = vld [vmem:[%s14622_s12 + $0x50c] ss:$28 sps:$4 sm:$0xff]  }
 0x586   : > { %v4641_v29 = vadd.f32 %v4640_v1, %v13330_v56  ;;  %v4754_v52 = vadd.f32 %v4753_v26, %v13333_v60  ;;  %v4642_v16 = vpop.f32.mrb[127].mxu1  ;;  %v4755_v39 = vpop.f32.mrb[127].mxu0  ;;  %6392 = vmatmul.mubr.bf16.gmra.mrb[152].mxu1 %v13437_v23  ;;  %6618 = vmatmul.mubr.bf16.gmra.mrb[152].mxu0 %v13437_v23  ;;  %v4822_v13 = vmax.f32 %v4637_v6, 0.0  ;;  %v4824_v22 = vmax.f32 %v4750_v43, 0.0  ;;  %v10696_v26 = vld [vmem:[%s14622_s12 + $0x508] ss:$28 sps:$4 sm:$0xff]  }
 0x587   : > { %v4643_v14 = vadd.f32 %v4642_v16, %v13336_v38  ;;  %v4756_v19 = vadd.f32 %v4755_v39, %v13339_v10  ;;  %6461 = vmatpush1.bf16.msra.mxu1 %v10678_v11  ;;  %6687 = vmatpush1.bf16.msra.mxu0 %v10681_v21  ;;  %v4823_v28 = vmax.f32 %v4639_v8, 0.0  ;;  %v4825_v33 = vmax.f32 %v4752_v53, 0.0  ;;  %v10701_v11 = vld [vmem:[%s14622_s12 + $0x514] ss:$28 sps:$4 sm:$0xff]  }
 0x588   : > { %v4826_v34 = vmax.f32 %v4641_v29, 0.0  ;;  %v4828_v40 = vmax.f32 %v4754_v52, 0.0  ;;  %6462 = vmatprep.subr.bf16.mxu1 %v10686_v45  ;;  %6688 = vmatprep.subr.bf16.mxu0 %v10689_v62  ;;  %v10699_v29 = vld [vmem:[%s14622_s12 + $0x510] ss:$28 sps:$4 sm:$0xff]   ;;  %v10704_v52 = vld [vmem:[%s14622_s12 + $0x544] ss:$28 sps:$4 sm:$0xff]  }
 0x589   : > { %v4827_v49 = vmax.f32 %v4643_v14, 0.0  ;;  %v4829_v61 = vmax.f32 %v4756_v19, 0.0 }
 0x58a   : > { %v13481_v44 = vpack.c.bf16 %v4826_v34, %v4822_v13  ;;  %v13483_v58 = vpack.c.bf16 %v4828_v40, %v4824_v22 }
 0x58b   : > { %v13485_v50 = vpack.c.bf16 %v4827_v49, %v4823_v28  ;;  %v13487_v54 = vpack.c.bf16 %v4829_v61, %v4825_v33  ;;  %v4646_v48 = vpop.f32.mrb[128].mxu1  ;;  %v4759_v47 = vpop.f32.mrb[128].mxu0  ;;  %6463 = vmatpush1.bf16.msra.mxu1 %v10684_v4  ;;  %6689 = vmatpush1.bf16.msra.mxu0 %v10687_v17  ;;  %v10707_v4 = vld [vmem:[%s14622_s12 + $0x54c] ss:$28 sps:$4 sm:$0xff]   ;;  %v10702_v61 = vld [vmem:[%s14622_s12 + $0x540] ss:$28 sps:$4 sm:$0xff]  }
 0x58c   : > { %v4647_v41 = vadd.f32 %v4646_v48, %v13330_v56  ;;  %v4760_v18 = vadd.f32 %v4759_v47, %v13333_v60  ;;  %v4648_v2 = vpop.f32.mrb[129].mxu1  ;;  %v4761_v55 = vpop.f32.mrb[129].mxu0  ;;  %6464 = vmatprep.subr.bf16.mxu1 %v10692_v5  ;;  %6690 = vmatprep.subr.bf16.mxu0 %v10695_v46  ;;  %v10705_v48 = vld [vmem:[%s14622_s12 + $0x548] ss:$28 sps:$4 sm:$0xff]  }
 0x58d   : > { %v4649_v21 = vadd.f32 %v4648_v2, %v13336_v38  ;;  %v4762_v6 = vadd.f32 %v4761_v55, %v13339_v10  ;;  %v4650_v43 = vpop.f32.mrb[130].mxu1  ;;  %v4763_v31 = vpop.f32.mrb[130].mxu0  ;;  %6401 = vmatprep.mubr.bf16.mxu1 %v13485_v50  ;;  %6627 = vmatprep.mubr.bf16.mxu0 %v13485_v50  ;;  %v10713_v2 = vld [vmem:[%s14622_s12 + $0x584] ss:$28 sps:$4 sm:$0xff]  }
 0x58e   : > { %v4651_v12 = vadd.f32 %v4650_v43, %v13330_v56  ;;  %v4764_v45 = vadd.f32 %v4763_v31, %v13333_v60  ;;  %v4652_v62 = vpop.f32.mrb[131].mxu1  ;;  %v4765_v8 = vpop.f32.mrb[131].mxu0  ;;  %6402 = vmatmul.mubr.bf16.gmra.mrb[156].mxu1 %v13481_v44  ;;  %6628 = vmatmul.mubr.bf16.gmra.mrb[156].mxu0 %v13481_v44  ;;  %v4830_v16 = vmax.f32 %v4647_v41, 0.0  ;;  %v4832_v39 = vmax.f32 %v4760_v18, 0.0  ;;  %v10710_v18 = vld [vmem:[%s14622_s12 + $0x57c] ss:$28 sps:$4 sm:$0xff]  }
 0x58f   : > { %v4653_v53 = vadd.f32 %v4652_v62, %v13336_v38  ;;  %v4766_v1 = vadd.f32 %v4765_v8, %v13339_v10  ;;  %6465 = vmatpush1.bf16.msra.mxu1 %v10690_v27  ;;  %6691 = vmatpush1.bf16.msra.mxu0 %v10693_v15  ;;  %v4831_v17 = vmax.f32 %v4649_v21, 0.0  ;;  %v4833_v5 = vmax.f32 %v4762_v6, 0.0  ;;  %v10708_v8 = vld [vmem:[%s14622_s12 + $0x578] ss:$28 sps:$4 sm:$0xff]  }
 0x590   : > { %v4834_v14 = vmax.f32 %v4651_v12, 0.0  ;;  %v4836_v19 = vmax.f32 %v4764_v45, 0.0  ;;  %6466 = vmatprep.subr.bf16.mxu1 %v10698_v57  ;;  %6692 = vmatprep.subr.bf16.mxu0 %v10701_v11 }
 0x591   : > { %v4835_v13 = vmax.f32 %v4653_v53, 0.0  ;;  %v4837_v22 = vmax.f32 %v4766_v1, 0.0  ;;  %v10711_v53 = vld [vmem:[%s14622_s12 + $0x580] ss:$28 sps:$4 sm:$0xff]   ;;  %v10716_v1 = vld [vmem:[%s14622_s12 + $0x5b4] ss:$28 sps:$4 sm:$0xff]  }
 0x592   : > { %v13525_v34 = vpack.c.bf16 %v4834_v14, %v4830_v16  ;;  %v13527_v40 = vpack.c.bf16 %v4836_v19, %v4832_v39  ;;  %v10719_v39 = vld [vmem:[%s14622_s12 + $0x5bc] ss:$28 sps:$4 sm:$0xff]  }
 0x593   : > { %v13529_v46 = vpack.c.bf16 %v4835_v13, %v4831_v17  ;;  %v13531_v28 = vpack.c.bf16 %v4837_v22, %v4833_v5  ;;  %v4656_v33 = vpop.f32.mrb[132].mxu1  ;;  %v4769_v49 = vpop.f32.mrb[132].mxu0  ;;  %6467 = vmatpush1.bf16.msra.mxu1 %v10696_v26  ;;  %6693 = vmatpush1.bf16.msra.mxu0 %v10699_v29 }
 0x594   : > { %v4657_v47 = vadd.f32 %v4656_v33, %v13330_v56  ;;  %v4770_v27 = vadd.f32 %v4769_v49, %v13333_v60  ;;  %v4658_v15 = vpop.f32.mrb[133].mxu1  ;;  %v4771_v41 = vpop.f32.mrb[133].mxu0  ;;  %6468 = vmatprep.subr.bf16.mxu1 %v10704_v52  ;;  %6694 = vmatprep.subr.bf16.mxu0 %v10707_v4 }
 0x595   : > { %v4659_v55 = vadd.f32 %v4658_v15, %v13336_v38  ;;  %v4772_v57 = vadd.f32 %v4771_v41, %v13339_v10  ;;  %v4660_v11 = vpop.f32.mrb[134].mxu1  ;;  %v4773_v21 = vpop.f32.mrb[134].mxu0  ;;  %6411 = vmatprep.mubr.bf16.mxu1 %v13529_v46  ;;  %6637 = vmatprep.mubr.bf16.mxu0 %v13529_v46 }
 0x596   : > { %v4661_v6 = vadd.f32 %v4660_v11, %v13330_v56  ;;  %v4774_v43 = vadd.f32 %v4773_v21, %v13333_v60  ;;  %v4662_v31 = vpop.f32.mrb[135].mxu1  ;;  %v4775_v12 = vpop.f32.mrb[135].mxu0  ;;  %6412 = vmatmul.mubr.bf16.gmra.mrb[160].mxu1 %v13525_v34  ;;  %6638 = vmatmul.mubr.bf16.gmra.mrb[160].mxu0 %v13525_v34  ;;  %v4838_v26 = vmax.f32 %v4657_v47, 0.0  ;;  %v4840_v29 = vmax.f32 %v4770_v27, 0.0  ;;  %v10717_v47 = vld [vmem:[%s14622_s12 + $0x5b8] ss:$28 sps:$4 sm:$0xff]  }
 0x597   : > { %v4663_v45 = vadd.f32 %v4662_v31, %v13336_v38  ;;  %v4776_v62 = vadd.f32 %v4775_v12, %v13339_v10  ;;  %6469 = vmatpush1.bf16.msra.mxu1 %v10702_v61  ;;  %6695 = vmatpush1.bf16.msra.mxu0 %v10705_v48  ;;  %v4839_v14 = vmax.f32 %v4659_v55, 0.0  ;;  %v4841_v19 = vmax.f32 %v4772_v57, 0.0  ;;  %v10714_v48 = vld [vmem:[%s14622_s12 + $0x5b0] ss:$28 sps:$4 sm:$0xff]  }
 0x598   : > { %v4842_v52 = vmax.f32 %v4661_v6, 0.0  ;;  %v4844_v16 = vmax.f32 %v4774_v43, 0.0  ;;  %6470 = vmatprep.subr.bf16.mxu1 %v10710_v18  ;;  %6696 = vmatprep.subr.bf16.mxu0 %v10713_v2  ;;  %v10722_v2 = vld [vmem:[%s14622_s12 + $0x5ec] ss:$28 sps:$4 sm:$0xff]   ;;  %v10725_v55 = vld [vmem:[%s14622_s12 + $0x5f4] ss:$28 sps:$4 sm:$0xff]  }
 0x599   : > { %v4843_v4 = vmax.f32 %v4663_v45, 0.0  ;;  %v4845_v17 = vmax.f32 %v4776_v62, 0.0 }
 0x59a   : > { %v13569_v5 = vpack.c.bf16 %v4842_v52, %v4838_v26  ;;  %v13571_v13 = vpack.c.bf16 %v4844_v16, %v4840_v29  ;;  %v10728_v26 = vld [vmem:[%s14622_s12 + $0x624] ss:$28 sps:$4 sm:$0xff]  }
 0x59b   : > { %v13573_v22 = vpack.c.bf16 %v4843_v4, %v4839_v14  ;;  %v13575_v33 = vpack.c.bf16 %v4845_v17, %v4841_v19  ;;  %v4666_v49 = vpop.f32.mrb[136].mxu1  ;;  %v4779_v61 = vpop.f32.mrb[136].mxu0  ;;  %6471 = vmatpush1.bf16.msra.mxu1 %v10708_v8  ;;  %6697 = vmatpush1.bf16.msra.mxu0 %v10711_v53  ;;  %v10720_v53 = vld [vmem:[%s14622_s12 + $0x5e8] ss:$28 sps:$4 sm:$0xff]  }
 0x59c   : > { %v4667_v27 = vadd.f32 %v4666_v49, %v13330_v56  ;;  %v4780_v15 = vadd.f32 %v4779_v61, %v13333_v60  ;;  %v4668_v41 = vpop.f32.mrb[137].mxu1  ;;  %v4781_v18 = vpop.f32.mrb[137].mxu0  ;;  %6472 = vmatprep.subr.bf16.mxu1 %v10716_v1  ;;  %6698 = vmatprep.subr.bf16.mxu0 %v10719_v39  ;;  %v10723_v1 = vld [vmem:[%s14622_s12 + $0x5f0] ss:$28 sps:$4 sm:$0xff]  }
 0x59d   : > { %v4669_v57 = vadd.f32 %v4668_v41, %v13336_v38  ;;  %v4782_v11 = vadd.f32 %v4781_v18, %v13339_v10  ;;  %v4670_v21 = vpop.f32.mrb[138].mxu1  ;;  %v4783_v6 = vpop.f32.mrb[138].mxu0  ;;  %6421 = vmatprep.mubr.bf16.mxu1 %v13573_v22  ;;  %6647 = vmatprep.mubr.bf16.mxu0 %v13573_v22  ;;  %v10731_v14 = vld [vmem:[%s14622_s12 + $0x62c] ss:$28 sps:$4 sm:$0xff]   ;;  %v10726_v18 = vld [vmem:[%s14622_s12 + $0x620] ss:$28 sps:$4 sm:$0xff]  }
 0x59e   : > { %v4671_v43 = vadd.f32 %v4670_v21, %v13330_v56  ;;  %v4784_v31 = vadd.f32 %v4783_v6, %v13333_v60  ;;  %v4672_v12 = vpop.f32.mrb[139].mxu1  ;;  %v4785_v45 = vpop.f32.mrb[139].mxu0  ;;  %6422 = vmatmul.mubr.bf16.gmra.mrb[164].mxu1 %v13569_v5  ;;  %6648 = vmatmul.mubr.bf16.gmra.mrb[164].mxu0 %v13569_v5  ;;  %v4846_v29 = vmax.f32 %v4667_v27, 0.0  ;;  %v4848_v52 = vmax.f32 %v4780_v15, 0.0  ;;  %v10734_v6 = vld [vmem:[%s14622_s12 + $0x65c] ss:$28 sps:$4 sm:$0xff]  }
 0x59f   : > { %v4673_v62 = vadd.f32 %v4672_v12, %v13336_v38  ;;  %v4786_v8 = vadd.f32 %v4785_v45, %v13339_v10  ;;  %6473 = vmatpush1.bf16.msra.mxu1 %v10714_v48  ;;  %6699 = vmatpush1.bf16.msra.mxu0 %v10717_v47  ;;  %v4847_v19 = vmax.f32 %v4669_v57, 0.0  ;;  %v4849_v4 = vmax.f32 %v4782_v11, 0.0 }
 0x5a0   : > { %v4850_v16 = vmax.f32 %v4671_v43, 0.0  ;;  %v4852_v39 = vmax.f32 %v4784_v31, 0.0  ;;  %6474 = vmatprep.subr.bf16.mxu1 %v10722_v2  ;;  %6700 = vmatprep.subr.bf16.mxu0 %v10725_v55  ;;  %v10729_v2 = vld [vmem:[%s14622_s12 + $0x628] ss:$28 sps:$4 sm:$0xff]  }
 0x5a1   : > { %v4851_v17 = vmax.f32 %v4673_v62, 0.0  ;;  %v4853_v49 = vmax.f32 %v4786_v8, 0.0  ;;  %v10737_v43 = vld [vmem:[%s14622_s12 + $0x664] ss:$28 sps:$4 sm:$0xff]  }
 0x5a2   : > { %v13613_v61 = vpack.c.bf16 %v4850_v16, %v4846_v29  ;;  %v13615_v48 = vpack.c.bf16 %v4852_v39, %v4848_v52  ;;  %v10732_v16 = vld [vmem:[%s14622_s12 + $0x658] ss:$28 sps:$4 sm:$0xff]  }
 0x5a3   : > { %v13617_v47 = vpack.c.bf16 %v4851_v17, %v4847_v19  ;;  %v13619_v27 = vpack.c.bf16 %v4853_v49, %v4849_v4  ;;  %v4676_v15 = vpop.f32.mrb[140].mxu1  ;;  %v4789_v41 = vpop.f32.mrb[140].mxu0  ;;  %6475 = vmatpush1.bf16.msra.mxu1 %v10720_v53  ;;  %6701 = vmatpush1.bf16.msra.mxu0 %v10723_v1 }
 0x5a4   : > { %v4677_v55 = vadd.f32 %v4676_v15, %v13330_v56  ;;  %v4790_v57 = vadd.f32 %v4789_v41, %v13333_v60  ;;  %v4678_v11 = vpop.f32.mrb[141].mxu1  ;;  %v4791_v21 = vpop.f32.mrb[141].mxu0  ;;  %6476 = vmatprep.subr.bf16.mxu1 %v10728_v26  ;;  %6702 = vmatprep.subr.bf16.mxu0 %v10731_v14 }
 0x5a5   : > { %v4679_v31 = vadd.f32 %v4678_v11, %v13336_v38  ;;  %v4792_v12 = vadd.f32 %v4791_v21, %v13339_v10  ;;  %v4680_v45 = vpop.f32.mrb[142].mxu1  ;;  %v4793_v62 = vpop.f32.mrb[142].mxu0  ;;  %6431 = vmatprep.mubr.bf16.mxu1 %v13617_v47  ;;  %6657 = vmatprep.mubr.bf16.mxu0 %v13617_v47  ;;  %v10741_v11 = vld [vmem:[%s14622_s12 + $0x698] ss:$28 sps:$4 sm:$0xff]   ;;  %v10746_v21 = vld [vmem:[%s14622_s12 + $0x6cc] ss:$28 sps:$4 sm:$0xff]  }
 0x5a6   : > { %v4681_v8 = vadd.f32 %v4680_v45, %v13330_v56  ;;  %v4794_v53 = vadd.f32 %v4793_v62, %v13333_v60  ;;  %v4682_v1 = vpop.f32.mrb[143].mxu1  ;;  %v4795_v26 = vpop.f32.mrb[143].mxu0  ;;  %6432 = vmatmul.mubr.bf16.gmra.mrb[168].mxu1 %v13613_v61  ;;  %6658 = vmatmul.mubr.bf16.gmra.mrb[168].mxu0 %v13613_v61  ;;  %v10735_v56 = vld [vmem:[%s14622_s12 + $0x660] ss:$28 sps:$4 sm:$0xff]   ;;  %v10740_v60 = vld [vmem:[%s14622_s12 + $0x694] ss:$28 sps:$4 sm:$0xff]  }
 0x5a7   : > { %v4683_v29 = vadd.f32 %v4682_v1, %v13336_v38  ;;  %v4796_v52 = vadd.f32 %v4795_v26, %v13339_v10  ;;  %6477 = vmatpush1.bf16.msra.mxu1 %v10726_v18  ;;  %6703 = vmatpush1.bf16.msra.mxu0 %v10729_v2  ;;  %v4854_v39 = vmax.f32 %v4677_v55, 0.0  ;;  %v4856_v14 = vmax.f32 %v4790_v57, 0.0  ;;  %v10743_v10 = vld [vmem:[%s14622_s12 + $0x69c] ss:$28 sps:$4 sm:$0xff]   ;;  %v10738_v57 = vld [vmem:[%s14622_s12 + $0x690] ss:$28 sps:$4 sm:$0xff]  }
 0x5a8   : > { %v4858_v19 = vmax.f32 %v4681_v8, 0.0  ;;  %v4860_v38 = vmax.f32 %v4794_v53, 0.0  ;;  %6478 = vmatprep.subr.bf16.mxu1 %v10734_v6  ;;  %6704 = vmatprep.subr.bf16.mxu0 %v10737_v43  ;;  %v4855_v4 = vmax.f32 %v4679_v31, 0.0  ;;  %v4857_v17 = vmax.f32 %v4792_v12, 0.0  ;;  %v10749_v6 = vld [vmem:[%s14622_s12 + $0x6d4] ss:$28 sps:$4 sm:$0xff]  }
 0x5a9   : > { %v4859_v49 = vmax.f32 %v4683_v29, 0.0  ;;  %v4861_v15 = vmax.f32 %v4796_v52, 0.0  ;;  %v10744_v43 = vld [vmem:[%s14622_s12 + $0x6c8] ss:$28 sps:$4 sm:$0xff]   ;;  %v10747_v31 = vld [vmem:[%s14622_s12 + $0x6d0] ss:$28 sps:$4 sm:$0xff]  }
 0x5aa   : > { %v13657_v41 = vpack.c.bf16 %v4858_v19, %v4854_v39  ;;  %v13659_v18 = vpack.c.bf16 %v4860_v38, %v4856_v14  ;;  %v10752_v12 = vld [vmem:[%s14622_s12 + $0x14] ss:$28 sps:$4 sm:$0xff]   ;;  %v10755_v8 = vld [vmem:[%s14622_s12 + $0x4c] ss:$28 sps:$4 sm:$0xff]   ;;  %v10758_v29 = vld [vmem:[%s14622_s12 + $0x84] ss:$28 sps:$4 sm:$0xff]  }
 0x5ab   : > { %v13661_v2 = vpack.c.bf16 %v4859_v49, %v4855_v4  ;;  %v13663_v55 = vpack.c.bf16 %v4861_v15, %v4857_v17  ;;  %6479 = vmatpush1.bf16.msra.mxu1 %v10732_v16  ;;  %6705 = vmatpush1.bf16.msra.mxu0 %v10735_v56  ;;  %v13695_v45 = vld [vmem:[%s14622_s12 + $0x1d8] ss:$28 sps:$4 sm:$0xff]   ;;  %v10750_v62 = vld [vmem:[%s14622_s12 + $0x10] ss:$28 sps:$4 sm:$0xff]   ;;  %v10753_v26 = vld [vmem:[%s14622_s12 + $0x48] ss:$28 sps:$4 sm:$0xff]  }
 0x5ac   : > { %6480 = vmatprep.subr.bf16.mxu1 %v10740_v60  ;;  %6706 = vmatprep.subr.bf16.mxu0 %v10743_v10  ;;  %v13707_v53 = vld [vmem:[%s14622_s12 + $0x18] ss:$28 sps:$4 sm:$0xff]   ;;  %v13713_v1 = vld [vmem:[%s14622_s12 + $0x210] ss:$28 sps:$4 sm:$0xff]   ;;  %v13734_v16 = vld [vmem:[%s14622_s12 + $0x248] ss:$28 sps:$4 sm:$0xff]  }
 0x5ad   : > { %6441 = vmatprep.mubr.bf16.mxu1 %v13661_v2  ;;  %6667 = vmatprep.mubr.bf16.mxu0 %v13661_v2  ;;  %v13728_v52 = vld [vmem:[%s14622_s12 + $0x50] ss:$28 sps:$4 sm:$0xff]   ;;  %v10756_v56 = vld [vmem:[%s14622_s12 + $0x80] ss:$28 sps:$4 sm:$0xff]   ;;  %v13746_v39 = vld [vmem:[%s14622_s12 + $0x88] ss:$28 sps:$4 sm:$0xff]  }
 0x5ae   : > { %6442 = vmatmul.mubr.bf16.gmra.mrb[172].mxu1 %v13657_v41  ;;  %6668 = vmatmul.mubr.bf16.gmra.mrb[172].mxu0 %v13657_v41  ;;  %v10761_v60 = vld [vmem:[%s14622_s12 + $0xbc] ss:$28 sps:$4 sm:$0xff]   ;;  %v10764_v38 = vld [vmem:[%s14622_s12 + $0xf4] ss:$28 sps:$4 sm:$0xff]   ;;  %v10769_v49 = vld [vmem:[%s14622_s12 + $0x12c] ss:$28 sps:$4 sm:$0xff]  }
 0x5af   : > { %6481 = vmatpush1.bf16.msra.mxu1 %v10738_v57  ;;  %6484 = vmatprep.mubr.bf16.mxu1 %v13355_v51  ;;  %v13753_v14 = vld [vmem:[%s14622_s12 + $0x280] ss:$28 sps:$4 sm:$0xff]   ;;  %v10759_v19 = vld [vmem:[%s14622_s12 + $0xb8] ss:$28 sps:$4 sm:$0xff]   ;;  %v10762_v17 = vld [vmem:[%s14622_s12 + $0xf0] ss:$28 sps:$4 sm:$0xff]  }
 0x5b0   : > { %6707 = vmatpush1.bf16.msra.mxu0 %v10741_v11  ;;  %6710 = vmatprep.mubr.bf16.mxu0 %v13355_v51  ;;  %v13768_v10 = vld [vmem:[%s14622_s12 + $0xc0] ss:$28 sps:$4 sm:$0xff]   ;;  %v13774_v4 = vld [vmem:[%s14622_s12 + $0x2b8] ss:$28 sps:$4 sm:$0xff]   ;;  %v13793_v57 = vld [vmem:[%s14622_s12 + $0x2f0] ss:$28 sps:$4 sm:$0xff]  }
 0x5b1   : > { %6482 = vmatprep.subr.bf16.mxu1 %v10746_v21  ;;  %6708 = vmatprep.subr.bf16.mxu0 %v10749_v6  ;;  %v13786_v15 = vld [vmem:[%s14622_s12 + $0xf8] ss:$28 sps:$4 sm:$0xff]   ;;  %v10767_v11 = vld [vmem:[%s14622_s12 + $0x128] ss:$28 sps:$4 sm:$0xff]   ;;  %v13808_v6 = vld [vmem:[%s14622_s12 + $0x130] ss:$28 sps:$4 sm:$0xff]  }
 0x5b2   : > { %v10772_v21 = vld [vmem:[%s14622_s12 + $0x164] ss:$28 sps:$4 sm:$0xff]  }
 0x5b3   : > { %6483 = vmatpush1.bf16.msra.mxu1 %v10744_v43  ;;  %v13814_v43 = vld [vmem:[%s14622_s12 + $0x328] ss:$28 sps:$4 sm:$0xff]  }
 0x5b4   : > { %6709 = vmatpush1.bf16.msra.mxu0 %v10747_v31  ;;  %6791 = vmatprep.subr.bf16.mxu1 %v10752_v12  ;;  %v10770_v31 = vld [vmem:[%s14622_s12 + $0x160] ss:$28 sps:$4 sm:$0xff]  }
 0x5b5   : > { %9421 = vmatprep.subr.bf16.mxu0 %v13695_v45  ;;  %v10777_v12 = vld [vmem:[%s14622_s12 + $0x19c] ss:$28 sps:$4 sm:$0xff]  }
 0x5b6   : > { %6485 = vmatmul.mubr.bf16.vlgmr.msra.gmra.mrb[144].mxu1 %v13351_v0 }
 0x5b7   : > { %6711 = vmatmul.mubr.bf16.vlgmr.msra.gmra.mrb[144].mxu0 %v13351_v0  ;;  %6494 = vmatprep.mubr.bf16.mxu1 %v13399_v63 }
 0x5b8   : > { %6720 = vmatprep.mubr.bf16.mxu0 %v13399_v63  ;;  %6792 = vmatpush1.bf16.msra.mxu1 %v10750_v62  ;;  %v13826_v62 = vld [vmem:[%s14622_s12 + $0x168] ss:$28 sps:$4 sm:$0xff]  }
 0x5b9   : > { %6793 = vmatprep.subr.bf16.mxu1 %v10755_v8  ;;  %9422 = vmatpush3.bf16.msra.mxu0 %v13707_v53  ;;  %v13833_v8 = vld [vmem:[%s14622_s12 + $0x360] ss:$28 sps:$4 sm:$0xff]  }
 0x5ba   : > { %9423 = vmatprep.subr.bf16.mxu0 %v13713_v1 }
 0x5bc   : > { %6794 = vmatpush1.bf16.msra.mxu1 %v10753_v26  ;;  %v10775_v26 = vld [vmem:[%s14622_s12 + $0x198] ss:$28 sps:$4 sm:$0xff]  }
 0x5bd   : > { %6795 = vmatprep.subr.bf16.mxu1 %v10758_v29  ;;  %9424 = vmatpush3.bf16.msra.mxu0 %v13728_v52  ;;  %v10780_v29 = vld [vmem:[%s14622_s12 + $0x1d4] ss:$28 sps:$4 sm:$0xff]  }
 0x5be   : > { %6495 = vmatmul.mubr.bf16.gmra.mrb[148].mxu1 %v13395_v32  ;;  %9425 = vmatprep.subr.bf16.mxu0 %v13734_v16 }
 0x5bf   : > { %6721 = vmatmul.mubr.bf16.gmra.mrb[148].mxu0 %v13395_v32  ;;  %6504 = vmatprep.mubr.bf16.mxu1 %v13443_v25 }
 0x5c0   : > { %6730 = vmatprep.mubr.bf16.mxu0 %v13443_v25  ;;  %6796 = vmatpush1.bf16.msra.mxu1 %v10756_v56  ;;  %v13848_v56 = vld [vmem:[%s14622_s12 + $0x1a0] ss:$28 sps:$4 sm:$0xff]  }
 0x5c1   : > { %6797 = vmatprep.subr.bf16.mxu1 %v10761_v60  ;;  %9426 = vmatpush3.bf16.msra.mxu0 %v13746_v39  ;;  %v10829_v60 = vld [vmem:[%s14622_s12 + $0x558] ss:$28 sps:$4 sm:$0xff]  }
 0x5c2   : > { %9427 = vmatprep.subr.bf16.mxu0 %v13753_v14 }
 0x5c4   : > { %6798 = vmatpush1.bf16.msra.mxu1 %v10759_v19  ;;  %v10778_v19 = vld [vmem:[%s14622_s12 + $0x1d0] ss:$28 sps:$4 sm:$0xff]  }
 0x5c5   : > { %6799 = vmatprep.subr.bf16.mxu1 %v10764_v38  ;;  %9428 = vmatpush3.bf16.msra.mxu0 %v13768_v10  ;;  %v10785_v38 = vld [vmem:[%s14622_s12 + $0x20c] ss:$28 sps:$4 sm:$0xff]  }
 0x5c6   : > { %6505 = vmatmul.mubr.bf16.gmra.mrb[152].mxu1 %v13439_v20  ;;  %9429 = vmatprep.subr.bf16.mxu0 %v13774_v4 }
 0x5c7   : > { %6731 = vmatmul.mubr.bf16.gmra.mrb[152].mxu0 %v13439_v20  ;;  %6514 = vmatprep.mubr.bf16.mxu1 %v13487_v54 }
 0x5c8   : > { %6740 = vmatprep.mubr.bf16.mxu0 %v13487_v54  ;;  %6800 = vmatpush1.bf16.msra.mxu1 %v10762_v17  ;;  %v10783_v17 = vld [vmem:[%s14622_s12 + $0x208] ss:$28 sps:$4 sm:$0xff]  }
 0x5c9   : > { %6801 = vmatprep.subr.bf16.mxu1 %v10769_v49  ;;  %9430 = vmatpush3.bf16.msra.mxu0 %v13786_v15  ;;  %v10788_v49 = vld [vmem:[%s14622_s12 + $0x244] ss:$28 sps:$4 sm:$0xff]  }
 0x5ca   : > { %9431 = vmatprep.subr.bf16.mxu0 %v13793_v57 }
 0x5cc   : > { %6802 = vmatpush1.bf16.msra.mxu1 %v10767_v11  ;;  %v10786_v11 = vld [vmem:[%s14622_s12 + $0x240] ss:$28 sps:$4 sm:$0xff]  }
 0x5cd   : > { %6803 = vmatprep.subr.bf16.mxu1 %v10772_v21  ;;  %9432 = vmatpush3.bf16.msra.mxu0 %v13808_v6  ;;  %v10793_v21 = vld [vmem:[%s14622_s12 + $0x27c] ss:$28 sps:$4 sm:$0xff]  }
 0x5ce   : > { %6515 = vmatmul.mubr.bf16.gmra.mrb[156].mxu1 %v13483_v58  ;;  %9433 = vmatprep.subr.bf16.mxu0 %v13814_v43 }
 0x5cf   : > { %6741 = vmatmul.mubr.bf16.gmra.mrb[156].mxu0 %v13483_v58  ;;  %6524 = vmatprep.mubr.bf16.mxu1 %v13531_v28 }
 0x5d0   : > { %6750 = vmatprep.mubr.bf16.mxu0 %v13531_v28  ;;  %6804 = vmatpush1.bf16.msra.mxu1 %v10770_v31  ;;  %v10791_v31 = vld [vmem:[%s14622_s12 + $0x278] ss:$28 sps:$4 sm:$0xff]  }
 0x5d1   : > { %6805 = vmatprep.subr.bf16.mxu1 %v10777_v12  ;;  %9434 = vmatpush3.bf16.msra.mxu0 %v13826_v62  ;;  %v10796_v12 = vld [vmem:[%s14622_s12 + $0x2b4] ss:$28 sps:$4 sm:$0xff]  }
 0x5d2   : > { %9435 = vmatprep.subr.bf16.mxu0 %v13833_v8 }
 0x5d4   : > { %6806 = vmatpush1.bf16.msra.mxu1 %v10775_v26  ;;  %v10794_v26 = vld [vmem:[%s14622_s12 + $0x2b0] ss:$28 sps:$4 sm:$0xff]  }
 0x5d5   : > { %6807 = vmatprep.subr.bf16.mxu1 %v10780_v29  ;;  %9436 = vmatpush3.bf16.msra.mxu0 %v13848_v56  ;;  %v10801_v29 = vld [vmem:[%s14622_s12 + $0x2ec] ss:$28 sps:$4 sm:$0xff]  }
 0x5d6   : > { %6525 = vmatmul.mubr.bf16.gmra.mrb[160].mxu1 %v13527_v40  ;;  %9485 = vmatprep.subr.bf16.mxu0 %v10829_v60  ;;  %v10799_v60 = vld [vmem:[%s14622_s12 + $0x2e8] ss:$28 sps:$4 sm:$0xff]  }
 0x5d7   : > { %6751 = vmatmul.mubr.bf16.gmra.mrb[160].mxu0 %v13527_v40  ;;  %6534 = vmatprep.mubr.bf16.mxu1 %v13575_v33 }
 0x5d8   : > { %6760 = vmatprep.mubr.bf16.mxu0 %v13575_v33  ;;  %6808 = vmatpush1.bf16.msra.mxu1 %v10778_v19  ;;  %v10806_v19 = vld [vmem:[%s14622_s12 + $0x324] ss:$28 sps:$4 sm:$0xff]  }
 0x5d9   : > { %6809 = vmatprep.subr.bf16.mxu1 %v10785_v38  ;;  %v10804_v38 = vld [vmem:[%s14622_s12 + $0x320] ss:$28 sps:$4 sm:$0xff]  }
 0x5dc   : > { %6810 = vmatpush1.bf16.msra.mxu1 %v10783_v17  ;;  %v10811_v17 = vld [vmem:[%s14622_s12 + $0x35c] ss:$28 sps:$4 sm:$0xff]  }
 0x5dd   : > { %6811 = vmatprep.subr.bf16.mxu1 %v10788_v49  ;;  %v10809_v49 = vld [vmem:[%s14622_s12 + $0x358] ss:$28 sps:$4 sm:$0xff]  }
 0x5de   : > { %6535 = vmatmul.mubr.bf16.gmra.mrb[164].mxu1 %v13571_v13 }
 0x5df   : > { %6761 = vmatmul.mubr.bf16.gmra.mrb[164].mxu0 %v13571_v13  ;;  %6544 = vmatprep.mubr.bf16.mxu1 %v13619_v27 }
 0x5e0   : > { %6770 = vmatprep.mubr.bf16.mxu0 %v13619_v27  ;;  %6812 = vmatpush1.bf16.msra.mxu1 %v10786_v11  ;;  %v10816_v11 = vld [vmem:[%s14622_s12 + $0x394] ss:$28 sps:$4 sm:$0xff]  }
 0x5e1   : > { %6813 = vmatprep.subr.bf16.mxu1 %v10793_v21  ;;  %v10814_v21 = vld [vmem:[%s14622_s12 + $0x390] ss:$28 sps:$4 sm:$0xff]  }
 0x5e4   : > { %6814 = vmatpush1.bf16.msra.mxu1 %v10791_v31  ;;  %v10819_v31 = vld [vmem:[%s14622_s12 + $0x3cc] ss:$28 sps:$4 sm:$0xff]  }
 0x5e5   : > { %6815 = vmatprep.subr.bf16.mxu1 %v10796_v12  ;;  %v10837_v12 = vld [vmem:[%s14622_s12 + $0x590] ss:$28 sps:$4 sm:$0xff]  }
 0x5e6   : > { %6545 = vmatmul.mubr.bf16.gmra.mrb[168].mxu1 %v13615_v48 }
 0x5e7   : > { %6771 = vmatmul.mubr.bf16.gmra.mrb[168].mxu0 %v13615_v48  ;;  %6554 = vmatprep.mubr.bf16.mxu1 %v13663_v55 }
 0x5e8   : > { %6780 = vmatprep.mubr.bf16.mxu0 %v13663_v55  ;;  %6816 = vmatpush1.bf16.msra.mxu1 %v10794_v26  ;;  %v10817_v26 = vld [vmem:[%s14622_s12 + $0x3c8] ss:$28 sps:$4 sm:$0xff]  }
 0x5e9   : > { %6817 = vmatprep.subr.bf16.mxu1 %v10801_v29  ;;  %v10822_v29 = vld [vmem:[%s14622_s12 + $0x404] ss:$28 sps:$4 sm:$0xff]  }
 0x5ec   : > { %6818 = vmatpush1.bf16.msra.mxu1 %v10799_v60  ;;  %v10820_v60 = vld [vmem:[%s14622_s12 + $0x400] ss:$28 sps:$4 sm:$0xff]  }
 0x5ed   : > { %6819 = vmatprep.subr.bf16.mxu1 %v10806_v19  ;;  %v10845_v19 = vld [vmem:[%s14622_s12 + $0x5c8] ss:$28 sps:$4 sm:$0xff]  }
 0x5ee   : > { %6555 = vmatmul.mubr.bf16.gmra.mrb[172].mxu1 %v13659_v18 }
 0x5ef   : > { %6781 = vmatmul.mubr.bf16.gmra.mrb[172].mxu0 %v13659_v18  ;;  %6823 = vmatprep.mubr.bf16.mxu1 %v13353_v30 }
 0x5f0   : > { %6820 = vmatpush1.bf16.msra.mxu1 %v10804_v38  ;;  %7049 = vmatprep.mubr.bf16.mxu0 %v13353_v30  ;;  %v10830_v30 = vld [vmem:[%s14622_s12 + $0x398] ss:$28 sps:$4 sm:$0xff]   ;;  %v10846_v38 = vld [vmem:[%s14622_s12 + $0x408] ss:$28 sps:$4 sm:$0xff]  }
 0x5f1   : > { %6821 = vmatprep.subr.bf16.mxu1 %v10811_v17  ;;  %v10823_v17 = vld [vmem:[%s14622_s12 + $0x438] ss:$28 sps:$4 sm:$0xff]  }
 0x5f4   : > { %6822 = vmatpush1.bf16.msra.mxu1 %v10809_v49  ;;  %v10850_v49 = vld [vmem:[%s14622_s12 + $0x600] ss:$28 sps:$4 sm:$0xff]  }
 0x5f5   : > { %6904 = vmatprep.subr.bf16.mxu1 %v10816_v11  ;;  %v10826_v11 = vld [vmem:[%s14622_s12 + $0x470] ss:$28 sps:$4 sm:$0xff]  }
 0x5f7   : > { %6824 = vmatmul.mubr.bf16.vlgmr.msra.gmra.mrb[176].mxu1 %v13349_v24  ;;  %7050 = vmatmul.mubr.bf16.vlgmr.msra.gmra.mrb[176].mxu0 %v13349_v24  ;;  %v10838_v24 = vld [vmem:[%s14622_s12 + $0x3d0] ss:$28 sps:$4 sm:$0xff]  }
 0x5f8   : > { %6833 = vmatprep.mubr.bf16.mxu1 %v13397_v9  ;;  %6905 = vmatpush1.bf16.msra.mxu1 %v10814_v21  ;;  %v10833_v21 = vld [vmem:[%s14622_s12 + $0x4ac] ss:$28 sps:$4 sm:$0xff]  }
 0x5f9   : > { %7057 = vmatprep.mubr.bf16.mxu0 %v13397_v9  ;;  %6906 = vmatprep.subr.bf16.mxu1 %v10819_v31  ;;  %v10825_v9 = vld [vmem:[%s14622_s12 + $0x43c] ss:$28 sps:$4 sm:$0xff]  }
 0x5fa   : > { %9486 = vmatpush3.bf16.msra.mxu0 %v10830_v30  ;;  %v10855_v31 = vld [vmem:[%s14622_s12 + $0x638] ss:$28 sps:$4 sm:$0xff]   ;;  %v10831_v30 = vld [vmem:[%s14622_s12 + $0x4a8] ss:$28 sps:$4 sm:$0xff]  }
 0x5fb   : > { %9487 = vmatprep.subr.bf16.mxu0 %v10837_v12  ;;  %v10836_v12 = vld [vmem:[%s14622_s12 + $0x4e4] ss:$28 sps:$4 sm:$0xff]  }
 0x5fc   : > { %6907 = vmatpush1.bf16.msra.mxu1 %v10817_v26  ;;  %v10834_v26 = vld [vmem:[%s14622_s12 + $0x4e0] ss:$28 sps:$4 sm:$0xff]  }
 0x5fd   : > { %6908 = vmatprep.subr.bf16.mxu1 %v10822_v29  ;;  %v10860_v29 = vld [vmem:[%s14622_s12 + $0x670] ss:$28 sps:$4 sm:$0xff]  }
 0x5fe   : > { %9488 = vmatpush3.bf16.msra.mxu0 %v10838_v24  ;;  %v10861_v24 = vld [vmem:[%s14622_s12 + $0x4b0] ss:$28 sps:$4 sm:$0xff]  }
 0x5ff   : > { %6834 = vmatmul.mubr.bf16.gmra.mrb[180].mxu1 %v13393_v59  ;;  %7058 = vmatmul.mubr.bf16.gmra.mrb[180].mxu0 %v13393_v59  ;;  %v10828_v59 = vld [vmem:[%s14622_s12 + $0x474] ss:$28 sps:$4 sm:$0xff]  }
 0x600   : > { %6843 = vmatprep.mubr.bf16.mxu1 %v13441_v3  ;;  %6909 = vmatpush1.bf16.msra.mxu1 %v10820_v60  ;;  %v10839_v60 = vld [vmem:[%s14622_s12 + $0x518] ss:$28 sps:$4 sm:$0xff]  }
 0x601   : > { %7065 = vmatprep.mubr.bf16.mxu0 %v13441_v3  ;;  %6910 = vmatprep.subr.bf16.mxu1 %v10825_v9  ;;  %v10851_v3 = vld [vmem:[%s14622_s12 + $0x440] ss:$28 sps:$4 sm:$0xff]   ;;  %v10865_v9 = vld [vmem:[%s14622_s12 + $0x6a8] ss:$28 sps:$4 sm:$0xff]  }
 0x602   : > { %9489 = vmatprep.subr.bf16.mxu0 %v10845_v19  ;;  %v10842_v19 = vld [vmem:[%s14622_s12 + $0x550] ss:$28 sps:$4 sm:$0xff]  }
 0x603   : > { %9490 = vmatpush3.bf16.msra.mxu0 %v10846_v38  ;;  %v10849_v38 = vld [vmem:[%s14622_s12 + $0x58c] ss:$28 sps:$4 sm:$0xff]  }
 0x604   : > { %6911 = vmatpush1.bf16.msra.mxu1 %v10823_v17  ;;  %9491 = vmatprep.subr.bf16.mxu0 %v10850_v49  ;;  %v10870_v17 = vld [vmem:[%s14622_s12 + $0x6e0] ss:$28 sps:$4 sm:$0xff]   ;;  %v10847_v49 = vld [vmem:[%s14622_s12 + $0x588] ss:$28 sps:$4 sm:$0xff]  }
 0x605   : > { %6912 = vmatprep.subr.bf16.mxu1 %v10828_v59  ;;  %v10854_v59 = vld [vmem:[%s14622_s12 + $0x5c4] ss:$28 sps:$4 sm:$0xff]  }
 0x607   : > { %6844 = vmatmul.mubr.bf16.gmra.mrb[184].mxu1 %v13437_v23  ;;  %7066 = vmatmul.mubr.bf16.gmra.mrb[184].mxu0 %v13437_v23  ;;  %v10856_v23 = vld [vmem:[%s14622_s12 + $0x478] ss:$28 sps:$4 sm:$0xff]  }
 0x608   : > { %6853 = vmatprep.mubr.bf16.mxu1 %v13485_v50  ;;  %6913 = vmatpush1.bf16.msra.mxu1 %v10826_v11  ;;  %v10852_v11 = vld [vmem:[%s14622_s12 + $0x5c0] ss:$28 sps:$4 sm:$0xff]  }
 0x609   : > { %7073 = vmatprep.mubr.bf16.mxu0 %v13485_v50  ;;  %6914 = vmatprep.subr.bf16.mxu1 %v10833_v21  ;;  %v10841_v50 = vld [vmem:[%s14622_s12 + $0x51c] ss:$28 sps:$4 sm:$0xff]  }
 0x60a   : > { %9492 = vmatpush3.bf16.msra.mxu0 %v10851_v3  ;;  %v10857_v21 = vld [vmem:[%s14622_s12 + $0x5f8] ss:$28 sps:$4 sm:$0xff]  }
 0x60b   : > { %9493 = vmatprep.subr.bf16.mxu0 %v10855_v31  ;;  %v10864_v3 = vld [vmem:[%s14622_s12 + $0x634] ss:$28 sps:$4 sm:$0xff]  }
 0x60c   : > { %6915 = vmatpush1.bf16.msra.mxu1 %v10831_v30  ;;  %v10862_v31 = vld [vmem:[%s14622_s12 + $0x630] ss:$28 sps:$4 sm:$0xff]   ;;  %v10874_v30 = vld [vmem:[%s14622_s12 + $0x6a4] ss:$28 sps:$4 sm:$0xff]  }
 0x60d   : > { %6916 = vmatprep.subr.bf16.mxu1 %v10836_v12  ;;  %v10872_v12 = vld [vmem:[%s14622_s12 + $0x6a0] ss:$28 sps:$4 sm:$0xff]  }
 0x60e   : > { %9494 = vmatpush3.bf16.msra.mxu0 %v10856_v23  ;;  %v10875_v23 = vld [vmem:[%s14622_s12 + $0x6d8] ss:$28 sps:$4 sm:$0xff]  }
 0x60f   : > { %6854 = vmatmul.mubr.bf16.gmra.mrb[188].mxu1 %v13481_v44  ;;  %7074 = vmatmul.mubr.bf16.gmra.mrb[188].mxu0 %v13481_v44  ;;  %v10844_v44 = vld [vmem:[%s14622_s12 + $0x554] ss:$28 sps:$4 sm:$0xff]  }
 0x610   : > { %6863 = vmatprep.mubr.bf16.mxu1 %v13529_v46  ;;  %6917 = vmatpush1.bf16.msra.mxu1 %v10834_v26 }
 0x611   : > { %7081 = vmatprep.mubr.bf16.mxu0 %v13529_v46  ;;  %6918 = vmatprep.subr.bf16.mxu1 %v10841_v50  ;;  %v10866_v46 = vld [vmem:[%s14622_s12 + $0x4e8] ss:$28 sps:$4 sm:$0xff]  }
 0x612   : > { %9495 = vmatprep.subr.bf16.mxu0 %v10860_v29 }
 0x613   : > { %9496 = vmatpush3.bf16.msra.mxu0 %v10861_v24 }
 0x614   : > { %6919 = vmatpush1.bf16.msra.mxu1 %v10839_v60  ;;  %9497 = vmatprep.subr.bf16.mxu0 %v10865_v9 }
 0x615   : > { %6920 = vmatprep.subr.bf16.mxu1 %v10844_v44 }
 0x617   : > { %6864 = vmatmul.mubr.bf16.gmra.mrb[192].mxu1 %v13525_v34  ;;  %7082 = vmatmul.mubr.bf16.gmra.mrb[192].mxu0 %v13525_v34  ;;  %v10871_v34 = vld [vmem:[%s14622_s12 + $0x520] ss:$28 sps:$4 sm:$0xff]  }
 0x618   : > { %6873 = vmatprep.mubr.bf16.mxu1 %v13573_v22  ;;  %6921 = vmatpush1.bf16.msra.mxu1 %v10842_v19 }
 0x619   : > { %7089 = vmatprep.mubr.bf16.mxu0 %v13573_v22  ;;  %6922 = vmatprep.subr.bf16.mxu1 %v10849_v38  ;;  %v10859_v22 = vld [vmem:[%s14622_s12 + $0x5fc] ss:$28 sps:$4 sm:$0xff]  }
 0x61a   : > { %9498 = vmatpush3.bf16.msra.mxu0 %v10866_v46 }
 0x61b   : > { %9499 = vmatprep.subr.bf16.mxu0 %v10870_v17 }
 0x61c   : > { %6923 = vmatpush1.bf16.msra.mxu1 %v10847_v49 }
 0x61d   : > { %6924 = vmatprep.subr.bf16.mxu1 %v10854_v59 }
 0x61e   : > { %9500 = vmatpush3.bf16.msra.mxu0 %v10871_v34 }
 0x61f   : > { %6874 = vmatmul.mubr.bf16.gmra.mrb[196].mxu1 %v13569_v5  ;;  %7090 = vmatmul.mubr.bf16.gmra.mrb[196].mxu0 %v13569_v5  ;;  %v10869_v5 = vld [vmem:[%s14622_s12 + $0x66c] ss:$28 sps:$4 sm:$0xff]  }
 0x620   : > { %6883 = vmatprep.mubr.bf16.mxu1 %v13617_v47  ;;  %6925 = vmatpush1.bf16.msra.mxu1 %v10852_v11 }
 0x621   : > { %7097 = vmatprep.mubr.bf16.mxu0 %v13617_v47  ;;  %6926 = vmatprep.subr.bf16.mxu1 %v10859_v22  ;;  %v10867_v47 = vld [vmem:[%s14622_s12 + $0x668] ss:$28 sps:$4 sm:$0xff]  }
 0x624   : > { %6927 = vmatpush1.bf16.msra.mxu1 %v10857_v21 }
 0x625   : > { %6928 = vmatprep.subr.bf16.mxu1 %v10864_v3 }
 0x627   : > { %6884 = vmatmul.mubr.bf16.gmra.mrb[200].mxu1 %v13613_v61  ;;  %7098 = vmatmul.mubr.bf16.gmra.mrb[200].mxu0 %v13613_v61  ;;  %v10877_v61 = vld [vmem:[%s14622_s12 + $0x6dc] ss:$28 sps:$4 sm:$0xff]  }
 0x628   : > { %6893 = vmatprep.mubr.bf16.mxu1 %v13661_v2  ;;  %6929 = vmatpush1.bf16.msra.mxu1 %v10862_v31 }
 0x629   : > { %7146 = vmatprep.mubr.bf16.mxu0 %v13355_v51  ;;  %6930 = vmatprep.subr.bf16.mxu1 %v10869_v5 }
 0x62c   : > { %6931 = vmatpush1.bf16.msra.mxu1 %v10867_v47 }
 0x62d   : > { %6932 = vmatprep.subr.bf16.mxu1 %v10874_v30 }
 0x62f   : > { %6894 = vmatmul.mubr.bf16.gmra.mrb[204].mxu1 %v13657_v41  ;;  %7147 = vmatmul.mubr.bf16.vlgmr.msra.gmra.mrb[204].mxu0 %v13351_v0 }
 0x630   : > { %6933 = vmatpush1.bf16.msra.mxu1 %v10872_v12  ;;  %6936 = vmatprep.mubr.bf16.mxu1 %v13355_v51 }
 0x631   : > { %7154 = vmatprep.mubr.bf16.mxu0 %v13399_v63  ;;  %6934 = vmatprep.subr.bf16.mxu1 %v10877_v61 }
 0x634   : > { %6935 = vmatpush1.bf16.msra.mxu1 %v10875_v23 }
 0x635   : > { %9583 = vmatprep.subr.bf16.mxu1 %v13695_v45 }
 0x637   : > { %6937 = vmatmul.mubr.bf16.vlgmr.msra.gmra.mrb[176].mxu1 %v13351_v0  ;;  %7155 = vmatmul.mubr.bf16.gmra.mrb[208].mxu0 %v13395_v32  ;;  %v5150_v0 = vld [vmem:[%s14623_s13] sm:$0x7f] }
 0x638   : > { %6946 = vmatprep.mubr.bf16.mxu1 %v13399_v63  ;;  %9591 = vmatpush3.bf16.msra.mxu1 %v13707_v53  ;;  %v14139_v51 = vrot.slane %v5150_v0, %v12330_v36  ;;  %v14145_v63 = vrot.slane %v5150_v0, %v12338_v42 }
 0x639   : > { %7162 = vmatprep.mubr.bf16.mxu0 %v13443_v25  ;;  %9584 = vmatprep.subr.bf16.mxu1 %v13713_v1 }
 0x63c   : > { %9592 = vmatpush3.bf16.msra.mxu1 %v13728_v52 }
 0x63d   : > { %9585 = vmatprep.subr.bf16.mxu1 %v13734_v16 }
 0x63f   : > { %6947 = vmatmul.mubr.bf16.gmra.mrb[180].mxu1 %v13395_v32  ;;  %7163 = vmatmul.mubr.bf16.gmra.mrb[212].mxu0 %v13439_v20  ;;  %v14142_v32 = vrot.slane %v5150_v0, %v12437_v7 }
 0x640   : > { %6956 = vmatprep.mubr.bf16.mxu1 %v13443_v25  ;;  %7170 = vmatprep.mubr.bf16.mxu0 %v13487_v54 }
 0x641   : > { %9593 = vmatpush3.bf16.msra.mxu1 %v13746_v39 }
 0x642   : > { %9586 = vmatprep.subr.bf16.mxu1 %v13753_v14 }
 0x645   : > { %9594 = vmatpush3.bf16.msra.mxu1 %v13768_v10 }
 0x646   : > { %9587 = vmatprep.subr.bf16.mxu1 %v13774_v4 }
 0x647   : > { %6957 = vmatmul.mubr.bf16.gmra.mrb[184].mxu1 %v13439_v20  ;;  %7171 = vmatmul.mubr.bf16.gmra.mrb[216].mxu0 %v13483_v58  ;;  %v14148_v20 = vrot.slane %v5150_v0, %v12440_v37 }
 0x648   : > { %6966 = vmatprep.mubr.bf16.mxu1 %v13487_v54  ;;  %7178 = vmatprep.mubr.bf16.mxu0 %v13531_v28 }
 0x649   : > { %9595 = vmatpush3.bf16.msra.mxu1 %v13786_v15 }
 0x64a   : > { %9588 = vmatprep.subr.bf16.mxu1 %v13793_v57 }
 0x64d   : > { %9596 = vmatpush3.bf16.msra.mxu1 %v13808_v6 }
 0x64e   : > { %9589 = vmatprep.subr.bf16.mxu1 %v13814_v43 }
 0x64f   : > { %6967 = vmatmul.mubr.bf16.gmra.mrb[188].mxu1 %v13483_v58  ;;  %7179 = vmatmul.mubr.bf16.gmra.mrb[220].mxu0 %v13527_v40 }
 0x650   : > { %6976 = vmatprep.mubr.bf16.mxu1 %v13531_v28  ;;  %7186 = vmatprep.mubr.bf16.mxu0 %v13575_v33 }
 0x651   : > { %9597 = vmatpush3.bf16.msra.mxu1 %v13826_v62 }
 0x652   : > { %9590 = vmatprep.subr.bf16.mxu1 %v13833_v8 }
 0x655   : > { %9598 = vmatpush3.bf16.msra.mxu1 %v13848_v56 }
 0x657   : > { %6977 = vmatmul.mubr.bf16.gmra.mrb[192].mxu1 %v13527_v40  ;;  %7187 = vmatmul.mubr.bf16.gmra.mrb[224].mxu0 %v13571_v13 }
 0x658   : > { %6986 = vmatprep.mubr.bf16.mxu1 %v13575_v33  ;;  %7194 = vmatprep.mubr.bf16.mxu0 %v13619_v27 }
 0x65f   : > { %6987 = vmatmul.mubr.bf16.gmra.mrb[196].mxu1 %v13571_v13  ;;  %7195 = vmatmul.mubr.bf16.gmra.mrb[228].mxu0 %v13615_v48 }
 0x660   : > { %6996 = vmatprep.mubr.bf16.mxu1 %v13619_v27  ;;  %7202 = vmatprep.mubr.bf16.mxu0 %v13663_v55 }
 0x667   : > { %6997 = vmatmul.mubr.bf16.gmra.mrb[200].mxu1 %v13615_v48  ;;  %7203 = vmatmul.mubr.bf16.gmra.mrb[232].mxu0 %v13659_v18 }
 0x668   : > { %7006 = vmatprep.mubr.bf16.mxu1 %v13663_v55 }
 0x66f   : > { %7007 = vmatmul.mubr.bf16.gmra.mrb[204].mxu1 %v13659_v18 }
 0x670   : > { %7105 = vmatprep.mubr.bf16.mxu1 %v13661_v2 }
 0x677   : > { %7106 = vmatmul.mubr.bf16.vlgmr.msra.gmra.mrb[208].mxu1 %v13657_v41 }
 0x689   : > { %v6486_v25 = vpop.f32.mrb[144].mxu1 }
 0x68a   : > { %v9711_v58 = vadd.f32 %v6486_v25, %v14139_v51  ;;  %v6712_v54 = vpop.f32.mrb[144].mxu0  ;;  %v6488_v40 = vpop.f32.mrb[145].mxu1 }
 0x68b   : > { %v9743_v28 = vadd.f32 %v6712_v54, %v14142_v32  ;;  %v9712_v13 = vadd.f32 %v6488_v40, %v14145_v63  ;;  %v6714_v36 = vpop.f32.mrb[145].mxu0  ;;  %v6490_v33 = vpop.f32.mrb[146].mxu1 }
 0x68c   : > { %v9035_v48 = vmul.f32 -1.442695, %v9711_v58  ;;  %v9744_v7 = vadd.f32 %v6714_v36, %v14148_v20  ;;  %v9713_v42 = vadd.f32 %v6490_v33, %v14139_v51  ;;  %v6716_v27 = vpop.f32.mrb[146].mxu0  ;;  %v6492_v41 = vpop.f32.mrb[147].mxu1 }
 0x68d   : > { %v9037_v37 = vmul.f32 -1.442695, %v9743_v28  ;;  %v9036_v18 = vmul.f32 -1.442695, %v9712_v13  ;;  %v9745_v2 = vadd.f32 %v6716_v27, %v14142_v32  ;;  %v9714_v55 = vadd.f32 %v6492_v41, %v14145_v63  ;;  %v6718_v45 = vpop.f32.mrb[147].mxu0 }
 0x68e   : > { %10910 = vpow2.f32 %v9035_v48  ;;  %v9038_v53 = vmul.f32 -1.442695, %v9744_v7  ;;  %v9042_v1 = vmul.f32 -1.442695, %v9713_v42  ;;  %v9746_v52 = vadd.f32 %v6718_v45, %v14148_v20 }
 0x68f   : > { %10912 = vpow2.f32 %v9037_v37  ;;  %v9044_v16 = vmul.f32 -1.442695, %v9745_v2  ;;  %v9043_v39 = vmul.f32 -1.442695, %v9714_v55 }
 0x690   : > { %10914 = vpow2.f32 %v9036_v18  ;;  %v9045_v14 = vmul.f32 -1.442695, %v9746_v52 }
 0x691   : > { %10916 = vpow2.f32 %v9038_v53  ;;  %v6496_v10 = vpop.f32.mrb[148].mxu1 }
 0x692   : > { %10918 = vpow2.f32 %v9042_v1  ;;  %v9715_v4 = vadd.f32 %v6496_v10, %v14139_v51  ;;  %v6722_v15 = vpop.f32.mrb[148].mxu0  ;;  %v6498_v57 = vpop.f32.mrb[149].mxu1 }
 0x693   : > { %10920 = vpow2.f32 %v9044_v16  ;;  %v9747_v6 = vadd.f32 %v6722_v15, %v14142_v32  ;;  %v9716_v43 = vadd.f32 %v6498_v57, %v14145_v63  ;;  %v6724_v62 = vpop.f32.mrb[149].mxu0  ;;  %v6500_v8 = vpop.f32.mrb[150].mxu1 }
 0x694   : > { %10922 = vpow2.f32 %v9043_v39  ;;  %v9049_v56 = vmul.f32 -1.442695, %v9715_v4  ;;  %v9748_v26 = vadd.f32 %v6724_v62, %v14148_v20  ;;  %v9717_v50 = vadd.f32 %v6500_v8, %v14139_v51  ;;  %v6726_v29 = vpop.f32.mrb[150].mxu0  ;;  %v6502_v24 = vpop.f32.mrb[151].mxu1 }
 0x695   : > { %10924 = vpow2.f32 %v9045_v14  ;;  %v9051_v60 = vmul.f32 -1.442695, %v9747_v6  ;;  %v9050_v9 = vmul.f32 -1.442695, %v9716_v43  ;;  %v6728_v44 = vpop.f32.mrb[151].mxu0  ;;  %v9749_v48 = vadd.f32 %v6726_v29, %v14142_v32 }
 0x696   : > { %10926 = vpow2.f32 %v9049_v56  ;;  %v9052_v19 = vmul.f32 -1.442695, %v9748_v26  ;;  %v9056_v38 = vmul.f32 -1.442695, %v9717_v50  ;;  %v9718_v27 = vadd.f32 %v6502_v24, %v14145_v63 }
 0x697   : > { %10928 = vpow2.f32 %v9051_v60  ;;  %v9750_v2 = vadd.f32 %v6728_v44, %v14148_v20  ;;  %v9058_v4 = vmul.f32 -1.442695, %v9749_v48 }
 0x698   : > { %v10911_v46 = vpop.eup %10910  ;;  %10930 = vpow2.f32 %v9050_v9  ;;  %v9057_v8 = vmul.f32 -1.442695, %v9718_v27 }
 0x699   : > { %v10913_v17 = vpop.eup %10912  ;;  %v7547_v49 = vadd.f32 1.0, %v10911_v46  ;;  %10932 = vpow2.f32 %v9052_v19  ;;  %v6506_v59 = vpop.f32.mrb[152].mxu1  ;;  %v9059_v29 = vmul.f32 -1.442695, %v9750_v2 }
 0x69a   : > { %v10915_v34 = vpop.eup %10914  ;;  %v7549_v11 = vadd.f32 1.0, %v10913_v17  ;;  %10934 = vpow2.f32 %v9056_v38  ;;  %v6732_v22 = vpop.f32.mrb[152].mxu0  ;;  %v9719_v52 = vadd.f32 %v6506_v59, %v14139_v51 }
 0x69b   : > { %v6508_v21 = vpop.f32.mrb[153].mxu1  ;;  %v10917_v3 = vpop.eup %10916  ;;  %10936 = vrcp.f32 %v7547_v49  ;;  %v7548_v31 = vadd.f32 1.0, %v10915_v34  ;;  %v9751_v15 = vadd.f32 %v6732_v22, %v14142_v32 }
 0x69c   : > { %v6734_v5 = vpop.f32.mrb[153].mxu0  ;;  %v6510_v47 = vpop.f32.mrb[154].mxu1  ;;  %10938 = vrcp.f32 %v7549_v11  ;;  %v7550_v12 = vadd.f32 1.0, %v10917_v3  ;;  %v9720_v56 = vadd.f32 %v6508_v21, %v14145_v63  ;;  %v9063_v9 = vmul.f32 -1.442695, %v9719_v52 }
 0x69d   : > { %v10919_v30 = vpop.eup %10918  ;;  %v6736_v61 = vpop.f32.mrb[154].mxu0  ;;  %10940 = vrcp.f32 %v7548_v31  ;;  %v9752_v24 = vadd.f32 %v6734_v5, %v14148_v20  ;;  %v9721_v44 = vadd.f32 %v6510_v47, %v14139_v51  ;;  %v9065_v46 = vmul.f32 -1.442695, %v9751_v15 }
 0x69e   : > { %v14163_v23 = vpop.f32.mrb[155].mxu1  ;;  %v10921_v0 = vpop.eup %10920  ;;  %v7554_v25 = vadd.f32 1.0, %v10919_v30  ;;  %10942 = vrcp.f32 %v7550_v12  ;;  %v9753_v17 = vadd.f32 %v6736_v61, %v14142_v32  ;;  %v9064_v34 = vmul.f32 -1.442695, %v9720_v56 }
 0x69f   : > { %v14165_v58 = vpop.f32.mrb[155].mxu0  ;;  %v10923_v54 = vpop.eup %10922  ;;  %v7556_v40 = vadd.f32 1.0, %v10921_v0  ;;  %v9722_v11 = vadd.f32 %v14163_v23, %v14145_v63  ;;  %v9066_v3 = vmul.f32 -1.442695, %v9752_v24  ;;  %v9070_v12 = vmul.f32 -1.442695, %v9721_v44 }
 0x6a0   : > { %v10925_v28 = vpop.eup %10924  ;;  %10944 = vrcp.f32 %v7554_v25  ;;  %v7555_v13 = vadd.f32 1.0, %v10923_v54  ;;  %v9754_v31 = vadd.f32 %v14165_v58, %v14148_v20  ;;  %v9072_v58 = vmul.f32 -1.442695, %v9753_v17 }
 0x6a1   : > { %v10927_v36 = vpop.eup %10926  ;;  %10946 = vrcp.f32 %v7556_v40  ;;  %v7557_v33 = vadd.f32 1.0, %v10925_v28  ;;  %v6516_v41 = vpop.f32.mrb[156].mxu1  ;;  %v9071_v48 = vmul.f32 -1.442695, %v9722_v11 }
 0x6a2   : > { %v10929_v7 = vpop.eup %10928  ;;  %10948 = vrcp.f32 %v7555_v13  ;;  %v7561_v42 = vadd.f32 1.0, %v10927_v36  ;;  %v6742_v55 = vpop.f32.mrb[156].mxu0  ;;  %v9723_v61 = vadd.f32 %v6516_v41, %v14139_v51  ;;  %v9073_v27 = vmul.f32 -1.442695, %v9754_v31 }
 0x6a3   : > { %v10931_v37 = vpop.eup %10930  ;;  %10950 = vrcp.f32 %v7557_v33  ;;  %v7563_v18 = vadd.f32 1.0, %v10929_v7  ;;  %v14170_v45 = vpop.f32.mrb[157].mxu1  ;;  %v9755_v40 = vadd.f32 %v6742_v55, %v14142_v32 }
 0x6a4   : > { %v10933_v53 = vpop.eup %10932  ;;  %10952 = vrcp.f32 %v7561_v42  ;;  %v7562_v1 = vadd.f32 1.0, %v10931_v37  ;;  %v14173_v16 = vpop.f32.mrb[157].mxu0  ;;  %v9724_v15 = vadd.f32 %v14170_v45, %v14145_v63 }
 0x6a5   : > { %v14175_v39 = vpop.f32.mrb[158].mxu1  ;;  %v10935_v14 = vpop.eup %10934  ;;  %10954 = vrcp.f32 %v7563_v18  ;;  %v7564_v10 = vadd.f32 1.0, %v10933_v53  ;;  %v9077_v18 = vmul.f32 -1.442695, %v9723_v61  ;;  %v9756_v45 = vadd.f32 %v14173_v16, %v14148_v20 }
 0x6a6   : > { %v14178_v57 = vpop.f32.mrb[158].mxu0  ;;  %v14180_v6 = vpop.f32.mrb[159].mxu1  ;;  %10956 = vrcp.f32 %v7562_v1  ;;  %v7568_v62 = vadd.f32 1.0, %v10935_v14  ;;  %v9079_v1 = vmul.f32 -1.442695, %v9755_v40 }
 0x6a7   : > { %v10937_v43 = vpop.eup %10936  ;;  %v14183_v26 = vpop.f32.mrb[159].mxu0  ;;  %10958 = vrcp.f32 %v7564_v10 }
 0x6a8   : > { %v10939_v50 = vpop.eup %10938  ;;  %10960 = vrcp.f32 %v7568_v62 }
 0x6a9   : > { %v10941_v60 = vpop.eup %10940  ;;  %10962 = vpow2.f32 %v9058_v4  ;;  %v14197_v22 = vpop.f32.mrb[160].mxu1 }
 0x6aa   : > { %v10943_v19 = vpop.eup %10942  ;;  %v9213_v38 = vpack.c.bf16 %v10941_v60, %v10937_v43  ;;  %10964 = vpow2.f32 %v9057_v8  ;;  %v14202_v5 = vpop.f32.mrb[160].mxu0 }
 0x6ab   : > { %v10945_v49 = vpop.eup %10944  ;;  %v9214_v59 = vpack.c.bf16 %v10943_v19, %v10939_v50  ;;  %10966 = vpow2.f32 %v9059_v29  ;;  %v14204_v47 = vpop.f32.mrb[161].mxu1 }
 0x6ac   : > { %v10947_v21 = vpop.eup %10946  ;;  %8235 = vst [vmem:[%s14191_s30] sm:$0xff] %v9213_v38  ;;  %10968 = vpow2.f32 %v9063_v9  ;;  %v14208_v23 = vpop.f32.mrb[161].mxu0 }
 0x6ad   : > { %v10949_v30 = vpop.eup %10948  ;;  %8236 = vst [vmem:[%s14191_s30 + $0x8] sm:$0xff] %v9214_v59  ;;  %v14210_v0 = vpop.f32.mrb[162].mxu1  ;;  %10970 = vpow2.f32 %v9065_v46 }
 0x6ae   : > { %v10951_v25 = vpop.eup %10950  ;;  %v9217_v54 = vpack.c.bf16 %v10949_v30, %v10945_v49  ;;  %v6756_v28 = vpop.f32.mrb[162].mxu0  ;;  %10972 = vpow2.f32 %v9064_v34 }
 0x6af   : > { %v14213_v13 = vpop.f32.mrb[163].mxu1  ;;  %v10953_v36 = vpop.eup %10952  ;;  %v9218_v33 = vpack.c.bf16 %v10951_v25, %v10947_v21  ;;  %10974 = vpow2.f32 %v9066_v3  ;;  %v14217_v41 = vadd.f32 %v6756_v28, %v14142_v32  ;;  %v14243_v3 = vmul.f32 -1.442695, %v9724_v15 }
 0x6b0   : > { %v6758_v7 = vpop.f32.mrb[163].mxu0  ;;  %v10955_v42 = vpop.eup %10954  ;;  %8240 = vst [vmem:[%s14191_s30 + $0x1c] sm:$0xff] %v9217_v54  ;;  %10976 = vpow2.f32 %v9070_v12 }
 0x6b1   : > { %v10957_v37 = vpop.eup %10956  ;;  %8241 = vst [vmem:[%s14191_s30 + $0x24] sm:$0xff] %v9218_v33  ;;  %v14221_v2 = vadd.f32 %v6758_v7, %v14148_v20  ;;  %10978 = vpow2.f32 %v9072_v58  ;;  %v6536_v10 = vpop.f32.mrb[164].mxu1  ;;  %v14254_v58 = vmul.f32 -1.442695, %v9756_v45  ;;  %v9725_v33 = vadd.f32 %v14175_v39, %v14139_v51 }
 0x6b2   : > { %v10959_v55 = vpop.eup %10958  ;;  %v9221_v53 = vpack.c.bf16 %v10957_v37, %v10953_v36  ;;  %10980 = vpow2.f32 %v9071_v48  ;;  %v14229_v43 = vadd.f32 %v6536_v10, %v14139_v51  ;;  %v6762_v62 = vpop.f32.mrb[164].mxu0  ;;  %v9757_v48 = vadd.f32 %v14178_v57, %v14142_v32 }
 0x6b3   : > { %v14223_v52 = vpop.eup %10960  ;;  %v9222_v14 = vpack.c.bf16 %v10959_v55, %v10955_v42  ;;  %10982 = vpow2.f32 %v9073_v27  ;;  %v6538_v8 = vpop.f32.mrb[165].mxu1  ;;  %v14233_v29 = vadd.f32 %v6762_v62, %v14142_v32  ;;  %v9726_v37 = vadd.f32 %v14180_v6, %v14145_v63 }
 0x6b4   : > { %v10963_v4 = vpop.eup %10962  ;;  %8244 = vst [vmem:[%s14191_s30 + $0x38] sm:$0xff] %v9221_v53  ;;  %10984 = vpow2.f32 %v9077_v18  ;;  %v14236_v24 = vadd.f32 %v6538_v8, %v14145_v63  ;;  %v6764_v60 = vpop.f32.mrb[165].mxu0  ;;  %v9758_v6 = vadd.f32 %v14183_v26, %v14148_v20 }
 0x6b5   : > { %v10965_v56 = vpop.eup %10964  ;;  %8245 = vst [vmem:[%s14191_s30 + $0x40] sm:$0xff] %v9222_v14  ;;  %v7570_v50 = vadd.f32 1.0, %v10963_v4  ;;  %v6540_v9 = vpop.f32.mrb[166].mxu1  ;;  %10986 = vpow2.f32 %v9079_v1  ;;  %v14241_v38 = vadd.f32 %v6764_v60, %v14148_v20 }
 0x6b6   : > { %v10967_v44 = vpop.eup %10966  ;;  %v7569_v19 = vadd.f32 1.0, %v10965_v56  ;;  %v6766_v46 = vpop.f32.mrb[166].mxu0  ;;  %v14246_v31 = vadd.f32 %v6540_v9, %v14139_v51 }
 0x6b7   : > { %v6542_v17 = vpop.f32.mrb[167].mxu1  ;;  %v10969_v49 = vpop.eup %10968  ;;  %10988 = vrcp.f32 %v7570_v50  ;;  %v7571_v59 = vadd.f32 1.0, %v10967_v44  ;;  %v14249_v12 = vadd.f32 %v6766_v46, %v14142_v32  ;;  %v9084_v44 = vmul.f32 -1.442695, %v9725_v33 }
 0x6b8   : > { %v6768_v34 = vpop.f32.mrb[167].mxu0  ;;  %v10971_v11 = vpop.eup %10970  ;;  %10990 = vrcp.f32 %v7569_v19  ;;  %v7575_v21 = vadd.f32 1.0, %v10969_v49  ;;  %v14252_v61 = vadd.f32 %v6542_v17, %v14145_v63  ;;  %v9086_v19 = vmul.f32 -1.442695, %v9757_v48 }
 0x6b9   : > { %v10973_v30 = vpop.eup %10972  ;;  %10992 = vrcp.f32 %v7571_v59  ;;  %v7577_v16 = vadd.f32 1.0, %v10971_v11  ;;  %v14257_v40 = vadd.f32 %v6768_v34, %v14148_v20  ;;  %v6546_v7 = vpop.f32.mrb[168].mxu1  ;;  %v9727_v49 = vadd.f32 %v14197_v22, %v14139_v51 }
 0x6ba   : > { %v10975_v25 = vpop.eup %10974  ;;  %10994 = vrcp.f32 %v7575_v21  ;;  %v7576_v54 = vadd.f32 1.0, %v10973_v30  ;;  %v14266_v18 = vadd.f32 %v6546_v7, %v14139_v51  ;;  %v6772_v55 = vpop.f32.mrb[168].mxu0  ;;  %v9728_v33 = vadd.f32 %v14204_v47, %v14145_v63 }
 0x6bb   : > { %v10977_v28 = vpop.eup %10976  ;;  %10996 = vrcp.f32 %v7577_v16  ;;  %v7578_v36 = vadd.f32 1.0, %v10975_v25  ;;  %v6548_v53 = vpop.f32.mrb[169].mxu1  ;;  %v14269_v39 = vadd.f32 %v6772_v55, %v14142_v32  ;;  %v9085_v16 = vmul.f32 -1.442695, %v9726_v37 }
 0x6bc   : > { %v10979_v42 = vpop.eup %10978  ;;  %10998 = vrcp.f32 %v7576_v54  ;;  %v7582_v27 = vadd.f32 1.0, %v10977_v28  ;;  %v14272_v57 = vadd.f32 %v6548_v53, %v14145_v63  ;;  %v6774_v10 = vpop.f32.mrb[169].mxu0  ;;  %v9087_v25 = vmul.f32 -1.442695, %v9758_v6 }
 0x6bd   : > { %v10981_v1 = vpop.eup %10980  ;;  %11000 = vrcp.f32 %v7578_v36  ;;  %v7584_v14 = vadd.f32 1.0, %v10979_v42  ;;  %v6550_v4 = vpop.f32.mrb[170].mxu1  ;;  %v14277_v8 = vadd.f32 %v6774_v10, %v14148_v20  ;;  %v9759_v36 = vadd.f32 %v14202_v5, %v14142_v32 }
 0x6be   : > { %v10983_v15 = vpop.eup %10982  ;;  %11002 = vrcp.f32 %v7582_v27  ;;  %v7583_v62 = vadd.f32 1.0, %v10981_v1  ;;  %v6776_v56 = vpop.f32.mrb[170].mxu0  ;;  %v14282_v59 = vadd.f32 %v6550_v4, %v14139_v51  ;;  %v9760_v27 = vadd.f32 %v14208_v23, %v14148_v20 }
 0x6bf   : > { %v6552_v50 = vpop.f32.mrb[171].mxu1  ;;  %v10985_v60 = vpop.eup %10984  ;;  %11004 = vrcp.f32 %v7584_v14  ;;  %v7585_v9 = vadd.f32 1.0, %v10983_v15  ;;  %v14285_v11 = vadd.f32 %v6776_v56, %v14142_v32  ;;  %v9091_v5 = vmul.f32 -1.442695, %v9727_v49 }
 0x6c0   : > { %v6778_v45 = vpop.f32.mrb[171].mxu0  ;;  %v10987_v46 = vpop.eup %10986  ;;  %11006 = vrcp.f32 %v7583_v62  ;;  %v7589_v17 = vadd.f32 1.0, %v10985_v60  ;;  %v14288_v21 = vadd.f32 %v6552_v50, %v14145_v63  ;;  %v9729_v23 = vadd.f32 %v14210_v0, %v14139_v51 }
 0x6c1   : > { %v10989_v26 = vpop.eup %10988  ;;  %11008 = vrcp.f32 %v7585_v9  ;;  %v7591_v34 = vadd.f32 1.0, %v10987_v46  ;;  %v14291_v54 = vadd.f32 %v6778_v45, %v14148_v20  ;;  %v6556_v48 = vpop.f32.mrb[172].mxu1  ;;  %v9093_v50 = vmul.f32 -1.442695, %v9759_v36 }
 0x6c2   : > { %v10991_v30 = vpop.eup %10990  ;;  %11010 = vrcp.f32 %v7589_v17  ;;  %v14302_v37 = vadd.f32 %v6556_v48, %v14139_v51  ;;  %v6558_v55 = vpop.f32.mrb[173].mxu1  ;;  %v9092_v60 = vmul.f32 -1.442695, %v9728_v33  ;;  %v9094_v0 = vmul.f32 -1.442695, %v9760_v27 }
 0x6c3   : > { %v10993_v22 = vpop.eup %10992  ;;  %v9225_v28 = vpack.c.bf16 %v10991_v30, %v14223_v52  ;;  %11012 = vrcp.f32 %v7591_v34  ;;  %v6782_v52 = vpop.f32.mrb[172].mxu0  ;;  %v14310_v1 = vadd.f32 %v6558_v55, %v14145_v63  ;;  %v9730_v46 = vadd.f32 %v14213_v13, %v14145_v63 }
 0x6c4   : > { %v10995_v7 = vpop.eup %10994  ;;  %v9226_v42 = vpack.c.bf16 %v10993_v22, %v10989_v26  ;;  %11014 = vpow2.f32 %v14243_v3  ;;  %v14307_v47 = vadd.f32 %v6782_v52, %v14142_v32  ;;  %v6784_v3 = vpop.f32.mrb[173].mxu0  ;;  %v9098_v34 = vmul.f32 -1.442695, %v9729_v23 }
 0x6c5   : > { %v10997_v53 = vpop.eup %10996  ;;  %8248 = vst [vmem:[%s14191_s30 + $0x54] sm:$0xff] %v9225_v28  ;;  %11016 = vpow2.f32 %v14254_v58  ;;  %v6560_v14 = vpop.f32.mrb[174].mxu1  ;;  %v14316_v4 = vadd.f32 %v6784_v3, %v14148_v20 }
 0x6c6   : > { %v10999_v10 = vpop.eup %10998  ;;  %8249 = vst [vmem:[%s14191_s30 + $0x5c] sm:$0xff] %v9226_v42  ;;  %11018 = vpow2.f32 %v9084_v44  ;;  %v14319_v58 = vadd.f32 %v6560_v14, %v14139_v51  ;;  %v6786_v15 = vpop.f32.mrb[174].mxu0 }
 0x6c7   : > { %v6562_v62 = vpop.f32.mrb[175].mxu1  ;;  %v11001_v6 = vpop.eup %11000  ;;  %v9229_v56 = vpack.c.bf16 %v10999_v10, %v10995_v7  ;;  %11020 = vpow2.f32 %v9086_v19  ;;  %v14325_v51 = vadd.f32 %v6786_v15, %v14142_v32 }
 0x6c8   : > { %v6788_v9 = vpop.f32.mrb[175].mxu0  ;;  %v11003_v44 = vpop.eup %11002  ;;  %v9230_v45 = vpack.c.bf16 %v11001_v6, %v10997_v53  ;;  %11022 = vpow2.f32 %v9085_v16  ;;  %v14328_v49 = vadd.f32 %v6562_v62, %v14145_v63  ;;  %v9100_v16 = vmul.f32 -1.442695, %v14217_v41 }
 0x6c9   : > { %v11005_v17 = vpop.eup %11004  ;;  %8252 = vst [vmem:[%s14191_s30 + $0x70] sm:$0xff] %v9229_v56  ;;  %11024 = vpow2.f32 %v9087_v25  ;;  %v14331_v19 = vadd.f32 %v6788_v9, %v14148_v20  ;;  %v9099_v63 = vmul.f32 -1.442695, %v9730_v46 }
 0x6ca   : > { %v11007_v26 = vpop.eup %11006  ;;  %8253 = vst [vmem:[%s14191_s30 + $0x78] sm:$0xff] %v9230_v45  ;;  %11026 = vpow2.f32 %v9091_v5  ;;  %v9437_v22 = vpop.f32.mrb[176].mxu0 }
 0x6cb   : > { %v11009_v30 = vpop.eup %11008  ;;  %v9233_v13 = vpack.c.bf16 %v11007_v26, %v11003_v44  ;;  %11028 = vpow2.f32 %v9093_v50  ;;  %v9438_v20 = vpop.f32.mrb[177].mxu0 }
 0x6cc   : > { %v14335_v25 = vpop.eup %11010  ;;  %v9234_v32 = vpack.c.bf16 %v11009_v30, %v11005_v17  ;;  %11030 = vpow2.f32 %v9092_v60  ;;  %v14341_v33 = vadd.f32 %v9438_v20, %v9437_v22  ;;  %v9440_v48 = vpop.f32.mrb[178].mxu0  ;;  %v9101_v20 = vmul.f32 -1.442695, %v14221_v2 }
 0x6cd   : > { %v14337_v28 = vpop.eup %11012  ;;  %8256 = vst [vmem:[%s14191_s30 + $0x8c] sm:$0xff] %v9233_v13  ;;  %11032 = vpow2.f32 %v9094_v0  ;;  %v9441_v41 = vpop.f32.mrb[179].mxu0  ;;  %v9106_v2 = vmul.f32 -1.442695, %v14236_v24  ;;  %v9114_v24 = vmul.f32 -1.442695, %v14249_v12 }
 0x6ce   : > { %v11015_v36 = vpop.eup %11014  ;;  %8257 = vst [vmem:[%s14191_s30 + $0x94] sm:$0xff] %v9234_v32  ;;  %11034 = vpow2.f32 %v9098_v34  ;;  %v14343_v55 = vadd.f32 %v9441_v41, %v9440_v48 }
 0x6cf   : > { %v11017_v7 = vpop.eup %11016  ;;  %v7590_v42 = vadd.f32 1.0, %v11015_v36  ;;  %11036 = vpow2.f32 %v9100_v16 }
 0x6d0   : > { %v11019_v27 = vpop.eup %11018  ;;  %v7592_v52 = vadd.f32 1.0, %v11017_v7  ;;  %11038 = vpow2.f32 %v9099_v63  ;;  %v9105_v7 = vmul.f32 -1.442695, %v14229_v43  ;;  %v9108_v43 = vmul.f32 -1.442695, %v14241_v38 }
 0x6d1   : > { %v11021_v53 = vpop.eup %11020  ;;  %11040 = vrcp.f32 %v7590_v42  ;;  %v7596_v5 = vadd.f32 1.0, %v11019_v27  ;;  %v9107_v27 = vmul.f32 -1.442695, %v14233_v29  ;;  %v9112_v29 = vmul.f32 -1.442695, %v14246_v31 }
 0x6d2   : > { %v11023_v3 = vpop.eup %11022  ;;  %11042 = vrcp.f32 %v7592_v52  ;;  %v7598_v14 = vadd.f32 1.0, %v11021_v53  ;;  %v9443_v6 = vpop.f32.mrb[180].mxu0 }
 0x6d3   : > { %v11025_v10 = vpop.eup %11024  ;;  %11044 = vrcp.f32 %v7596_v5  ;;  %v7597_v23 = vadd.f32 1.0, %v11023_v3  ;;  %v9444_v60 = vpop.f32.mrb[181].mxu0 }
 0x6d4   : > { %v11027_v15 = vpop.eup %11026  ;;  %11046 = vrcp.f32 %v7598_v14  ;;  %v7599_v62 = vadd.f32 1.0, %v11025_v10  ;;  %v14345_v45 = vadd.f32 %v9444_v60, %v9443_v6  ;;  %v9446_v0 = vpop.f32.mrb[182].mxu0 }
 0x6d5   : > { %v11029_v56 = vpop.eup %11028  ;;  %11048 = vrcp.f32 %v7597_v23  ;;  %v7603_v50 = vadd.f32 1.0, %v11027_v15  ;;  %v9447_v26 = vpop.f32.mrb[183].mxu0 }
 0x6d6   : > { %v11031_v9 = vpop.eup %11030  ;;  %11050 = vrcp.f32 %v7599_v62  ;;  %v7605_v44 = vadd.f32 1.0, %v11029_v56  ;;  %v14347_v13 = vadd.f32 %v9447_v26, %v9446_v0 }
 0x6d7   : > { %v11033_v46 = vpop.eup %11032  ;;  %11052 = vrcp.f32 %v7603_v50  ;;  %v7604_v17 = vadd.f32 1.0, %v11031_v9  ;;  %v9113_v50 = vmul.f32 -1.442695, %v14252_v61  ;;  %v9115_v9 = vmul.f32 -1.442695, %v14257_v40 }
 0x6d8   : > { %v11035_v34 = vpop.eup %11034  ;;  %11054 = vrcp.f32 %v7605_v44  ;;  %v7606_v30 = vadd.f32 1.0, %v11033_v46  ;;  %v9119_v44 = vmul.f32 -1.442695, %v14266_v18  ;;  %v9121_v46 = vmul.f32 -1.442695, %v14269_v39 }
 0x6d9   : > { %v11037_v16 = vpop.eup %11036  ;;  %11056 = vrcp.f32 %v7604_v17  ;;  %v7610_v32 = vadd.f32 1.0, %v11035_v34  ;;  %v9120_v34 = vmul.f32 -1.442695, %v14272_v57  ;;  %v9122_v18 = vmul.f32 -1.442695, %v14277_v8 }
 0x6da   : > { %v11039_v63 = vpop.eup %11038  ;;  %11058 = vrcp.f32 %v7606_v30  ;;  %v7612_v22 = vadd.f32 1.0, %v11037_v16  ;;  %v9449_v52 = vpop.f32.mrb[184].mxu0 }
 0x6db   : > { %v11041_v36 = vpop.eup %11040  ;;  %11060 = vrcp.f32 %v7610_v32  ;;  %v7611_v48 = vadd.f32 1.0, %v11039_v63  ;;  %v9450_v3 = vpop.f32.mrb[185].mxu0 }
 0x6dc   : > { %v11043_v42 = vpop.eup %11042  ;;  %v9237_v41 = vpack.c.bf16 %v11041_v36, %v14335_v25  ;;  %11062 = vrcp.f32 %v7612_v22  ;;  %v14357_v10 = vadd.f32 %v9450_v3, %v9449_v52  ;;  %v9452_v25 = vpop.f32.mrb[186].mxu0 }
 0x6dd   : > { %v11045_v53 = vpop.eup %11044  ;;  %v9238_v5 = vpack.c.bf16 %v11043_v42, %v14337_v28  ;;  %11064 = vrcp.f32 %v7611_v48  ;;  %v9453_v28 = vpop.f32.mrb[187].mxu0 }
 0x6de   : > { %v11047_v14 = vpop.eup %11046  ;;  %8260 = vst [vmem:[%s14191_s30 + $0xa8] sm:$0xff] %v9237_v41  ;;  %11066 = vpow2.f32 %v9101_v20  ;;  %v14362_v6 = vadd.f32 %v9453_v28, %v9452_v25 }
 0x6df   : > { %v11049_v23 = vpop.eup %11048  ;;  %8261 = vst [vmem:[%s14191_s30 + $0xb0] sm:$0xff] %v9238_v5  ;;  %11068 = vpow2.f32 %v9105_v7 }
 0x6e0   : > { %v11051_v15 = vpop.eup %11050  ;;  %v9241_v62 = vpack.c.bf16 %v11049_v23, %v11045_v53  ;;  %11070 = vpow2.f32 %v9107_v27 }
 0x6e1   : > { %v11053_v56 = vpop.eup %11052  ;;  %v9242_v38 = vpack.c.bf16 %v11051_v15, %v11047_v14  ;;  %11072 = vpow2.f32 %v9106_v2 }
 0x6e2   : > { %v11055_v60 = vpop.eup %11054  ;;  %8264 = vst [vmem:[%s14191_s30 + $0xc4] sm:$0xff] %v9241_v62  ;;  %11074 = vpow2.f32 %v9108_v43  ;;  %v9455_v17 = vpop.f32.mrb[188].mxu0 }
 0x6e3   : > { %v11057_v31 = vpop.eup %11056  ;;  %8265 = vst [vmem:[%s14191_s30 + $0xcc] sm:$0xff] %v9242_v38  ;;  %11076 = vpow2.f32 %v9112_v29  ;;  %v9456_v30 = vpop.f32.mrb[189].mxu0 }
 0x6e4   : > { %v11059_v0 = vpop.eup %11058  ;;  %v9245_v12 = vpack.c.bf16 %v11057_v31, %v11053_v56  ;;  %11078 = vpow2.f32 %v9114_v24  ;;  %v14375_v16 = vadd.f32 %v9456_v30, %v9455_v17  ;;  %v9458_v32 = vpop.f32.mrb[190].mxu0 }
 0x6e5   : > { %v11061_v26 = vpop.eup %11060  ;;  %v9246_v61 = vpack.c.bf16 %v11059_v0, %v11055_v60  ;;  %11080 = vpow2.f32 %v9113_v50  ;;  %v9459_v39 = vpop.f32.mrb[191].mxu0 }
 0x6e6   : > { %v14371_v40 = vpop.eup %11062  ;;  %8268 = vst [vmem:[%s14191_s30 + $0xe0] sm:$0xff] %v9245_v12  ;;  %11082 = vpow2.f32 %v9115_v9  ;;  %v14378_v36 = vadd.f32 %v9459_v39, %v9458_v32 }
 0x6e7   : > { %v11065_v63 = vpop.eup %11064  ;;  %8269 = vst [vmem:[%s14191_s30 + $0xe8] sm:$0xff] %v9246_v61  ;;  %11084 = vpow2.f32 %v9119_v44 }
 0x6e8   : > { %v11067_v22 = vpop.eup %11066  ;;  %v9249_v20 = vpack.c.bf16 %v11065_v63, %v11061_v26  ;;  %11086 = vpow2.f32 %v9121_v46  ;;  %v9126_v46 = vmul.f32 -1.442695, %v14282_v59  ;;  %v9127_v63 = vmul.f32 -1.442695, %v14288_v21 }
 0x6e9   : > { %v11069_v57 = vpop.eup %11068  ;;  %v7613_v48 = vadd.f32 1.0, %v11067_v22  ;;  %11088 = vpow2.f32 %v9120_v34  ;;  %v9128_v34 = vmul.f32 -1.442695, %v14285_v11  ;;  %v9129_v59 = vmul.f32 -1.442695, %v14291_v54 }
 0x6ea   : > { %v11071_v7 = vpop.eup %11070  ;;  %8272 = vst [vmem:[%s14191_s30 + $0xfc] sm:$0xff] %v9249_v20  ;;  %v7617_v42 = vadd.f32 1.0, %v11069_v57  ;;  %11090 = vpow2.f32 %v9122_v18  ;;  %v9461_v53 = vpop.f32.mrb[192].mxu0  ;;  %v9133_v11 = vmul.f32 -1.442695, %v14302_v37 }
 0x6eb   : > { %v11073_v8 = vpop.eup %11072  ;;  %11092 = vrcp.f32 %v7613_v48  ;;  %v7619_v41 = vadd.f32 1.0, %v11071_v7  ;;  %v9462_v3 = vpop.f32.mrb[193].mxu0  ;;  %v9135_v21 = vmul.f32 -1.442695, %v14307_v47  ;;  %v9134_v54 = vmul.f32 -1.442695, %v14310_v1 }
 0x6ec   : > { %v11075_v27 = vpop.eup %11074  ;;  %11094 = vrcp.f32 %v7617_v42  ;;  %v7618_v52 = vadd.f32 1.0, %v11073_v8  ;;  %v14381_v25 = vadd.f32 %v9462_v3, %v9461_v53  ;;  %v9464_v23 = vpop.f32.mrb[194].mxu0  ;;  %v9140_v37 = vmul.f32 -1.442695, %v14319_v58 }
 0x6ed   : > { %v11077_v5 = vpop.eup %11076  ;;  %11096 = vrcp.f32 %v7619_v41  ;;  %v7620_v2 = vadd.f32 1.0, %v11075_v27  ;;  %v9465_v15 = vpop.f32.mrb[195].mxu0  ;;  %v9142_v47 = vmul.f32 -1.442695, %v14325_v51  ;;  %v5178_v1 = vsub.s32 6, %v12327_v35 }
 0x6ee   : > { %v11079_v14 = vpop.eup %11078  ;;  %11098 = vrcp.f32 %v7618_v52  ;;  %v7624_v43 = vadd.f32 1.0, %v11077_v5  ;;  %v14383_v56 = vadd.f32 %v9465_v15, %v9464_v23  ;;  %v9136_v52 = vmul.f32 -1.442695, %v14316_v4 }
 0x6ef   : > { %v11081_v29 = vpop.eup %11080  ;;  %11100 = vrcp.f32 %v7620_v2  ;;  %v7626_v28 = vadd.f32 1.0, %v11079_v14  ;;  %v9141_v4 = vmul.f32 -1.442695, %v14328_v49  ;;  %v9143_v58 = vmul.f32 -1.442695, %v14331_v19 }
 0x6f0   : > { %v11083_v62 = vpop.eup %11082  ;;  %11102 = vrcp.f32 %v7624_v43  ;;  %v7625_v24 = vadd.f32 1.0, %v11081_v29 }
 0x6f1   : > { %v11085_v38 = vpop.eup %11084  ;;  %11104 = vrcp.f32 %v7626_v28  ;;  %v7627_v50 = vadd.f32 1.0, %v11083_v62 }
 0x6f2   : > { %v11087_v60 = vpop.eup %11086  ;;  %11106 = vrcp.f32 %v7625_v24  ;;  %v7631_v9 = vadd.f32 1.0, %v11085_v38  ;;  %v9467_v17 = vpop.f32.mrb[196].mxu0 }
 0x6f3   : > { %v11089_v31 = vpop.eup %11088  ;;  %11108 = vrcp.f32 %v7627_v50  ;;  %v7633_v44 = vadd.f32 1.0, %v11087_v60  ;;  %v9468_v30 = vpop.f32.mrb[197].mxu0 }
 0x6f4   : > { %v11091_v0 = vpop.eup %11090  ;;  %11110 = vrcp.f32 %v7631_v9  ;;  %v7632_v12 = vadd.f32 1.0, %v11089_v31  ;;  %v14389_v39 = vadd.f32 %v9468_v30, %v9467_v17  ;;  %v9470_v22 = vpop.f32.mrb[198].mxu0  ;;  %v11366_v9 = vld [vmem:[%s14623_s13] sm:$0x7f]  ;;  %v5174_v30 = vsub.s32 5, %v12327_v35 }
 0x6f5   : > { %v11093_v26 = vpop.eup %11092  ;;  %11112 = vrcp.f32 %v7633_v44  ;;  %v7634_v61 = vadd.f32 1.0, %v11091_v0  ;;  %v9471_v57 = vpop.f32.mrb[199].mxu0  ;;  %v14415_v31 = vrot.slane %v11366_v9, %v5178_v1 }
 0x6f6   : > { %v11095_v18 = vpop.eup %11094  ;;  %v9250_v32 = vpack.c.bf16 %v11093_v26, %v14371_v40  ;;  %11114 = vrcp.f32 %v7632_v12  ;;  %v14394_v7 = vadd.f32 %v9471_v57, %v9470_v22 }
 0x6f7   : > { %v11097_v20 = vpop.eup %11096  ;;  %11116 = vrcp.f32 %v7634_v61 }
 0x6f8   : > { %v11099_v48 = vpop.eup %11098  ;;  %8273 = vst [vmem:[%s14191_s30 + $0x104] sm:$0xff] %v9250_v32  ;;  %11118 = vpow2.f32 %v9126_v46 }
 0x6f9   : > { %v11101_v40 = vpop.eup %11100  ;;  %v9253_v42 = vpack.c.bf16 %v11099_v48, %v11095_v18  ;;  %11120 = vpow2.f32 %v9128_v34  ;;  %v5170_v34 = vsub.s32 4, %v12327_v35  ;;  %v7055_v48 = vadd.f32 %v14343_v55, %v14415_v31 }
 0x6fa   : > { %v11103_v8 = vpop.eup %11102  ;;  %v9254_v41 = vpack.c.bf16 %v11101_v40, %v11097_v20  ;;  %11122 = vpow2.f32 %v9127_v63  ;;  %v9473_v5 = vpop.f32.mrb[200].mxu0  ;;  %v7052_v63 = vadd.f32 %v14341_v33, %v14415_v31 }
 0x6fb   : > { %v11105_v27 = vpop.eup %11104  ;;  %8276 = vst [vmem:[%s14191_s30 + $0x118] sm:$0xff] %v9253_v42  ;;  %11124 = vpow2.f32 %v9129_v59  ;;  %v9474_v14 = vpop.f32.mrb[201].mxu0 }
 0x6fc   : > { %v11107_v53 = vpop.eup %11106  ;;  %8277 = vst [vmem:[%s14191_s30 + $0x120] sm:$0xff] %v9254_v41  ;;  %11126 = vpow2.f32 %v9133_v11  ;;  %v14405_v29 = vadd.f32 %v9474_v14, %v9473_v5  ;;  %v9476_v28 = vpop.f32.mrb[202].mxu0 }
 0x6fd   : > { %v11109_v2 = vpop.eup %11108  ;;  %v9257_v3 = vpack.c.bf16 %v11107_v53, %v11103_v8  ;;  %11128 = vpow2.f32 %v9135_v21  ;;  %v9477_v62 = vpop.f32.mrb[203].mxu0  ;;  %v14427_v53 = vrot.slane %v11366_v9, %v5174_v30 }
 0x6fe   : > { %v11111_v43 = vpop.eup %11110  ;;  %v9258_v23 = vpack.c.bf16 %v11109_v2, %v11105_v27  ;;  %11130 = vpow2.f32 %v9134_v54  ;;  %v14410_v51 = vadd.f32 %v9477_v62, %v9476_v28  ;;  %v14425_v54 = vrot.slane %v11366_v9, %v5170_v34 }
 0x6ff   : > { %v11113_v15 = vpop.eup %11112  ;;  %8280 = vst [vmem:[%s14191_s30 + $0x134] sm:$0xff] %v9257_v3  ;;  %11132 = vpow2.f32 %v9136_v52  ;;  %v7060_v3 = vadd.f32 %v14345_v45, %v14415_v31 }
 0x700   : > { %v11115_v24 = vpop.eup %11114  ;;  %8281 = vst [vmem:[%s14191_s30 + $0x13c] sm:$0xff] %v9258_v23  ;;  %11134 = vpow2.f32 %v9140_v37 }
 0x701   : > { %v11117_v38 = vpop.eup %11116  ;;  %v9261_v50 = vpack.c.bf16 %v11115_v24, %v11111_v43  ;;  %11136 = vpow2.f32 %v9142_v47 }
 0x702   : > { %v11119_v49 = vpop.eup %11118  ;;  %v9262_v60 = vpack.c.bf16 %v11117_v38, %v11113_v15  ;;  %11138 = vpow2.f32 %v9141_v4  ;;  %v9501_v46 = vpop.f32.mrb[204].mxu0 }
 0x703   : > { %v11121_v19 = vpop.eup %11120  ;;  %8284 = vst [vmem:[%s14191_s30 + $0x150] sm:$0xff] %v9261_v50  ;;  %v7638_v44 = vadd.f32 1.0, %v11119_v49  ;;  %11140 = vpow2.f32 %v9143_v58  ;;  %v9502_v61 = vpop.f32.mrb[205].mxu0 }
 0x704   : > { %v11123_v0 = vpop.eup %11122  ;;  %8285 = vst [vmem:[%s14191_s30 + $0x158] sm:$0xff] %v9262_v60  ;;  %v7640_v12 = vadd.f32 1.0, %v11121_v19  ;;  %v9503_v22 = vadd.f32 %v9502_v61, %v9501_v46  ;;  %v9504_v20 = vpop.f32.mrb[206].mxu0  ;;  %v7063_v61 = vadd.f32 %v14347_v13, %v14415_v31  ;;  %v7068_v13 = vadd.f32 %v14357_v10, %v14415_v31 }
 0x705   : > { %v11125_v17 = vpop.eup %11124  ;;  %11142 = vrcp.f32 %v7638_v44  ;;  %v7639_v26 = vadd.f32 1.0, %v11123_v0  ;;  %v9505_v11 = vpop.f32.mrb[207].mxu0 }
 0x706   : > { %v11127_v18 = vpop.eup %11126  ;;  %11144 = vrcp.f32 %v7640_v12  ;;  %v7641_v32 = vadd.f32 1.0, %v11125_v17  ;;  %v7149_v21 = vadd.f32 %v9503_v22, %v7052_v63  ;;  %v9506_v35 = vadd.f32 %v9505_v11, %v9504_v20 }
 0x707   : > { %v11129_v59 = vpop.eup %11128  ;;  %11146 = vrcp.f32 %v7639_v26  ;;  %v7645_v57 = vadd.f32 1.0, %v11127_v18 }
 0x708   : > { %v11131_v40 = vpop.eup %11130  ;;  %11148 = vrcp.f32 %v7641_v32  ;;  %v7647_v42 = vadd.f32 1.0, %v11129_v59  ;;  %v7152_v52 = vadd.f32 %v9506_v35, %v7055_v48  ;;  %v9041_v47 = vmul.f32 -1.442695, %v7149_v21 }
 0x709   : > { %v11133_v8 = vpop.eup %11132  ;;  %11150 = vrcp.f32 %v7645_v57  ;;  %v7646_v41 = vadd.f32 1.0, %v11131_v40 }
 0x70a   : > { %v11135_v33 = vpop.eup %11134  ;;  %11152 = vrcp.f32 %v7647_v42  ;;  %v7648_v27 = vadd.f32 1.0, %v11133_v8  ;;  %v6938_v1 = vpop.f32.mrb[176].mxu1  ;;  %v9048_v4 = vmul.f32 -1.442695, %v7152_v52 }
 0x70b   : > { %v11137_v37 = vpop.eup %11136  ;;  %11154 = vrcp.f32 %v7646_v41  ;;  %v7652_v55 = vadd.f32 1.0, %v11135_v33  ;;  %v9507_v14 = vpop.f32.mrb[208].mxu0  ;;  %v9775_v28 = vadd.f32 %v6938_v1, %v14425_v54 }
 0x70c   : > { %v11139_v5 = vpop.eup %11138  ;;  %11156 = vrcp.f32 %v7648_v27  ;;  %v7654_v2 = vadd.f32 1.0, %v11137_v37  ;;  %v6940_v15 = vpop.f32.mrb[177].mxu1 }
 0x70d   : > { %v11141_v43 = vpop.eup %11140  ;;  %11158 = vrcp.f32 %v7652_v55  ;;  %v7653_v23 = vadd.f32 1.0, %v11139_v5  ;;  %v9508_v58 = vpop.f32.mrb[209].mxu0  ;;  %v9776_v24 = vadd.f32 %v6940_v15, %v14427_v53  ;;  %v9039_v45 = vmul.f32 -1.442695, %v9775_v28 }
 0x70e   : > { %11160 = vrcp.f32 %v7654_v2  ;;  %v7655_v62 = vadd.f32 1.0, %v11141_v43  ;;  %v9509_v38 = vadd.f32 %v9508_v58, %v9507_v14  ;;  %v6942_v50 = vpop.f32.mrb[178].mxu1  ;;  %v9510_v49 = vpop.f32.mrb[210].mxu0  ;;  %v7071_v58 = vadd.f32 %v14362_v6, %v14415_v31 }
 0x70f   : > { %v11143_v60 = vpop.eup %11142  ;;  %11162 = vrcp.f32 %v7653_v23  ;;  %v9777_v9 = vadd.f32 %v6942_v50, %v14425_v54  ;;  %v6944_v19 = vpop.f32.mrb[179].mxu1  ;;  %v9040_v12 = vmul.f32 -1.442695, %v9776_v24 }
 0x710   : > { %v9511_v44 = vpop.f32.mrb[211].mxu0  ;;  %v11145_v0 = vpop.eup %11144  ;;  %11164 = vrcp.f32 %v7655_v62  ;;  %v7157_v46 = vadd.f32 %v9509_v38, %v7060_v3  ;;  %v9778_v17 = vadd.f32 %v6944_v19, %v14427_v53 }
 0x711   : > { %v11147_v26 = vpop.eup %11146  ;;  %11166 = vpow2.f32 %v9041_v47  ;;  %v9512_v34 = vadd.f32 %v9511_v44, %v9510_v49  ;;  %v9046_v63 = vmul.f32 -1.442695, %v9777_v9 }
 0x712   : > { %v11149_v30 = vpop.eup %11148  ;;  %v9265_v18 = vpack.c.bf16 %v11147_v26, %v11143_v60  ;;  %11168 = vpow2.f32 %v9048_v4  ;;  %v9055_v32 = vmul.f32 -1.442695, %v7157_v46  ;;  %v9047_v59 = vmul.f32 -1.442695, %v9778_v17  ;;  %v6948_v11 = vpop.f32.mrb[180].mxu1 }
 0x713   : > { %v11151_v22 = vpop.eup %11150  ;;  %v9266_v20 = vpack.c.bf16 %v11149_v30, %v11145_v0  ;;  %11170 = vpow2.f32 %v9039_v45  ;;  %v7160_v57 = vadd.f32 %v9512_v34, %v7063_v61  ;;  %v9513_v40 = vpop.f32.mrb[212].mxu0  ;;  %v9779_v35 = vadd.f32 %v6948_v11, %v14425_v54 }
 0x714   : > { %v11153_v48 = vpop.eup %11152  ;;  %8288 = vst [vmem:[%s14191_s30 + $0x16c] sm:$0xff] %v9265_v18  ;;  %11172 = vpow2.f32 %v9040_v12  ;;  %v6950_v8 = vpop.f32.mrb[181].mxu1  ;;  %v7076_v30 = vadd.f32 %v14375_v16, %v14415_v31 }
 0x715   : > { %v11155_v42 = vpop.eup %11154  ;;  %8289 = vst [vmem:[%s14191_s30 + $0x174] sm:$0xff] %v9266_v20  ;;  %11174 = vpow2.f32 %v9055_v32  ;;  %v9062_v21 = vmul.f32 -1.442695, %v7160_v57  ;;  %v9514_v41 = vpop.f32.mrb[213].mxu0  ;;  %v9780_v52 = vadd.f32 %v6950_v8, %v14427_v53  ;;  %v9053_v10 = vmul.f32 -1.442695, %v9779_v35 }
 0x716   : > { %v11157_v33 = vpop.eup %11156  ;;  %v9269_v27 = vpack.c.bf16 %v11155_v42, %v11151_v22  ;;  %11176 = vpow2.f32 %v9046_v63  ;;  %v9515_v37 = vadd.f32 %v9514_v41, %v9513_v40  ;;  %v6952_v55 = vpop.f32.mrb[182].mxu1 }
 0x717   : > { %v9516_v5 = vpop.f32.mrb[214].mxu0  ;;  %v11159_v2 = vpop.eup %11158  ;;  %v9270_v3 = vpack.c.bf16 %v11157_v33, %v11153_v48  ;;  %11178 = vpow2.f32 %v9047_v59  ;;  %v9781_v47 = vadd.f32 %v6952_v55, %v14425_v54  ;;  %v9054_v23 = vmul.f32 -1.442695, %v9780_v52 }
 0x718   : > { %v6954_v1 = vpop.f32.mrb[183].mxu1  ;;  %v9517_v14 = vpop.f32.mrb[215].mxu0  ;;  %8292 = vst [vmem:[%s14191_s30 + $0x188] sm:$0xff] %v9269_v27  ;;  %11180 = vpow2.f32 %v9062_v21  ;;  %v7165_v4 = vadd.f32 %v9515_v37, %v7068_v13  ;;  %v7079_v21 = vadd.f32 %v14378_v36, %v14415_v31 }
 0x719   : > { %v11161_v43 = vpop.eup %11160  ;;  %v9782_v28 = vadd.f32 %v6954_v1, %v14427_v53  ;;  %8293 = vst [vmem:[%s14191_s30 + $0x190] sm:$0xff] %v9270_v3  ;;  %11182 = vpow2.f32 %v9053_v10  ;;  %v9060_v62 = vmul.f32 -1.442695, %v9781_v47  ;;  %v9518_v24 = vadd.f32 %v9517_v14, %v9516_v5 }
 0x71a   : > { %v11163_v15 = vpop.eup %11162  ;;  %11184 = vpow2.f32 %v9054_v23  ;;  %v9069_v49 = vmul.f32 -1.442695, %v7165_v4  ;;  %v6958_v12 = vpop.f32.mrb[184].mxu1  ;;  %v7084_v47 = vadd.f32 %v14381_v25, %v14415_v31 }
 0x71b   : > { %v11165_v38 = vpop.eup %11164  ;;  %v9273_v50 = vpack.c.bf16 %v11163_v15, %v11159_v2  ;;  %v9061_v60 = vmul.f32 -1.442695, %v9782_v28  ;;  %11186 = vpow2.f32 %v9060_v62  ;;  %v7168_v19 = vadd.f32 %v9518_v24, %v7071_v58  ;;  %v9519_v46 = vpop.f32.mrb[216].mxu0 }
 0x71c   : > { %v11167_v45 = vpop.eup %11166  ;;  %v9274_v9 = vpack.c.bf16 %v11165_v38, %v11161_v43  ;;  %11188 = vpow2.f32 %v9069_v49  ;;  %v6960_v26 = vpop.f32.mrb[185].mxu1  ;;  %v9783_v41 = vadd.f32 %v6958_v12, %v14425_v54  ;;  %v7087_v28 = vadd.f32 %v14383_v56, %v14415_v31 }
 0x71d   : > { %v11169_v44 = vpop.eup %11168  ;;  %8296 = vst [vmem:[%s14191_s30 + $0x1a4] sm:$0xff] %v9273_v50  ;;  %v7553_v0 = vadd.f32 1.0, %v11167_v45  ;;  %11190 = vpow2.f32 %v9061_v60  ;;  %v9520_v61 = vpop.f32.mrb[217].mxu0  ;;  %v9784_v5 = vadd.f32 %v6960_v26, %v14427_v53  ;;  %v9076_v14 = vmul.f32 -1.442695, %v7168_v19 }
 0x71e   : > { %v11171_v6 = vpop.eup %11170  ;;  %8297 = vst [vmem:[%s14191_s30 + $0x1ac] sm:$0xff] %v9274_v9  ;;  %v7560_v17 = vadd.f32 1.0, %v11169_v44  ;;  %v9521_v32 = vadd.f32 %v9520_v61, %v9519_v46  ;;  %v6962_v63 = vpop.f32.mrb[186].mxu1  ;;  %v9067_v58 = vmul.f32 -1.442695, %v9783_v41 }
 0x71f   : > { %v11173_v34 = vpop.eup %11172  ;;  %11192 = vrcp.f32 %v7553_v0  ;;  %v7551_v18 = vadd.f32 1.0, %v11171_v6  ;;  %v9522_v22 = vpop.f32.mrb[218].mxu0  ;;  %v9785_v49 = vadd.f32 %v6962_v63, %v14425_v54  ;;  %v9068_v44 = vmul.f32 -1.442695, %v9784_v5 }
 0x720   : > { %v11175_v20 = vpop.eup %11174  ;;  %11194 = vrcp.f32 %v7560_v17  ;;  %v7552_v59 = vadd.f32 1.0, %v11173_v34  ;;  %v6964_v57 = vpop.f32.mrb[187].mxu1  ;;  %v7173_v42 = vadd.f32 %v9521_v32, %v7076_v30 }
 0x721   : > { %v9523_v48 = vpop.f32.mrb[219].mxu0  ;;  %v11177_v11 = vpop.eup %11176  ;;  %11196 = vrcp.f32 %v7551_v18  ;;  %v7567_v40 = vadd.f32 1.0, %v11175_v20  ;;  %v9786_v56 = vadd.f32 %v6964_v57, %v14427_v53  ;;  %v7092_v18 = vadd.f32 %v14389_v39, %v14415_v31 }
 0x722   : > { %v11179_v13 = vpop.eup %11178  ;;  %11198 = vrcp.f32 %v7552_v59  ;;  %v7558_v16 = vadd.f32 1.0, %v11177_v11  ;;  %v9524_v33 = vadd.f32 %v9523_v48, %v9522_v22  ;;  %v6968_v3 = vpop.f32.mrb[188].mxu1  ;;  %v9083_v46 = vmul.f32 -1.442695, %v7173_v42 }
 0x723   : > { %v11181_v35 = vpop.eup %11180  ;;  %11200 = vrcp.f32 %v7567_v40  ;;  %v7559_v8 = vadd.f32 1.0, %v11179_v13  ;;  %v9525_v36 = vpop.f32.mrb[220].mxu0  ;;  %v9787_v61 = vadd.f32 %v6968_v3, %v14425_v54  ;;  %v9074_v32 = vmul.f32 -1.442695, %v9785_v49 }
 0x724   : > { %v11183_v27 = vpop.eup %11182  ;;  %11202 = vrcp.f32 %v7558_v16  ;;  %v7574_v52 = vadd.f32 1.0, %v11181_v35  ;;  %v7176_v2 = vadd.f32 %v9524_v33, %v7079_v21  ;;  %v6970_v43 = vpop.f32.mrb[189].mxu1  ;;  %v9075_v59 = vmul.f32 -1.442695, %v9786_v56 }
 0x725   : > { %v11185_v37 = vpop.eup %11184  ;;  %11204 = vrcp.f32 %v7559_v8  ;;  %v7565_v55 = vadd.f32 1.0, %v11183_v27  ;;  %v9526_v23 = vpop.f32.mrb[221].mxu0  ;;  %v9788_v63 = vadd.f32 %v6970_v43, %v14427_v53  ;;  %v9081_v8 = vmul.f32 -1.442695, %v9787_v61 }
 0x726   : > { %v11187_v10 = vpop.eup %11186  ;;  %11206 = vrcp.f32 %v7574_v52  ;;  %v7566_v1 = vadd.f32 1.0, %v11185_v37  ;;  %v6972_v62 = vpop.f32.mrb[190].mxu1  ;;  %v9527_v25 = vadd.f32 %v9526_v23, %v9525_v36  ;;  %v9090_v42 = vmul.f32 -1.442695, %v7176_v2 }
 0x727   : > { %v11189_v4 = vpop.eup %11188  ;;  %11208 = vrcp.f32 %v7565_v55  ;;  %v7572_v15 = vadd.f32 1.0, %v11187_v10  ;;  %v9528_v24 = vpop.f32.mrb[222].mxu0  ;;  %v9789_v13 = vadd.f32 %v6972_v62, %v14425_v54  ;;  %v9082_v5 = vmul.f32 -1.442695, %v9788_v63 }
 0x728   : > { %v11191_v38 = vpop.eup %11190  ;;  %11210 = vrcp.f32 %v7566_v1  ;;  %v7581_v50 = vadd.f32 1.0, %v11189_v4  ;;  %v6974_v60 = vpop.f32.mrb[191].mxu1  ;;  %v7181_v6 = vadd.f32 %v9527_v25, %v7084_v47  ;;  %v7095_v43 = vadd.f32 %v14394_v7, %v14415_v31 }
 0x729   : > { %v9529_v45 = vpop.f32.mrb[223].mxu0  ;;  %v11193_v9 = vpop.eup %11192  ;;  %11212 = vrcp.f32 %v7572_v15  ;;  %v7573_v19 = vadd.f32 1.0, %v11191_v38  ;;  %v9790_v41 = vadd.f32 %v6974_v60, %v14427_v53  ;;  %v9088_v23 = vmul.f32 -1.442695, %v9789_v13 }
 0x72a   : > { %v11195_v0 = vpop.eup %11194  ;;  %v9216_v12 = vpack.c.bf16 %v11193_v9, %v11193_v9  ;;  %11214 = vrcp.f32 %v7581_v50  ;;  %v9530_v34 = vadd.f32 %v9529_v45, %v9528_v24  ;;  %v14471_v48 = vpop.f32.mrb[192].mxu1  ;;  %v9097_v47 = vmul.f32 -1.442695, %v7181_v6 }
 0x72b   : > { %v11197_v17 = vpop.eup %11196  ;;  %v9220_v26 = vpack.c.bf16 %v11195_v0, %v11195_v0  ;;  %11216 = vrcp.f32 %v7573_v19  ;;  %v9531_v11 = vpop.f32.mrb[224].mxu0  ;;  %v7100_v56 = vadd.f32 %v14405_v29, %v14415_v31  ;;  %v7103_v63 = vadd.f32 %v14410_v51, %v14415_v31 }
 0x72c   : > { %v11199_v30 = vpop.eup %11198  ;;  %8239 = vst.msk [vmem:[%s14191_s30 + $0x18] sm:$0xf] %vm8238_vm4, %v9216_v12  ;;  %11218 = vpow2.f32 %v9076_v14  ;;  %v7184_v57 = vadd.f32 %v9530_v34, %v7087_v28  ;;  %v14474_v21 = vpop.f32.mrb[193].mxu1 }
 0x72d   : > { %v11201_v22 = vpop.eup %11200  ;;  %8243 = vst.msk [vmem:[%s14191_s30 + $0x34] sm:$0xf] %vm8238_vm4, %v9220_v26  ;;  %v9215_v20 = vpack.c.bf16 %v11199_v30, %v11197_v17  ;;  %11220 = vpow2.f32 %v9067_v58  ;;  %v9532_v16 = vpop.f32.mrb[225].mxu0  ;;  %v9089_v58 = vmul.f32 -1.442695, %v9790_v41 }
 0x72e   : > { %v11203_v40 = vpop.eup %11202  ;;  %v9224_v39 = vpack.c.bf16 %v11201_v22, %v11201_v22  ;;  %11222 = vpow2.f32 %v9068_v44  ;;  %v9533_v33 = vadd.f32 %v9532_v16, %v9531_v11  ;;  %v14478_v27 = vpop.f32.mrb[194].mxu1  ;;  %v9104_v24 = vmul.f32 -1.442695, %v7184_v57 }
 0x72f   : > { %v11205_v35 = vpop.eup %11204  ;;  %8237 = vst [vmem:[%s14191_s30 + $0x10] sm:$0xff] %v9215_v20  ;;  %11224 = vpow2.f32 %v9083_v46  ;;  %v9534_v52 = vpop.f32.mrb[226].mxu0  ;;  %v9791_v57 = vadd.f32 %v14471_v48, %v14425_v54 }
 0x730   : > { %v11207_v37 = vpop.eup %11206  ;;  %8247 = vst.msk [vmem:[%s14191_s30 + $0x50] sm:$0xf] %vm8238_vm4, %v9224_v39  ;;  %v9219_v55 = vpack.c.bf16 %v11205_v35, %v11203_v40  ;;  %11226 = vpow2.f32 %v9074_v32  ;;  %v14482_v2 = vpop.f32.mrb[195].mxu1  ;;  %v14484_v1 = vadd.f32 %v9533_v33, %v7092_v18  ;;  %v9792_v33 = vadd.f32 %v14474_v21, %v14427_v53 }
 0x731   : > { %v9535_v3 = vpop.f32.mrb[227].mxu0  ;;  %v11209_v36 = vpop.eup %11208  ;;  %v9228_v10 = vpack.c.bf16 %v11207_v37, %v11207_v37  ;;  %11228 = vpow2.f32 %v9075_v59  ;;  %v9793_v21 = vadd.f32 %v14478_v27, %v14425_v54 }
 0x732   : > { %v11211_v14 = vpop.eup %11210  ;;  %8242 = vst [vmem:[%s14191_s30 + $0x2c] sm:$0xff] %v9219_v55  ;;  %11230 = vpow2.f32 %v9090_v42  ;;  %v9536_v4 = vadd.f32 %v9535_v3, %v9534_v52  ;;  %v14494_v7 = vpop.f32.mrb[196].mxu1  ;;  %v9095_v3 = vmul.f32 -1.442695, %v9791_v57 }
 0x733   : > { %v11213_v28 = vpop.eup %11212  ;;  %8251 = vst.msk [vmem:[%s14191_s30 + $0x6c] sm:$0xf] %vm8238_vm4, %v9228_v10  ;;  %v9223_v15 = vpack.c.bf16 %v11211_v14, %v11209_v36  ;;  %11232 = vpow2.f32 %v9081_v8  ;;  %v9537_v25 = vpop.f32.mrb[228].mxu0 }
 0x734   : > { %v11215_v62 = vpop.eup %11214  ;;  %11234 = vpow2.f32 %v9082_v5  ;;  %v14491_v38 = vadd.f32 %v9536_v4, %v7095_v43  ;;  %v14496_v9 = vpop.f32.mrb[197].mxu1 }
 0x735   : > { %v11217_v50 = vpop.eup %11216  ;;  %8246 = vst [vmem:[%s14191_s30 + $0x48] sm:$0xff] %v9223_v15  ;;  %v9232_v49 = vpack.c.bf16 %v11215_v62, %v11215_v62  ;;  %11236 = vpow2.f32 %v9097_v47  ;;  %v9538_v19 = vpop.f32.mrb[229].mxu0  ;;  %v9794_v62 = vadd.f32 %v14482_v2, %v14427_v53  ;;  %v9111_v2 = vmul.f32 -1.442695, %v14484_v1 }
 0x736   : > { %v11219_v60 = vpop.eup %11218  ;;  %v9227_v45 = vpack.c.bf16 %v11217_v50, %v11213_v28  ;;  %11238 = vpow2.f32 %v9088_v23  ;;  %v9539_v12 = vadd.f32 %v9538_v19, %v9537_v25  ;;  %v14502_v46 = vpop.f32.mrb[198].mxu1  ;;  %v9096_v19 = vmul.f32 -1.442695, %v9792_v33 }
 0x737   : > { %v11221_v44 = vpop.eup %11220  ;;  %8255 = vst.msk [vmem:[%s14191_s30 + $0x88] sm:$0xf] %vm8238_vm4, %v9232_v49  ;;  %v7588_v0 = vadd.f32 1.0, %v11219_v60  ;;  %11240 = vpow2.f32 %v9089_v58  ;;  %v9540_v6 = vpop.f32.mrb[230].mxu0 }
 0x738   : > { %v11223_v17 = vpop.eup %11222  ;;  %8250 = vst [vmem:[%s14191_s30 + $0x64] sm:$0xff] %v9227_v45  ;;  %v7579_v26 = vadd.f32 1.0, %v11221_v44  ;;  %11242 = vpow2.f32 %v9104_v24  ;;  %v14505_v61 = vpop.f32.mrb[199].mxu1  ;;  %v14507_v32 = vadd.f32 %v9539_v12, %v7100_v56 }
 0x739   : > { %v9541_v34 = vpop.f32.mrb[231].mxu0  ;;  %v11225_v30 = vpop.eup %11224  ;;  %11244 = vrcp.f32 %v7588_v0  ;;  %v7580_v18 = vadd.f32 1.0, %v11223_v17  ;;  %v9795_v0 = vadd.f32 %v14494_v7, %v14425_v54  ;;  %v9103_v17 = vmul.f32 -1.442695, %v9794_v62 }
 0x73a   : > { %v11227_v29 = vpop.eup %11226  ;;  %11246 = vrcp.f32 %v7579_v26  ;;  %v7595_v22 = vadd.f32 1.0, %v11225_v30  ;;  %v9542_v11 = vadd.f32 %v9541_v34, %v9540_v6  ;;  %v6998_v35 = vpop.f32.mrb[200].mxu1  ;;  %v9102_v6 = vmul.f32 -1.442695, %v9793_v21 }
 0x73b   : > { %v11229_v20 = vpop.eup %11228  ;;  %11248 = vrcp.f32 %v7580_v18  ;;  %v7586_v59 = vadd.f32 1.0, %v11227_v29  ;;  %v9543_v8 = vpop.f32.mrb[232].mxu0  ;;  %v14518_v52 = vadd.f32 %v6998_v35, %v14425_v54  ;;  %v9796_v26 = vadd.f32 %v14496_v9, %v14427_v53 }
 0x73c   : > { %v11231_v40 = vpop.eup %11230  ;;  %11250 = vrcp.f32 %v7595_v22  ;;  %v7587_v39 = vadd.f32 1.0, %v11229_v20  ;;  %v14513_v16 = vadd.f32 %v9542_v11, %v7103_v63  ;;  %v7000_v48 = vpop.f32.mrb[201].mxu1  ;;  %v9118_v29 = vmul.f32 -1.442695, %v14491_v38 }
 0x73d   : > { %v11233_v42 = vpop.eup %11232  ;;  %11252 = vrcp.f32 %v7586_v59  ;;  %v7602_v13 = vadd.f32 1.0, %v11231_v40  ;;  %v9544_v37 = vpop.f32.mrb[233].mxu0  ;;  %v14521_v36 = vadd.f32 %v7000_v48, %v14427_v53  ;;  %v9797_v9 = vadd.f32 %v14502_v46, %v14425_v54 }
 0x73e   : > { %v11235_v51 = vpop.eup %11234  ;;  %11254 = vrcp.f32 %v7587_v39  ;;  %v7593_v41 = vadd.f32 1.0, %v11233_v42  ;;  %v7002_v10 = vpop.f32.mrb[202].mxu1  ;;  %v14525_v23 = vadd.f32 %v9544_v37, %v9543_v8  ;;  %v9109_v38 = vmul.f32 -1.442695, %v9795_v0 }
 0x73f   : > { %v11237_v55 = vpop.eup %11236  ;;  %11256 = vrcp.f32 %v7602_v13  ;;  %v7594_v5 = vadd.f32 1.0, %v11235_v51  ;;  %v9546_v47 = vpop.f32.mrb[234].mxu0  ;;  %v14530_v24 = vadd.f32 %v7002_v10, %v14425_v54  ;;  %v9798_v11 = vadd.f32 %v14505_v61, %v14427_v53 }
 0x740   : > { %v11239_v14 = vpop.eup %11238  ;;  %11258 = vrcp.f32 %v7593_v41  ;;  %v7609_v43 = vadd.f32 1.0, %v11237_v55  ;;  %v7004_v4 = vpop.f32.mrb[203].mxu1  ;;  %v9110_v13 = vmul.f32 -1.442695, %v9796_v26  ;;  %v9125_v41 = vmul.f32 -1.442695, %v14507_v32 }
 0x741   : > { %v9547_v28 = vpop.f32.mrb[235].mxu0  ;;  %v11241_v15 = vpop.eup %11240  ;;  %11260 = vrcp.f32 %v7594_v5  ;;  %v7600_v58 = vadd.f32 1.0, %v11239_v14  ;;  %v14533_v25 = vadd.f32 %v7004_v4, %v14427_v53  ;;  %v9117_v37 = vmul.f32 -1.442695, %v9798_v11 }
 0x742   : > { %v11243_v50 = vpop.eup %11242  ;;  %11262 = vrcp.f32 %v7609_v43  ;;  %v7601_v49 = vadd.f32 1.0, %v11241_v15  ;;  %v14535_v27 = vadd.f32 %v9547_v28, %v9546_v47  ;;  %v7008_v34 = vpop.f32.mrb[204].mxu1  ;;  %v9132_v5 = vmul.f32 -1.442695, %v14513_v16 }
 0x743   : > { %v11245_v60 = vpop.eup %11244  ;;  %11264 = vrcp.f32 %v7600_v58  ;;  %v7616_v45 = vadd.f32 1.0, %v11243_v50  ;;  %v14546_v1 = vadd.f32 %v7008_v34, %v14425_v54  ;;  %v7010_v7 = vpop.f32.mrb[205].mxu1  ;;  %v9123_v32 = vmul.f32 -1.442695, %v14518_v52 }
 0x744   : > { %v11247_v44 = vpop.eup %11246  ;;  %v9236_v56 = vpack.c.bf16 %v11245_v60, %v11245_v60  ;;  %11266 = vrcp.f32 %v7601_v49  ;;  %v14551_v20 = vadd.f32 %v7010_v7, %v14427_v53  ;;  %v7012_v59 = vpop.f32.mrb[206].mxu1 }
 0x745   : > { %v11249_v12 = vpop.eup %11248  ;;  %11268 = vrcp.f32 %v7616_v45  ;;  %v14557_v40 = vadd.f32 %v7012_v59, %v14425_v54  ;;  %v7014_v39 = vpop.f32.mrb[207].mxu1  ;;  %v9116_v54 = vmul.f32 -1.442695, %v9797_v9 }
 0x746   : > { %v11251_v30 = vpop.eup %11250  ;;  %8259 = vst.msk [vmem:[%s14191_s30 + $0xa4] sm:$0xf] %vm8238_vm4, %v9236_v56  ;;  %v9231_v18 = vpack.c.bf16 %v11249_v12, %v11247_v44  ;;  %11270 = vpow2.f32 %v9095_v3  ;;  %v14562_v35 = vadd.f32 %v7014_v39, %v14427_v53  ;;  %v9130_v39 = vmul.f32 -1.442695, %v14530_v24 }
 0x747   : > { %v11253_v63 = vpop.eup %11252  ;;  %v9240_v22 = vpack.c.bf16 %v11251_v30, %v11251_v30  ;;  %11272 = vpow2.f32 %v9096_v19  ;;  %v9144_v24 = vmul.f32 -1.442695, %v14557_v40 }
 0x748   : > { %v11255_v57 = vpop.eup %11254  ;;  %8254 = vst [vmem:[%s14191_s30 + $0x80] sm:$0xff] %v9231_v18  ;;  %11274 = vpow2.f32 %v9111_v2 }
 0x749   : > { %v11257_v42 = vpop.eup %11256  ;;  %8263 = vst.msk [vmem:[%s14191_s30 + $0xc0] sm:$0xf] %vm8238_vm4, %v9240_v22  ;;  %v9235_v46 = vpack.c.bf16 %v11255_v57, %v11253_v63  ;;  %11276 = vpow2.f32 %v9102_v6 }
 0x74a   : > { %v11259_v8 = vpop.eup %11258  ;;  %v9244_v51 = vpack.c.bf16 %v11257_v42, %v11257_v42  ;;  %11278 = vpow2.f32 %v9103_v17  ;;  %v9479_v3 = vpop.f32.mrb[208].mxu1 }
 0x74b   : > { %v11261_v61 = vpop.eup %11260  ;;  %8258 = vst [vmem:[%s14191_s30 + $0x9c] sm:$0xff] %v9235_v46  ;;  %11280 = vpow2.f32 %v9118_v29  ;;  %v9480_v47 = vpop.f32.mrb[209].mxu1  ;;  %v9131_v46 = vmul.f32 -1.442695, %v14533_v25 }
 0x74c   : > { %v11263_v33 = vpop.eup %11262  ;;  %8267 = vst.msk [vmem:[%s14191_s30 + $0xdc] sm:$0xf] %vm8238_vm4, %v9244_v51  ;;  %v9239_v48 = vpack.c.bf16 %v11261_v61, %v11259_v8  ;;  %11282 = vpow2.f32 %v9109_v38  ;;  %v9481_v21 = vadd.f32 %v9480_v47, %v9479_v3  ;;  %v9482_v4 = vpop.f32.mrb[210].mxu1  ;;  %v9124_v38 = vmul.f32 -1.442695, %v14521_v36 }
 0x74d   : > { %v11265_v55 = vpop.eup %11264  ;;  %v9248_v53 = vpack.c.bf16 %v11263_v33, %v11263_v33  ;;  %11284 = vpow2.f32 %v9110_v13  ;;  %v9483_v16 = vpop.f32.mrb[211].mxu1  ;;  %v9137_v51 = vmul.f32 -1.442695, %v14546_v1 }
 0x74e   : > { %v11267_v10 = vpop.eup %11266  ;;  %8262 = vst [vmem:[%s14191_s30 + $0xb8] sm:$0xff] %v9239_v48  ;;  %11286 = vpow2.f32 %v9125_v41  ;;  %v7108_v50 = vadd.f32 %v9481_v21, %v14415_v31  ;;  %v9484_v52 = vadd.f32 %v9483_v16, %v9482_v4  ;;  %v9145_v48 = vmul.f32 -1.442695, %v14562_v35 }
 0x74f   : > { %v11269_v14 = vpop.eup %11268  ;;  %8271 = vst.msk [vmem:[%s14191_s30 + $0xf8] sm:$0xf] %vm8238_vm4, %v9248_v53  ;;  %v9243_v43 = vpack.c.bf16 %v11267_v10, %v11265_v55  ;;  %11288 = vpow2.f32 %v9116_v54  ;;  %v9138_v54 = vmul.f32 -1.442695, %v14551_v20 }
 0x750   : > { %v11271_v28 = vpop.eup %11270  ;;  %v9252_v15 = vpack.c.bf16 %v11269_v14, %v11269_v14  ;;  %11290 = vpow2.f32 %v9117_v37  ;;  %v7205_v44 = vadd.f32 %v14525_v23, %v7108_v50  ;;  %v7111_v56 = vadd.f32 %v9484_v52, %v14415_v31 }
 0x751   : > { %v11273_v58 = vpop.eup %11272  ;;  %8266 = vst [vmem:[%s14191_s30 + $0xd4] sm:$0xff] %v9243_v43  ;;  %v7607_v62 = vadd.f32 1.0, %v11271_v28  ;;  %11292 = vpow2.f32 %v9132_v5 }
 0x752   : > { %v11275_v49 = vpop.eup %11274  ;;  %8275 = vst.msk [vmem:[%s14191_s30 + $0x114] sm:$0xf] %vm8238_vm4, %v9252_v15  ;;  %v7608_v60 = vadd.f32 1.0, %v11273_v58  ;;  %11294 = vpow2.f32 %v9123_v32  ;;  %v7208_v17 = vadd.f32 %v14535_v27, %v7111_v56  ;;  %v9139_v55 = vmul.f32 -1.442695, %v7205_v44 }
 0x753   : > { %v11277_v45 = vpop.eup %11276  ;;  %11296 = vrcp.f32 %v7607_v62  ;;  %v7623_v19 = vadd.f32 1.0, %v11275_v49 }
 0x754   : > { %v11279_v2 = vpop.eup %11278  ;;  %11298 = vrcp.f32 %v7608_v60  ;;  %v7614_v0 = vadd.f32 1.0, %v11277_v45  ;;  %v9146_v20 = vmul.f32 -1.442695, %v7208_v17 }
 0x755   : > { %v11281_v12 = vpop.eup %11280  ;;  %11300 = vrcp.f32 %v7623_v19  ;;  %v7615_v6 = vadd.f32 1.0, %v11279_v2 }
 0x756   : > { %v11283_v26 = vpop.eup %11282  ;;  %11302 = vrcp.f32 %v7614_v0  ;;  %v7630_v34 = vadd.f32 1.0, %v11281_v12 }
 0x757   : > { %v11285_v30 = vpop.eup %11284  ;;  %11304 = vrcp.f32 %v7615_v6  ;;  %v7621_v18 = vadd.f32 1.0, %v11283_v26 }
 0x758   : > { %v11287_v29 = vpop.eup %11286  ;;  %11306 = vrcp.f32 %v7630_v34  ;;  %v7622_v7 = vadd.f32 1.0, %v11285_v30 }
 0x759   : > { %v11289_v23 = vpop.eup %11288  ;;  %11308 = vrcp.f32 %v7621_v18  ;;  %v7637_v31 = vadd.f32 1.0, %v11287_v29 }
 0x75a   : > { %v11291_v63 = vpop.eup %11290  ;;  %11310 = vrcp.f32 %v7622_v7  ;;  %v7628_v22 = vadd.f32 1.0, %v11289_v23 }
 0x75b   : > { %v11293_v9 = vpop.eup %11292  ;;  %11312 = vrcp.f32 %v7637_v31  ;;  %v7629_v59 = vadd.f32 1.0, %v11291_v63 }
 0x75c   : > { %v11295_v57 = vpop.eup %11294  ;;  %11314 = vrcp.f32 %v7628_v22  ;;  %v7644_v27 = vadd.f32 1.0, %v11293_v9 }
 0x75d   : > { %v11297_v11 = vpop.eup %11296  ;;  %11316 = vrcp.f32 %v7629_v59  ;;  %v7635_v32 = vadd.f32 1.0, %v11295_v57 }
 0x75e   : > { %v11299_v42 = vpop.eup %11298  ;;  %11318 = vrcp.f32 %v7644_v27 }
 0x75f   : > { %v11301_v13 = vpop.eup %11300  ;;  %v9247_v8 = vpack.c.bf16 %v11299_v42, %v11297_v11  ;;  %11320 = vpow2.f32 %v9124_v38 }
 0x760   : > { %v11303_v41 = vpop.eup %11302  ;;  %v9256_v61 = vpack.c.bf16 %v11301_v13, %v11301_v13  ;;  %11322 = vpow2.f32 %v9130_v39 }
 0x761   : > { %v11305_v36 = vpop.eup %11304  ;;  %8270 = vst [vmem:[%s14191_s30 + $0xf0] sm:$0xff] %v9247_v8  ;;  %11324 = vpow2.f32 %v9131_v46 }
 0x762   : > { %v11307_v33 = vpop.eup %11306  ;;  %8279 = vst.msk [vmem:[%s14191_s30 + $0x130] sm:$0xf] %vm8238_vm4, %v9256_v61  ;;  %v9251_v25 = vpack.c.bf16 %v11305_v36, %v11303_v41  ;;  %11326 = vpow2.f32 %v9137_v51 }
 0x763   : > { %v11309_v1 = vpop.eup %11308  ;;  %v9260_v37 = vpack.c.bf16 %v11307_v33, %v11307_v33  ;;  %11328 = vpow2.f32 %v9138_v54 }
 0x764   : > { %v11311_v53 = vpop.eup %11310  ;;  %8274 = vst [vmem:[%s14191_s30 + $0x10c] sm:$0xff] %v9251_v25  ;;  %11330 = vpow2.f32 %v9144_v24 }
 0x765   : > { %v11313_v5 = vpop.eup %11312  ;;  %8283 = vst.msk [vmem:[%s14191_s30 + $0x14c] sm:$0xf] %vm8238_vm4, %v9260_v37  ;;  %v9255_v40 = vpack.c.bf16 %v11311_v53, %v11309_v1  ;;  %11332 = vpow2.f32 %v9145_v48 }
 0x766   : > { %v11315_v3 = vpop.eup %11314  ;;  %v9264_v10 = vpack.c.bf16 %v11313_v5, %v11313_v5  ;;  %11334 = vpow2.f32 %v9139_v55 }
 0x767   : > { %v11317_v35 = vpop.eup %11316  ;;  %8278 = vst [vmem:[%s14191_s30 + $0x128] sm:$0xff] %v9255_v40  ;;  %11336 = vpow2.f32 %v9146_v20 }
 0x768   : > { %v11319_v47 = vpop.eup %11318  ;;  %8287 = vst.msk [vmem:[%s14191_s30 + $0x168] sm:$0xf] %vm8238_vm4, %v9264_v10  ;;  %v9259_v14 = vpack.c.bf16 %v11317_v35, %v11315_v3  ;;  %11338 = vrcp.f32 %v7635_v32 }
 0x769   : > { %v9268_v43 = vpack.c.bf16 %v11319_v47, %v11319_v47  ;;  %v11321_v21 = vpop.eup %11320 }
 0x76a   : > { %8282 = vst [vmem:[%s14191_s30 + $0x144] sm:$0xff] %v9259_v14  ;;  %v11323_v4 = vpop.eup %11322  ;;  %v7636_v28 = vadd.f32 1.0, %v11321_v21 }
 0x76b   : > { %8291 = vst.msk [vmem:[%s14191_s30 + $0x184] sm:$0xf] %vm8238_vm4, %v9268_v43  ;;  %v11325_v15 = vpop.eup %11324  ;;  %v7642_v16 = vadd.f32 1.0, %v11323_v4 }
 0x76c   : > { %v11327_v58 = vpop.eup %11326  ;;  %11340 = vrcp.f32 %v7636_v28  ;;  %v7643_v62 = vadd.f32 1.0, %v11325_v15 }
 0x76d   : > { %v11329_v50 = vpop.eup %11328  ;;  %11342 = vrcp.f32 %v7642_v16  ;;  %v7649_v52 = vadd.f32 1.0, %v11327_v58 }
 0x76e   : > { %v11331_v49 = vpop.eup %11330  ;;  %11344 = vrcp.f32 %v7643_v62  ;;  %v7650_v60 = vadd.f32 1.0, %v11329_v50 }
 0x76f   : > { %v11333_v45 = vpop.eup %11332  ;;  %11346 = vrcp.f32 %v7649_v52  ;;  %v7656_v19 = vadd.f32 1.0, %v11331_v49 }
 0x770   : > { %v11335_v44 = vpop.eup %11334  ;;  %11348 = vrcp.f32 %v7650_v60  ;;  %v7657_v56 = vadd.f32 1.0, %v11333_v45 }
 0x771   : > { %v11337_v2 = vpop.eup %11336  ;;  %11350 = vrcp.f32 %v7656_v19  ;;  %v7651_v0 = vadd.f32 1.0, %v11335_v44 }
 0x772   : > { %11352 = vrcp.f32 %v7657_v56  ;;  %v7658_v12 = vadd.f32 1.0, %v11337_v2  ;;  %v11339_v6 = vpop.eup %11338 }
 0x773   : > { %11354 = vrcp.f32 %v7651_v0 }
 0x774   : > { %11356 = vrcp.f32 %v7658_v12 }
 0x776   : > { %v11341_v17 = vpop.eup %11340 }
 0x777   : > { %v11343_v26 = vpop.eup %11342  ;;  %v9263_v34 = vpack.c.bf16 %v11341_v17, %v11339_v6 }
 0x778   : > { %v11345_v30 = vpop.eup %11344 }
 0x779   : > { %v11347_v18 = vpop.eup %11346  ;;  %8286 = vst [vmem:[%s14191_s30 + $0x160] sm:$0xff] %v9263_v34  ;;  %v9267_v29 = vpack.c.bf16 %v11345_v30, %v11343_v26 }
 0x77a   : > { %v11349_v7 = vpop.eup %11348 }
 0x77b   : > { %v11351_v23 = vpop.eup %11350  ;;  %8290 = vst [vmem:[%s14191_s30 + $0x17c] sm:$0xff] %v9267_v29  ;;  %v9271_v31 = vpack.c.bf16 %v11349_v7, %v11347_v18 }
 0x77c   : > { %v11353_v63 = vpop.eup %11352 }
 0x77d   : > { %v11355_v22 = vpop.eup %11354  ;;  %8294 = vst [vmem:[%s14191_s30 + $0x198] sm:$0xff] %v9271_v31  ;;  %v9275_v9 = vpack.c.bf16 %v11353_v63, %v11351_v23 }
 0x77e   : > { %v11357_v59 = vpop.eup %11356  ;;  %v9272_v57 = vpack.c.bf16 %v11355_v22, %v11355_v22 }
 0x77f   : > { %8298 = vst [vmem:[%s14191_s30 + $0x1b4] sm:$0xff] %v9275_v9  ;;  %v9276_v27 = vpack.c.bf16 %v11357_v59, %v11357_v59 }
 0x780   : > { %8295 = vst.msk [vmem:[%s14191_s30 + $0x1a0] sm:$0xf] %vm8238_vm4, %v9272_v57 }
 0x781   : > { %8299 = vst.msk [vmem:[%s14191_s30 + $0x1bc] sm:$0xf] %vm8238_vm4, %v9276_v27 }
 0x782 PF: > { %s27_s21 = sadd.s32 1, %s11373_s21  }
 0x783   : > { %p24_p4 = scmp.ge.s32.totalorder %s27_s21, 4  }
 0x785   :  { %26 = sbr.rel (!%p24_p4) target bundleno = 2 (0x2), region = 133 }

</bundles_post_ra>
